<compile_context>
chip_gen: v6e
topology: v6e:2x2x1
jax: 0.10.0
libtpu: 0.0.40
codegen_flags: <defaults>
</compile_context>

<pallas_src>
import functools

import jax
import jax.numpy as jnp
from jax import lax
from jax.experimental import pallas as pl
from jax.experimental.pallas import tpu as pltpu


def _resblock_kernel(x_ref, w1_ref, b1_ref, w2_ref, b2_ref, out_ref, xs_ref,
                     *, W, PAD):
    """One batch element per grid step.

    x_ref   : (C, H*W)            f32   input, spatially flattened (lane-dense)
    w1_ref  : (C, 9*C)            bf16  conv1 weights, [co, (dy*3+dx)*C + ci]
    b1_ref  : (C, 1)              f32
    w2_ref  : (C, 9*C)            bf16
    b2_ref  : (C, 1)              f32
    out_ref : (C, H*W)            f32
    xs_ref  : (C, 2*PAD + H*W)    bf16  scratch; activation lives at [:, PAD:PAD+H*W],
                                        the PAD-wide borders stay zero so taps that
                                        fall outside the image read zeros.
    """
    C = x_ref.shape[0]
    HW = x_ref.shape[1]

    # Column-validity masks for the horizontal tap offsets dx-1 in {-1, 0, +1}.
    # They kill values that bleed across row boundaries in the flattened layout.
    col = lax.broadcasted_iota(jnp.int32, (1, HW), 1) % W
    wmask = {0: col >= 1, 2: col <= W - 2}          # dx == 1 needs no mask

    def conv3x3(w_ref, b_ref):
        # im2col: 9 shifted copies of the activation stacked along K, then a single
        # (C, 9C) x (9C, HW) bf16 MXU matmul with f32 accumulation.
        pieces = []
        for dy in range(3):
            for dx in range(3):
                start = PAD + (dy - 1) * W + (dx - 1)
                p = xs_ref[:, start:start + HW]      # (C, HW) bf16, unaligned lane slice
                if dx != 1:
                    p = jnp.where(wmask[dx], p, 0.0)
                pieces.append(p)
        patch = jnp.concatenate(pieces, axis=0)      # (9C, HW) bf16
        acc = jnp.dot(w_ref[...], patch,
                      preferred_element_type=jnp.float32)   # (C, HW) f32
        return acc + b_ref[...]                      # bias broadcast along lanes

    # Keep the zero borders (cheap: 2*PAD lanes; the interior is overwritten below).
    zero_border = jnp.zeros((C, PAD), jnp.bfloat16)
    xs_ref[:, :PAD] = zero_border
    xs_ref[:, PAD + HW:] = zero_border

    # ---- conv1 + bias + ReLU -------------------------------------------------
    x_f32 = x_ref[...]                               # identity, kept in f32
    xs_ref[:, PAD:PAD + HW] = x_f32.astype(jnp.bfloat16)
    y = jnp.maximum(conv3x3(w1_ref, b1_ref), 0.0)    # (C, HW) f32

    # ---- conv2 + bias + residual ----------------------------------------------
    xs_ref[:, PAD:PAD + HW] = y.astype(jnp.bfloat16)
    out = x_f32 + conv3x3(w2_ref, b2_ref)
    out_ref[...] = out.astype(out_ref.dtype)


def residual_block_nobn(x_nchw, w1_hwio, b1, w2_hwio, b2):
    """x_nchw: (N, C, H, W) float32; weights HWIO (3, 3, C, C); biases (C,)."""
    N, C, H, W = x_nchw.shape
    HW = H * W
    PAD = ((W + 1 + 127) // 128) * 128               # lane-aligned halo width >= W+1

    # Free contiguous reshape; trailing dim H*W is lane-dense.  No transposes, no pad.
    x_flat = x_nchw.reshape(N, C, HW)

    # Conv weights as a single (Cout, 9*Cin) im2col matrix, bf16 for the MXU.
    def to_2d(w_hwio):
        return (jnp.transpose(w_hwio, (3, 0, 1, 2))  # (co, dy, dx, ci)
                .reshape(C, 9 * C).astype(jnp.bfloat16))

    w1_2d, w2_2d = to_2d(w1_hwio), to_2d(w2_hwio)
    b1_c1 = b1.reshape(C, 1).astype(jnp.float32)
    b2_c1 = b2.reshape(C, 1).astype(jnp.float32)

    kernel = functools.partial(_resblock_kernel, W=W, PAD=PAD)

    out_flat = pl.pallas_call(
        kernel,
        out_shape=jax.ShapeDtypeStruct((N, C, HW), x_nchw.dtype),
        grid_spec=pltpu.PrefetchScalarGridSpec(
            num_scalar_prefetch=0,
            grid=(N,),
            in_specs=[
                pl.BlockSpec((None, C, HW), lambda n: (n, 0, 0)),
                pl.BlockSpec((C, 9 * C), lambda n: (0, 0)),
                pl.BlockSpec((C, 1), lambda n: (0, 0)),
                pl.BlockSpec((C, 9 * C), lambda n: (0, 0)),
                pl.BlockSpec((C, 1), lambda n: (0, 0)),
            ],
            out_specs=pl.BlockSpec((None, C, HW), lambda n: (n, 0, 0)),
            scratch_shapes=[pltpu.VMEM((C, 2 * PAD + HW), jnp.bfloat16)],
        ),
        compiler_params=pltpu.CompilerParams(
            dimension_semantics=("parallel",),
            vmem_limit_bytes=32 * 1024 * 1024,
        ),
    )(x_flat, w1_2d, b1_c1, w2_2d, b2_c1)

    return out_flat.reshape(N, C, H, W)


def _reference(x_nchw, w1, b1, w2, b2):
    """Pure-JAX f32 reference (same math as the PyTorch module)."""
    x = jnp.transpose(x_nchw, (0, 2, 3, 1))
    dn = ('NHWC', 'HWIO', 'NHWC')
    y = lax.conv_general_dilated(x, w1, (1, 1), 'SAME', dimension_numbers=dn) + b1
    y = jnp.maximum(y, 0.0)
    y = lax.conv_general_dilated(y, w2, (1, 1), 'SAME', dimension_numbers=dn) + b2
    return jnp.transpose(x + y, (0, 3, 1, 2))


if __name__ == "__main__":
    # Small shapes consistent with the module (nf=64 default, square spatial map).
    N, C, H, W = 2, 64, 16, 16

    key = jax.random.PRNGKey(0)
    kx, k1, k2 = jax.random.split(key, 3)

    x = jax.random.normal(kx, (N, C, H, W), dtype=jnp.float32)

    # Deterministic init mimicking arch_util.initialize_weights(scale=0.1):
    # kaiming-style normal scaled by 0.1, zero biases.  Weights stored as HWIO.
    fan_in = 3 * 3 * C
    std = (2.0 / fan_in) ** 0.5
    w1 = jax.random.normal(k1, (3, 3, C, C), dtype=jnp.float32) * std * 0.1
    w2 = jax.random.normal(k2, (3, 3, C, C), dtype=jnp.float32) * std * 0.1
    b1 = jnp.zeros((C,), jnp.float32)
    b2 = jnp.zeros((C,), jnp.float32)

    out = jax.block_until_ready(residual_block_nobn(x, w1, b1, w2, b2))
    ref = jax.block_until_ready(_reference(x, w1, b1, w2, b2))

    assert out.shape == (N, C, H, W)
    max_err = float(jnp.max(jnp.abs(out - ref)))
    # bf16 MXU operands vs. f32 reference -> small deltas expected.
    assert jnp.allclose(out, ref, atol=2e-2, rtol=2e-2), max_err

    print("KERNEL_OK")
</pallas_src>

<mosaic_0001>
module attributes {stable_mosaic.version = 11 : i64} {
  func.func @_resblock_kernel(%arg0: i32, %arg1: memref<1x64x256xf32, #tpu.memory_space<vmem>>, %arg2: memref<64x576xbf16, #tpu.memory_space<vmem>>, %arg3: memref<64x1xf32, #tpu.memory_space<vmem>>, %arg4: memref<64x576xbf16, #tpu.memory_space<vmem>>, %arg5: memref<64x1xf32, #tpu.memory_space<vmem>>, %arg6: memref<1x64x256xf32, #tpu.memory_space<vmem>>, %arg7: memref<64x512xbf16, #tpu.memory_space<vmem>>) attributes {dimension_semantics = [#tpu.dimension_semantics<parallel>], iteration_bounds = array<i64: 2>, scalar_prefetch = 0 : i64, scratch_operands = 1 : i64, tpu.core_type = #tpu.core_type<tc>, window_params = [{transform_indices = @transform_0, window_bounds = array<i64: 1, 64, 256>}, {pipeline_mode = #tpu.pipeline_mode<synchronous>, transform_indices = @transform_1, window_bounds = array<i64: 64, 576>}, {pipeline_mode = #tpu.pipeline_mode<synchronous>, transform_indices = @transform_2, window_bounds = array<i64: 64, 1>}, {pipeline_mode = #tpu.pipeline_mode<synchronous>, transform_indices = @transform_3, window_bounds = array<i64: 64, 576>}, {pipeline_mode = #tpu.pipeline_mode<synchronous>, transform_indices = @transform_4, window_bounds = array<i64: 64, 1>}, {transform_indices = @transform_5, window_bounds = array<i64: 1, 64, 256>}]} {
    %0 = tpu.iota {dimensions = array<i32: 1>} : vector<1x256xi32>
    %c16_i32 = arith.constant 16 : i32
    %c0_i32 = arith.constant 0 : i32
    %1 = arith.cmpi eq, %c16_i32, %c0_i32 : i32
    %c1_i32 = arith.constant 1 : i32
    %2 = arith.select %1, %c1_i32, %c16_i32 : i32
    %3 = vector.broadcast %2 : i32 to vector<1x256xi32>
    %4 = arith.remsi %0, %3 : vector<1x256xi32>
    %c0_i32_0 = arith.constant 0 : i32
    %5 = vector.broadcast %c0_i32_0 : i32 to vector<1x256xi32>
    %6 = arith.cmpi ne, %4, %5 : vector<1x256xi32>
    %c0_i32_1 = arith.constant 0 : i32
    %7 = vector.broadcast %c0_i32_1 : i32 to vector<1x256xi32>
    %8 = arith.cmpi slt, %4, %7 : vector<1x256xi32>
    %c0_i32_2 = arith.constant 0 : i32
    %9 = arith.cmpi slt, %2, %c0_i32_2 : i32
    %10 = vector.broadcast %9 : i1 to vector<1x256xi1>
    %11 = vector.broadcast %10 : vector<1x256xi1> to vector<1x256xi1>
    %12 = arith.xori %8, %11 : vector<1x256xi1>
    %13 = arith.andi %12, %6 : vector<1x256xi1>
    %14 = vector.broadcast %2 : i32 to vector<1x256xi32>
    %15 = arith.addi %4, %14 : vector<1x256xi32>
    %16 = arith.select %13, %15, %4 : vector<1x256xi1>, vector<1x256xi32>
    %c1_i32_3 = arith.constant 1 : i32
    %17 = vector.broadcast %c1_i32_3 : i32 to vector<1x256xi32>
    %18 = arith.cmpi sge, %16, %17 : vector<1x256xi32>
    %c14_i32 = arith.constant 14 : i32
    %19 = vector.broadcast %c14_i32 : i32 to vector<1x256xi32>
    %20 = arith.cmpi sle, %16, %19 : vector<1x256xi32>
    %cst = arith.constant 0.000000e+00 : bf16
    %21 = vector.broadcast %cst : bf16 to vector<64x128xbf16>
    %c0 = arith.constant 0 : index
    %c0_4 = arith.constant 0 : index
    %22 = vector.load %arg7[%c0, %c0_4] : memref<64x512xbf16, #tpu.memory_space<vmem>>, vector<64x128xbf16>
    tpu.vector_store %arg7[%c0, %c0_4], %21 {strides = array<i32>} : memref<64x512xbf16, #tpu.memory_space<vmem>>, vector<64x128xbf16>,
    %c0_5 = arith.constant 0 : index
    %c384 = arith.constant 384 : index
    %23 = vector.load %arg7[%c0_5, %c384] : memref<64x512xbf16, #tpu.memory_space<vmem>>, vector<64x128xbf16>
    tpu.vector_store %arg7[%c0_5, %c384], %21 {strides = array<i32>} : memref<64x512xbf16, #tpu.memory_space<vmem>>, vector<64x128xbf16>,
    %c0_6 = arith.constant 0 : index
    %c0_7 = arith.constant 0 : index
    %c0_8 = arith.constant 0 : index
    %24 = vector.load %arg1[%c0_6, %c0_7, %c0_8] : memref<1x64x256xf32, #tpu.memory_space<vmem>>, vector<1x64x256xf32>
    %25 = vector.shape_cast %24 : vector<1x64x256xf32> to vector<64x256xf32>
    %26 = arith.truncf %25 : vector<64x256xf32> to vector<64x256xbf16>
    %c0_9 = arith.constant 0 : index
    %c128 = arith.constant 128 : index
    %27 = vector.load %arg7[%c0_9, %c128] : memref<64x512xbf16, #tpu.memory_space<vmem>>, vector<64x256xbf16>
    tpu.vector_store %arg7[%c0_9, %c128], %26 {strides = array<i32>} : memref<64x512xbf16, #tpu.memory_space<vmem>>, vector<64x256xbf16>,
    %c0_10 = arith.constant 0 : index
    %c111 = arith.constant 111 : index
    %28 = vector.load %arg7[%c0_10, %c111] : memref<64x512xbf16, #tpu.memory_space<vmem>>, vector<64x256xbf16>
    %cst_11 = arith.constant 0.000000e+00 : f32
    %29 = arith.truncf %cst_11 : f32 to bf16
    %30 = vector.shape_cast %18 : vector<1x256xi1> to vector<1x256xi1>
    %31 = vector.broadcast %30 : vector<1x256xi1> to vector<64x256xi1>
    %32 = vector.broadcast %29 : bf16 to vector<64x256xbf16>
    %33 = arith.select %31, %28, %32 : vector<64x256xi1>, vector<64x256xbf16>
    %c0_12 = arith.constant 0 : index
    %c112 = arith.constant 112 : index
    %34 = vector.load %arg7[%c0_12, %c112] : memref<64x512xbf16, #tpu.memory_space<vmem>>, vector<64x256xbf16>
    %c0_13 = arith.constant 0 : index
    %c113 = arith.constant 113 : index
    %35 = vector.load %arg7[%c0_13, %c113] : memref<64x512xbf16, #tpu.memory_space<vmem>>, vector<64x256xbf16>
    %cst_14 = arith.constant 0.000000e+00 : f32
    %36 = arith.truncf %cst_14 : f32 to bf16
    %37 = vector.shape_cast %20 : vector<1x256xi1> to vector<1x256xi1>
    %38 = vector.broadcast %37 : vector<1x256xi1> to vector<64x256xi1>
    %39 = vector.broadcast %36 : bf16 to vector<64x256xbf16>
    %40 = arith.select %38, %35, %39 : vector<64x256xi1>, vector<64x256xbf16>
    %c0_15 = arith.constant 0 : index
    %c127 = arith.constant 127 : index
    %41 = vector.load %arg7[%c0_15, %c127] : memref<64x512xbf16, #tpu.memory_space<vmem>>, vector<64x256xbf16>
    %cst_16 = arith.constant 0.000000e+00 : f32
    %42 = arith.truncf %cst_16 : f32 to bf16
    %43 = vector.shape_cast %18 : vector<1x256xi1> to vector<1x256xi1>
    %44 = vector.broadcast %43 : vector<1x256xi1> to vector<64x256xi1>
    %45 = vector.broadcast %42 : bf16 to vector<64x256xbf16>
    %46 = arith.select %44, %41, %45 : vector<64x256xi1>, vector<64x256xbf16>
    %c0_17 = arith.constant 0 : index
    %c128_18 = arith.constant 128 : index
    %47 = vector.load %arg7[%c0_17, %c128_18] : memref<64x512xbf16, #tpu.memory_space<vmem>>, vector<64x256xbf16>
    %c0_19 = arith.constant 0 : index
    %c129 = arith.constant 129 : index
    %48 = vector.load %arg7[%c0_19, %c129] : memref<64x512xbf16, #tpu.memory_space<vmem>>, vector<64x256xbf16>
    %cst_20 = arith.constant 0.000000e+00 : f32
    %49 = arith.truncf %cst_20 : f32 to bf16
    %50 = vector.shape_cast %20 : vector<1x256xi1> to vector<1x256xi1>
    %51 = vector.broadcast %50 : vector<1x256xi1> to vector<64x256xi1>
    %52 = vector.broadcast %49 : bf16 to vector<64x256xbf16>
    %53 = arith.select %51, %48, %52 : vector<64x256xi1>, vector<64x256xbf16>
    %c0_21 = arith.constant 0 : index
    %c143 = arith.constant 143 : index
    %54 = vector.load %arg7[%c0_21, %c143] : memref<64x512xbf16, #tpu.memory_space<vmem>>, vector<64x256xbf16>
    %cst_22 = arith.constant 0.000000e+00 : f32
    %55 = arith.truncf %cst_22 : f32 to bf16
    %56 = vector.shape_cast %18 : vector<1x256xi1> to vector<1x256xi1>
    %57 = vector.broadcast %56 : vector<1x256xi1> to vector<64x256xi1>
    %58 = vector.broadcast %55 : bf16 to vector<64x256xbf16>
    %59 = arith.select %57, %54, %58 : vector<64x256xi1>, vector<64x256xbf16>
    %c0_23 = arith.constant 0 : index
    %c144 = arith.constant 144 : index
    %60 = vector.load %arg7[%c0_23, %c144] : memref<64x512xbf16, #tpu.memory_space<vmem>>, vector<64x256xbf16>
    %c0_24 = arith.constant 0 : index
    %c145 = arith.constant 145 : index
    %61 = vector.load %arg7[%c0_24, %c145] : memref<64x512xbf16, #tpu.memory_space<vmem>>, vector<64x256xbf16>
    %cst_25 = arith.constant 0.000000e+00 : f32
    %62 = arith.truncf %cst_25 : f32 to bf16
    %63 = vector.shape_cast %20 : vector<1x256xi1> to vector<1x256xi1>
    %64 = vector.broadcast %63 : vector<1x256xi1> to vector<64x256xi1>
    %65 = vector.broadcast %62 : bf16 to vector<64x256xbf16>
    %66 = arith.select %64, %61, %65 : vector<64x256xi1>, vector<64x256xbf16>
    %67 = tpu.concatenate %33, %34, %40, %46, %47, %53, %59, %60, %66 in 0 : vector<64x256xbf16>, vector<64x256xbf16>, vector<64x256xbf16>, vector<64x256xbf16>, vector<64x256xbf16>, vector<64x256xbf16>, vector<64x256xbf16>, vector<64x256xbf16>, vector<64x256xbf16> -> vector<576x256xbf16>
    %c0_26 = arith.constant 0 : index
    %c0_27 = arith.constant 0 : index
    %68 = vector.load %arg2[%c0_26, %c0_27] : memref<64x576xbf16, #tpu.memory_space<vmem>>, vector<64x576xbf16>
    %cst_28 = arith.constant dense<0.000000e+00> : vector<64x256xf32>
    %69 = tpu.matmul %68, %67, %cst_28 {dimension_numbers = #tpu.dot_dimension_numbers<[1], [0], [0], [1], [0, 0, 1, 1], [], []>} : vector<64x576xbf16>, vector<576x256xbf16>, vector<64x256xf32> -> vector<64x256xf32>
    %c0_29 = arith.constant 0 : index
    %c0_30 = arith.constant 0 : index
    %70 = vector.load %arg3[%c0_29, %c0_30] : memref<64x1xf32, #tpu.memory_space<vmem>>, vector<64x1xf32>
    %71 = vector.broadcast %70 : vector<64x1xf32> to vector<64x256xf32>
    %72 = arith.addf %69, %71 : vector<64x256xf32>
    %cst_31 = arith.constant 0.000000e+00 : f32
    %73 = vector.broadcast %cst_31 : f32 to vector<64x256xf32>
    %74 = arith.maximumf %72, %73 : vector<64x256xf32>
    %75 = arith.truncf %74 : vector<64x256xf32> to vector<64x256xbf16>
    %c0_32 = arith.constant 0 : index
    %c128_33 = arith.constant 128 : index
    %76 = vector.load %arg7[%c0_32, %c128_33] : memref<64x512xbf16, #tpu.memory_space<vmem>>, vector<64x256xbf16>
    tpu.vector_store %arg7[%c0_32, %c128_33], %75 {strides = array<i32>} : memref<64x512xbf16, #tpu.memory_space<vmem>>, vector<64x256xbf16>,
    %c0_34 = arith.constant 0 : index
    %c111_35 = arith.constant 111 : index
    %77 = vector.load %arg7[%c0_34, %c111_35] : memref<64x512xbf16, #tpu.memory_space<vmem>>, vector<64x256xbf16>
    %cst_36 = arith.constant 0.000000e+00 : f32
    %78 = arith.truncf %cst_36 : f32 to bf16
    %79 = vector.shape_cast %18 : vector<1x256xi1> to vector<1x256xi1>
    %80 = vector.broadcast %79 : vector<1x256xi1> to vector<64x256xi1>
    %81 = vector.broadcast %78 : bf16 to vector<64x256xbf16>
    %82 = arith.select %80, %77, %81 : vector<64x256xi1>, vector<64x256xbf16>
    %c0_37 = arith.constant 0 : index
    %c112_38 = arith.constant 112 : index
    %83 = vector.load %arg7[%c0_37, %c112_38] : memref<64x512xbf16, #tpu.memory_space<vmem>>, vector<64x256xbf16>
    %c0_39 = arith.constant 0 : index
    %c113_40 = arith.constant 113 : index
    %84 = vector.load %arg7[%c0_39, %c113_40] : memref<64x512xbf16, #tpu.memory_space<vmem>>, vector<64x256xbf16>
    %cst_41 = arith.constant 0.000000e+00 : f32
    %85 = arith.truncf %cst_41 : f32 to bf16
    %86 = vector.shape_cast %20 : vector<1x256xi1> to vector<1x256xi1>
    %87 = vector.broadcast %86 : vector<1x256xi1> to vector<64x256xi1>
    %88 = vector.broadcast %85 : bf16 to vector<64x256xbf16>
    %89 = arith.select %87, %84, %88 : vector<64x256xi1>, vector<64x256xbf16>
    %c0_42 = arith.constant 0 : index
    %c127_43 = arith.constant 127 : index
    %90 = vector.load %arg7[%c0_42, %c127_43] : memref<64x512xbf16, #tpu.memory_space<vmem>>, vector<64x256xbf16>
    %cst_44 = arith.constant 0.000000e+00 : f32
    %91 = arith.truncf %cst_44 : f32 to bf16
    %92 = vector.shape_cast %18 : vector<1x256xi1> to vector<1x256xi1>
    %93 = vector.broadcast %92 : vector<1x256xi1> to vector<64x256xi1>
    %94 = vector.broadcast %91 : bf16 to vector<64x256xbf16>
    %95 = arith.select %93, %90, %94 : vector<64x256xi1>, vector<64x256xbf16>
    %c0_45 = arith.constant 0 : index
    %c128_46 = arith.constant 128 : index
    %96 = vector.load %arg7[%c0_45, %c128_46] : memref<64x512xbf16, #tpu.memory_space<vmem>>, vector<64x256xbf16>
    %c0_47 = arith.constant 0 : index
    %c129_48 = arith.constant 129 : index
    %97 = vector.load %arg7[%c0_47, %c129_48] : memref<64x512xbf16, #tpu.memory_space<vmem>>, vector<64x256xbf16>
    %cst_49 = arith.constant 0.000000e+00 : f32
    %98 = arith.truncf %cst_49 : f32 to bf16
    %99 = vector.shape_cast %20 : vector<1x256xi1> to vector<1x256xi1>
    %100 = vector.broadcast %99 : vector<1x256xi1> to vector<64x256xi1>
    %101 = vector.broadcast %98 : bf16 to vector<64x256xbf16>
    %102 = arith.select %100, %97, %101 : vector<64x256xi1>, vector<64x256xbf16>
    %c0_50 = arith.constant 0 : index
    %c143_51 = arith.constant 143 : index
    %103 = vector.load %arg7[%c0_50, %c143_51] : memref<64x512xbf16, #tpu.memory_space<vmem>>, vector<64x256xbf16>
    %cst_52 = arith.constant 0.000000e+00 : f32
    %104 = arith.truncf %cst_52 : f32 to bf16
    %105 = vector.shape_cast %18 : vector<1x256xi1> to vector<1x256xi1>
    %106 = vector.broadcast %105 : vector<1x256xi1> to vector<64x256xi1>
    %107 = vector.broadcast %104 : bf16 to vector<64x256xbf16>
    %108 = arith.select %106, %103, %107 : vector<64x256xi1>, vector<64x256xbf16>
    %c0_53 = arith.constant 0 : index
    %c144_54 = arith.constant 144 : index
    %109 = vector.load %arg7[%c0_53, %c144_54] : memref<64x512xbf16, #tpu.memory_space<vmem>>, vector<64x256xbf16>
    %c0_55 = arith.constant 0 : index
    %c145_56 = arith.constant 145 : index
    %110 = vector.load %arg7[%c0_55, %c145_56] : memref<64x512xbf16, #tpu.memory_space<vmem>>, vector<64x256xbf16>
    %cst_57 = arith.constant 0.000000e+00 : f32
    %111 = arith.truncf %cst_57 : f32 to bf16
    %112 = vector.shape_cast %20 : vector<1x256xi1> to vector<1x256xi1>
    %113 = vector.broadcast %112 : vector<1x256xi1> to vector<64x256xi1>
    %114 = vector.broadcast %111 : bf16 to vector<64x256xbf16>
    %115 = arith.select %113, %110, %114 : vector<64x256xi1>, vector<64x256xbf16>
    %116 = tpu.concatenate %82, %83, %89, %95, %96, %102, %108, %109, %115 in 0 : vector<64x256xbf16>, vector<64x256xbf16>, vector<64x256xbf16>, vector<64x256xbf16>, vector<64x256xbf16>, vector<64x256xbf16>, vector<64x256xbf16>, vector<64x256xbf16>, vector<64x256xbf16> -> vector<576x256xbf16>
    %c0_58 = arith.constant 0 : index
    %c0_59 = arith.constant 0 : index
    %117 = vector.load %arg4[%c0_58, %c0_59] : memref<64x576xbf16, #tpu.memory_space<vmem>>, vector<64x576xbf16>
    %cst_60 = arith.constant dense<0.000000e+00> : vector<64x256xf32>
    %118 = tpu.matmul %117, %116, %cst_60 {dimension_numbers = #tpu.dot_dimension_numbers<[1], [0], [0], [1], [0, 0, 1, 1], [], []>} : vector<64x576xbf16>, vector<576x256xbf16>, vector<64x256xf32> -> vector<64x256xf32>
    %c0_61 = arith.constant 0 : index
    %c0_62 = arith.constant 0 : index
    %119 = vector.load %arg5[%c0_61, %c0_62] : memref<64x1xf32, #tpu.memory_space<vmem>>, vector<64x1xf32>
    %120 = vector.broadcast %119 : vector<64x1xf32> to vector<64x256xf32>
    %121 = arith.addf %118, %120 : vector<64x256xf32>
    %122 = arith.addf %25, %121 : vector<64x256xf32>
    %c0_63 = arith.constant 0 : index
    %c0_64 = arith.constant 0 : index
    %c0_65 = arith.constant 0 : index
    %123 = vector.load %arg6[%c0_63, %c0_64, %c0_65] : memref<1x64x256xf32, #tpu.memory_space<vmem>>, vector<1x64x256xf32>
    %124 = vector.shape_cast %123 : vector<1x64x256xf32> to vector<64x256xf32>
    %125 = vector.shape_cast %122 : vector<64x256xf32> to vector<1x64x256xf32>
    tpu.vector_store %arg6[%c0_63, %c0_64, %c0_65], %125 {strides = array<i32>} : memref<1x64x256xf32, #tpu.memory_space<vmem>>, vector<1x64x256xf32>,
    return
  }
  func.func @transform_0(%arg0: i32) -> (i32, i32, i32) {
    %c0_i32 = arith.constant 0 : i32
    %c0_i32_0 = arith.constant 0 : i32
    %c0_i32_1 = arith.constant 0 : i32
    return %arg0, %c0_i32, %c0_i32_0 : i32, i32, i32
  }
  func.func @transform_1(%arg0: i32) -> (i32, i32) {
    %c0_i32 = arith.constant 0 : i32
    %c0_i32_0 = arith.constant 0 : i32
    %c0_i32_1 = arith.constant 0 : i32
    return %c0_i32, %c0_i32_0 : i32, i32
  }
  func.func @transform_2(%arg0: i32) -> (i32, i32) {
    %c0_i32 = arith.constant 0 : i32
    %c0_i32_0 = arith.constant 0 : i32
    %c0_i32_1 = arith.constant 0 : i32
    return %c0_i32, %c0_i32_0 : i32, i32
  }
  func.func @transform_3(%arg0: i32) -> (i32, i32) {
    %c0_i32 = arith.constant 0 : i32
    %c0_i32_0 = arith.constant 0 : i32
    %c0_i32_1 = arith.constant 0 : i32
    return %c0_i32, %c0_i32_0 : i32, i32
  }
  func.func @transform_4(%arg0: i32) -> (i32, i32) {
    %c0_i32 = arith.constant 0 : i32
    %c0_i32_0 = arith.constant 0 : i32
    %c0_i32_1 = arith.constant 0 : i32
    return %c0_i32, %c0_i32_0 : i32, i32
  }
  func.func @transform_5(%arg0: i32) -> (i32, i32, i32) {
    %c0_i32 = arith.constant 0 : i32
    %c0_i32_0 = arith.constant 0 : i32
    %c0_i32_1 = arith.constant 0 : i32
    return %arg0, %c0_i32, %c0_i32_0 : i32, i32, i32
  }
}

</mosaic_0001>

<bundles_post_ra>
// kernel: tpu_custom_call.1
= control target key start
LH: loop header
LB: loop body
LE: loop exit
PB: predicated region body
PF: predicated region fallthrough
CT: control target
= control target key end

     0   :  { %10 = vsyncpa [#allocation4], 0  ;;  %s7452_s0 = inlined_call_operand.hbm [shape: f32[2,64,256], index: 0, kind: input, shape index: {}]   ;;  %s7453_s1 = inlined_call_operand.hbm [shape: bf16[64,576], index: 1, kind: input, shape index: {}]   ;;  %s7454_s2 = inlined_call_operand.vmem [shape: f32[64,1], index: 2, kind: input, shape index: {}]   ;;  %s7455_s3 = inlined_call_operand.hbm [shape: bf16[64,576], index: 3, kind: input, shape index: {}]   ;;  %s7456_s4 = inlined_call_operand.vmem [shape: f32[64,1], index: 4, kind: input, shape index: {}]   ;;  %s7457_s5 = inlined_call_operand.hbm [shape: f32[2,64,256], index: 5, kind: output, shape index: {}]  }
   0x1   :  { %12 = vsyncpa [#allocation4 + $0x1], 0 }
   0x2   :  { %13 = vsyncpa [#allocation7], 0 }
   0x3   :  { %14 = vsyncpa [#allocation5], 0 }
   0x4   :  { %16 = vsyncpa [#allocation5 + $0x1], 0  ;;  %s4566_s18 = smov 0   ;;  %s4568_s19 = smov 0  }
   0x5   :  { %s4570_s20 = smov 0   ;;  %s4572_s21 = smov 0  }
   0x6 LB: > { %s4587_s22 = sadd.s32 4294967295, %s4511_s21   ;;  %s3847_s23 = sadd.s32 4294967294, %s4511_s21   ;;  %s4511_s21 = sphi %s4572_s21, %s7579_s21   ;;  %s4507_s20 = sphi %s4570_s20, %s7578_s20   ;;  %s4503_s19 = sphi %s4568_s19, %s7577_s19   ;;  %s4499_s18 = sphi %s4566_s18, %s7576_s18  }
   0x7   : > { %p42_p0 = scmp.ne.s32.totalorder %s4503_s19, %s4499_s18  ;;  %p7458_p1 = scmp.eq.s32.totalorder %s4587_s22, 0 }
   0x8   : > { %p156_p3 = scmp.eq.s32.totalorder %s3847_s23, 1  ;;  %p3848_p5 = scmp.ge.s32.totalorder %s4511_s21, 1 }
   0x9   : > { %p4596_p4 = por %p7458_p1, %p42_p0  ;;  %p163_p7 = scmp.lt.s32.totalorder %s4511_s21, 3 }
   0xa   : > { %p4601_p6 = por %p156_p3, %p42_p0  ;;  %s4513_s27 = smov [#allocation6]  }
   0xb   : > { %s7488_s24 = scalar_select %p4596_p4, 1, 0 }
   0xc   : > { %s7489_s25 = scalar_select %p4601_p6, 1, 0 }
   0xd   : > { %p4606_p8 = pnand %p3848_p5, %p163_p7  ;;  %s175_s28 = sshll.u32 %s4513_s27, 4  ;;  %s176_s28 = int_to_ptr.vmem [resolvable:$true] %s175_s28 }
   0xe   : > { %s4514_s30 = smov [#allocation8]   ;;  %s4374_s7 = scalar_lea.vmem %s176_s28, 2560 }
   0xf   : > { %s7490_s26 = scalar_select %p4606_p8, 1, 0 }
  0x10   : > { %p4167_p9 = pneg %p4606_p8  ;;  %s191_s6 = sshll.u32 %s4514_s30, 4  ;;  %s192_s6 = int_to_ptr.vmem [resolvable:$true] %s191_s6 }
  0x11   : > { %p4375_p13 = scmp.ne.s32.totalorder %s176_s28, %s4374_s7  ;;  %p4382_p5 = scmp.lt.s32.totalorder %s176_s28, %s176_s28 }
  0x12   : > { %p4615_p11 = pnand %p4167_p9, %p7458_p1  ;;  %p4383_p7 = scmp.lt.s32.totalorder %s4374_s7, %s4374_s7 }
  0x14   : > { %p4365_p12 = pneg %p4615_p11  ;;  %p4384_p10 = por %p4383_p7, %p4382_p5 }
  0x16   : > { %p4377_p0 = pnand %p4375_p13, %p4365_p12 }
  0x18   : > { %p4378_p3 = pneg %p4377_p0 }
  0x1a   : > { %p4385_p9 = pnand %p4384_p10, %p4378_p3 }
  0x1c   : > { %4388 = shalt.err (!%p4385_p9)
}
  0x1d   : > { %s4515_s8 = smov 320   ;;  %s4516_s9 = smov 20  }
  0x1e   : > { %4170 = dma.hbm_to_vmem [thread:$0]  (!%p4615_p11), %s7453_s1, 2560, %s176_s28, [#allocation7], %s4515_s8, %s4515_s8, %s4516_s9  }
  0x1f   : > { %s4400_s12 = scalar_lea.vmem %s192_s6, 2560  ;;  %p4408_p2 = scmp.lt.s32.totalorder %s192_s6, %s192_s6 }
  0x20   : > { %p4401_p1 = scmp.ne.s32.totalorder %s192_s6, %s4400_s12  ;;  %p4409_p6 = scmp.lt.s32.totalorder %s4400_s12, %s4400_s12 }
  0x22   : > { %p4403_p13 = pnand %p4401_p1, %p4365_p12  ;;  %p4410_p5 = por %p4409_p6, %p4408_p2 }
  0x24   : > { %p4404_p0 = pneg %p4403_p13 }
  0x26   : > { %p4411_p10 = pnand %p4410_p5, %p4404_p0 }
  0x28   : > { %4414 = shalt.err (!%p4411_p10)
}
  0x29   : > { %4173 = dma.hbm_to_vmem [thread:$0]  (!%p4615_p11), %s7455_s3, 2560, %s192_s6, [#allocation7], %s4515_s8, %s4515_s8, %s4516_s9  }
  0x2a   : > { %s4638_s15 = sadd.s32 1, %s4511_s21   ;;  %s29_s16 = sadd.s32 1, %s4507_s20 }
  0x2b   : > { %s26_s17 = ssub.s32 %s4511_s21, %s4638_s15  ;;  %p36_p1 = scmp.ne.s32.totalorder %s4507_s20, %s4503_s19 }
  0x2c   : > { %p27_p2 = scmp.eq.s32.totalorder %s26_s17, 0  ;;  %p37_p6 = scmp.eq.s32.totalorder %s4511_s21, 0 }
  0x2d   : > { %p7492_p12 = scmp.eq.s32.totalorder %s4587_s22, 1  ;;  %p4184_p7 = scmp.lt.s32.totalorder %s4511_s21, 2 }
  0x2e   : > { %s4654_s27 = scalar_select %p27_p2, %s4507_s20, %s29_s16  }
  0x2f   : > { %p4648_p3 = por %p7492_p12, %p36_p1  ;;  %p38_p9 = por %p37_p6, %p36_p1 }
  0x30   : > { %s208_s28 = sand.u32 1, %s4507_s20   ;;  %s4137_s30 = sshll.u32 %s4511_s21, 11 }
  0x31   : > { %s7493_s23 = scalar_select %p4648_p3, 1, 0 }
  0x32   : > { %s3852_s29 = sshll.u32 %s208_s28, 7  ;;  %s4661_s8 = scalar_lea.hbm %s7452_s0, %s4137_s30 }
  0x33   : > { %s212_s9 = scalar_lea.vmem [#allocation3], %s3852_s29  ;;  %p4665_p11 = pnand %p4184_p7, %p38_p9 }
  0x34   : > { %s219_s10 = sshll.u32 %s212_s9, 4  ;;  %s4669_s12 = scalar_lea.sflag [#allocation4], %s208_s28  ;;  %s4663_s10 = int_to_ptr.vmem [resolvable:$true] %s219_s10 }
  0x35   : > { %s4415_s13 = scalar_lea.hbm %s4661_s8, 2048  ;;  %p4417_p0 = pneg %p4665_p11 }
  0x36   : > { %p4416_p13 = scmp.ne.s32.totalorder %s4661_s8, %s4415_s13  ;;  %s4420_s17 = scalar_lea.hbm %s7452_s0, 4096 }
  0x37   : > { %p4421_p1 = scmp.lt.s32.totalorder %s4661_s8, %s7452_s0  ;;  %p4422_p2 = scmp.lt.s32.totalorder %s4420_s17, %s4415_s13 }
  0x38   : > { %p4418_p5 = pnand %p4417_p0, %p4416_p13 }
  0x39   : > { %p4423_p6 = por %p4422_p2, %p4421_p1 }
  0x3a   : > { %p4419_p10 = pneg %p4418_p5 }
  0x3c   : > { %p4424_p12 = pnand %p4423_p6, %p4419_p10 }
  0x3e   : > { %4427 = shalt.err (!%p4424_p12)
}
  0x3f   : > { %s4428_s28 = scalar_lea.vmem %s4663_s10, 2048  ;;  %s4517_s6 = smov [#allocation3]  }
  0x40   : > { %p4429_p7 = scmp.ne.s32.totalorder %s4663_s10, %s4428_s28  ;;  %s4433_s7 = sshll.u32 %s4517_s6, 4  ;;  %s4434_s7 = int_to_ptr.vmem [resolvable:$false] %s4433_s7 }
  0x41   : > { %s4435_s9 = scalar_lea.vmem %s4434_s7, 4096  ;;  %p4436_p5 = scmp.lt.s32.totalorder %s4663_s10, %s4434_s7 }
  0x42   : > { %p4431_p9 = pnand %p4429_p7, %p4417_p0  ;;  %p4437_p3 = scmp.lt.s32.totalorder %s4435_s9, %s4428_s28 }
  0x44   : > { %p4432_p13 = pneg %p4431_p9  ;;  %p4438_p4 = por %p4437_p3, %p4436_p5 }
  0x46   : > { %p4439_p8 = pnand %p4438_p4, %p4432_p13 }
  0x48   : > { %4442 = shalt.err (!%p4439_p8)
}
  0x49   : > { %s4518_s13 = smov 256   ;;  %s4519_s14 = smov 16  }
  0x4a   : > { %4177 = dma.hbm_to_vmem [thread:$0]  (!%p4665_p11), %s4661_s8, 2048, %s4663_s10, %s4669_s12, %s4518_s13, %s4518_s13, %s4519_s14  }
  0x4b   : > { %p7495_p0 = scmp.ne.s32.totalorder %s7490_s26, 0 }
  0x4d   : > { %231 = sbr.rel (%p7495_p0) target bundleno = 1637 (0x665), region = 40 }
  0x52   : > { %s4693_s16 = sand.u32 1, %s4503_s19   ;;  %p7496_p4 = scmp.ne.s32.totalorder %s7488_s24, 0 }
  0x53   : > { %s7481_s17 = sshll.u32 %s4693_s16, 7  ;;  %s234_s29 = scalar_lea.sflag [#allocation4], %s4693_s16 }
  0x54   : > { %s4699_s30 = scalar_lea.vmem [#allocation3], %s7481_s17 }
  0x55   : > { %4486 = dma.done.wait (%p7496_p4), %s234_s29, 2048  }
  0x56   : > { %4488 = vsyncadd (%p7496_p4), %s234_s29, 4294965248  ;;  %p7497_p8 = scmp.eq.s32.totalorder %s4587_s22, 0 }
  0x58   : > { %4490 = dma.done.wait (%p7497_p8), [#allocation7], 5120   ;;  %p7498_p3 = pmov %p7497_p8 }
  0x59   : > { %v275_v0 = vlaneseq  ;;  %v7462_v1 = vmov 0   ;;  %v4736_v8 = vld [vmem:[%s4699_s30 + $0x60] sm:$0xff]  ;;  %v4739_v9 = vld [vmem:[%s4699_s30 + $0x68] sm:$0xff]  ;;  %v4742_v10 = vld [vmem:[%s4699_s30 + $0x70] sm:$0xff]  ;;  %s4521_s24 = smov 113   ;;  %s4522_s26 = smov 1  }
  0x5a   : > { %4492 = vsyncadd (%p7498_p3), [#allocation7], 4294962176  ;;  %306 = vst [vmem:[#allocation2] sm:$0xf] %v7462_v1  ;;  %4242 = vset.pattern.permute.xlu1 %v7462_v1  ;;  %4241 = vset.pattern.permute.xlu0 %v7462_v1  ;;  %v4749_v12 = vld [vmem:[%s4699_s30 + $0x78] sm:$0xff]  ;;  %v4753_v13 = vpack.c.bf16 %v4739_v9, %v4736_v8  ;;  %v4756_v14 = vld [vmem:[%s4699_s30 + $0x40] sm:$0xff]  ;;  %v4347_v63 = vpack.c.bf16 %v4742_v10, %v4736_v8 }
  0x5b   : > { %307 = vst [vmem:[#allocation2 + $0x10] sm:$0xf] %v7462_v1  ;;  %308 = vst [vmem:[#allocation2 + $0x20] sm:$0xf] %v7462_v1  ;;  %v276_v2 = vand.u32 127, %v275_v0  ;;  %v4759_v15 = vld [vmem:[%s4699_s30 + $0x48] sm:$0xff]  ;;  %v4765_v16 = vpack.c.bf16 %v4749_v12, %v4742_v10  ;;  %v4348_v0 = vpack.c.bf16 %v4749_v12, %v4739_v9 }
  0x5c   : > { %309 = vst [vmem:[#allocation2 + $0x30] sm:$0xf] %v7462_v1  ;;  %310 = vst [vmem:[#allocation2 + $0x40] sm:$0xf] %v7462_v1  ;;  %v4768_v17 = vld [vmem:[%s4699_s30 + $0x50] sm:$0xff]  ;;  %v4771_v18 = vld [vmem:[%s4699_s30 + $0x58] sm:$0xff]  ;;  %v4775_v19 = vpack.c.bf16 %v4759_v15, %v4756_v14 }
  0x5d   : > { %311 = vst [vmem:[#allocation2 + $0x50] sm:$0xf] %v7462_v1  ;;  %312 = vst [vmem:[#allocation2 + $0x60] sm:$0xf] %v7462_v1  ;;  %v277_v3 = vadd.s32 128, %v276_v2  ;;  %v282_v4 = vand.u32 15, %v276_v2  ;;  %v4787_v21 = vpack.c.bf16 %v4771_v18, %v4768_v17  ;;  %v4918_v2 = vpack.c.bf16 %v4771_v18, %v4759_v15 }
  0x5e   : > { %313 = vst [vmem:[#allocation2 + $0x70] sm:$0xf] %v7462_v1  ;;  %314 = vst [vmem:[#allocation2 + $0xc] sm:$0xf] %v7462_v1  ;;  %v4790_v22 = vld [vmem:[%s4699_s30 + $0x20] sm:$0xff]  ;;  %v4793_v23 = vld [vmem:[%s4699_s30 + $0x28] sm:$0xff] }
  0x5f   : > { %315 = vst [vmem:[#allocation2 + $0x1c] sm:$0xf] %v7462_v1  ;;  %316 = vst [vmem:[#allocation2 + $0x2c] sm:$0xf] %v7462_v1  ;;  %v289_v5 = vand.u32 15, %v277_v3  ;;  %vm4727_vm0 = vcmp.le.s32.totalorder %v282_v4, 14  ;;  %v4807_v26 = vpack.c.bf16 %v4793_v23, %v4790_v22  ;;  %v4923_v3 = vpack.c.bf16 %v4768_v17, %v4756_v14 }
  0x60   : > { %317 = vst [vmem:[#allocation2 + $0x3c] sm:$0xf] %v7462_v1  ;;  %318 = vst [vmem:[#allocation2 + $0x4c] sm:$0xf] %v7462_v1  ;;  %vm4731_vm1 = vcmp.ge.s32.totalorder %v282_v4, 1  ;;  %v4800_v24 = vld [vmem:[%s4699_s30 + $0x30] sm:$0xff] }
  0x61   : > { %319 = vst [vmem:[#allocation2 + $0x5c] sm:$0xf] %v7462_v1  ;;  %320 = vst [vmem:[#allocation2 + $0x6c] sm:$0xf] %v7462_v1  ;;  %vm305_vm2 = vcmp.le.s32.totalorder %v289_v5, 14  ;;  %vm4744_vm3 = vcmp.ge.s32.totalorder %v289_v5, 1  ;;  %v4929_v4 = vpack.c.bf16 %v4800_v24, %v4790_v22 }
  0x62   : > { %321 = vst [vmem:[#allocation2 + $0x7c] sm:$0xf] %v7462_v1  ;;  %vm443_vm4 = vmpackc.low %vm305_vm2, %vm4727_vm0  ;;  %v4803_v25 = vld [vmem:[%s4699_s30 + $0x38] sm:$0xff]  ;;  %v4816_v29 = vld [vmem:[%s4699_s30] sm:$0xff]  ;;  %s4523_s8 = smov 127   ;;  %s4524_s10 = smov 111  }
  0x63   : > { %v4778_v20 = vsel %vm443_vm4, 65537, %v7462_v1  ;;  %vm414_vm5 = vmpackc.low %vm4744_vm3, %vm4731_vm1  ;;  %392 = vst [vmem:[#allocation2 + $0x64] sm:$0xff] %v4753_v13  ;;  %v4813_v28 = vpack.c.bf16 %v4803_v25, %v4800_v24  ;;  %v4819_v30 = vld [vmem:[%s4699_s30 + $0x8] sm:$0xff]  ;;  %v4822_v31 = vld [vmem:[%s4699_s30 + $0x10] sm:$0xff]  ;;  %s4525_s11 = smov 15   ;;  %s7484_s12 = smov 17   ;;  %v4935_v5 = vpack.c.bf16 %v4803_v25, %v4793_v23 }
  0x64   : > { %445 = vrot.lane.b32.xlu1 %v4778_v20, %s4521_s24  ;;  %515 = vrot.lane.b32.xlu0 %v4778_v20, %s4522_s26  ;;  %393 = vst [vmem:[#allocation2 + $0x74] sm:$0xff] %v4765_v16  ;;  %390 = vst [vmem:[#allocation2 + $0x44] sm:$0xff] %v4775_v19  ;;  %v415_v27 = vsel %vm414_vm5, 65537, %v7462_v1  ;;  %v4826_v32 = vld [vmem:[%s4699_s30 + $0x18] sm:$0xff]  ;;  %v4830_v33 = vpack.c.bf16 %v4819_v30, %v4816_v29  ;;  %v4947_v7 = vpack.c.bf16 %v4822_v31, %v4816_v29  ;;  %s4527_s28 = smov 95   ;;  %vm518_vm6 = vcmask 7168  }
  0x65   : > { %391 = vst [vmem:[#allocation2 + $0x54] sm:$0xff] %v4787_v21  ;;  %388 = vst [vmem:[#allocation2 + $0x24] sm:$0xff] %v4807_v26  ;;  %v4835_v34 = vpack.c.bf16 %v4826_v32, %v4822_v31  ;;  %v4941_v6 = vpack.c.bf16 %v4826_v32, %v4819_v30  ;;  %v7505_v17 = vmov 0  ;;  %v7508_v18 = vmov 0  ;;  %s7482_s6 = smov 126   ;;  %s4529_s7 = smov 110  }
  0x66   : > { %389 = vst [vmem:[#allocation2 + $0x34] sm:$0xff] %v4813_v28  ;;  %386 = vst [vmem:[#allocation2 + $0x4] sm:$0xff] %v4830_v33  ;;  %vm7476_vm9 = vcmask 1039360   ;;  %s7486_s9 = smov 112   ;;  %vm448_vm13 = vcmask 924672   ;;  %vm541_vm15 = vcmask 121856  }
  0x67   : > { %387 = vst [vmem:[#allocation2 + $0x14] sm:$0xff] %v4835_v34  ;;  %vm7480_vm0 = vcmask 908288   ;;  %vm564_vm5 = vcmask 138240   ;;  %s4531_s13 = smov 96   ;;  %s4532_s14 = smov 94  }
  0x68   : > { %468 = vrot.lane.b32.xlu0 %v415_v27, %s4523_s8  ;;  %v4954_v8 = vld [vmem:[#allocation2 + $0x6c] sm:$0xf]  ;;  %s7529_s29 = smov 112   ;;  %s7531_s24 = smov 126  }
  0x69   : > { %v4956_v9 = vld [vmem:[#allocation2 + $0x7c] sm:$0xf]  ;;  %s7532_s26 = smov 17   ;;  %p7573_p10 = scmp.ne.s32.totalorder %s7493_s23, 0 }
  0x6a   : > { %v4840_v35 = vld [vmem:[#allocation2 + $0x60] sm:$0xff]  ;;  %v4842_v36 = vld [vmem:[#allocation2 + $0x68] sm:$0xf]  ;;  %v3959_v10 = vcombine.low %v4954_v8, %v4956_v9 }
  0x6b   : > { %v4844_v37 = vld [vmem:[#allocation2 + $0x70] sm:$0xff]  ;;  %v4846_v38 = vld [vmem:[#allocation2 + $0x78] sm:$0xf]  ;;  %v4848_v39 = vld [vmem:[#allocation2 + $0x40] sm:$0xff] }
  0x6c   : > { %v3890_v40 = vcombine.high %v4840_v35, %v4844_v37  ;;  %v3891_v41 = vcombine.low %v4842_v36, %v4846_v38  ;;  %v4854_v42 = vld [vmem:[#allocation2 + $0x50] sm:$0xff]  ;;  %v3889_v43 = vcombine.low %v4840_v35, %v4844_v37  ;;  %v4862_v45 = vld [vmem:[#allocation2 + $0x48] sm:$0xf]  ;;  %v4864_v46 = vld [vmem:[#allocation2 + $0x58] sm:$0xf] }
  0x6d   : > { %v3887_v44 = vcombine.high %v4848_v39, %v4854_v42  ;;  %v4866_v47 = vld [vmem:[#allocation2 + $0x20] sm:$0xff]  ;;  %v4868_v48 = vld [vmem:[#allocation2 + $0x30] sm:$0xff]  ;;  %v4870_v49 = vld [vmem:[#allocation2 + $0x28] sm:$0xf]  ;;  %v3888_v51 = vcombine.low %v4862_v45, %v4864_v46  ;;  %v3886_v52 = vcombine.low %v4848_v39, %v4854_v42 }
  0x6e   : > { %708 = vrot.lane.b32.xlu1 %v3890_v40, %s4523_s8  ;;  %710 = vrot.lane.b32.xlu0 %v3891_v41, %s4523_s8  ;;  %v4872_v50 = vld [vmem:[#allocation2 + $0x38] sm:$0xf]  ;;  %v3884_v53 = vcombine.high %v4866_v47, %v4868_v48  ;;  %v4886_v55 = vld [vmem:[#allocation2] sm:$0xff]  ;;  %v4888_v56 = vld [vmem:[#allocation2 + $0x10] sm:$0xff]  ;;  %v3883_v59 = vcombine.low %v4866_v47, %v4868_v48  ;;  %v7512_v41 = vmov 0 }
  0x6f   : > { %v3885_v54 = vcombine.low %v4870_v49, %v4872_v50  ;;  %v4890_v57 = vld [vmem:[#allocation2 + $0x8] sm:$0xf]  ;;  %v4892_v58 = vld [vmem:[#allocation2 + $0x18] sm:$0xf]  ;;  %v3881_v60 = vcombine.high %v4886_v55, %v4888_v56  ;;  %v3880_v62 = vcombine.low %v4886_v55, %v4888_v56 }
  0x70   : > { %v3882_v61 = vcombine.low %v4890_v57, %v4892_v58 }
  0x72   : > { %706 = vrot.lane.b32.xlu1 %v3889_v43, %s4523_s8  ;;  %702 = vrot.lane.b32.xlu0 %v3887_v44, %s4523_s8 }
  0x76   : > { %704 = vrot.lane.b32.xlu1 %v3888_v51, %s4523_s8  ;;  %700 = vrot.lane.b32.xlu0 %v3886_v52, %s4523_s8 }
  0x7a   : > { %696 = vrot.lane.b32.xlu1 %v3884_v53, %s4523_s8  ;;  %698 = vrot.lane.b32.xlu0 %v3885_v54, %s4523_s8  ;;  %v5011_v53 = vld [vmem:[#allocation2 + $0x4c] sm:$0xf]  ;;  %v5013_v54 = vld [vmem:[#allocation2 + $0x5c] sm:$0xf] }
  0x7e   : > { %694 = vrot.lane.b32.xlu1 %v3883_v59, %s4523_s8  ;;  %416 = vrot.lane.b32.xlu0 %v415_v27, %s4524_s10 }
  0x82   : > { %690 = vrot.lane.b32.xlu1 %v3881_v60, %s4523_s8  ;;  %692 = vrot.lane.b32.xlu0 %v3882_v61, %s4523_s8 }
  0x86   : > { %538 = vrot.lane.b32.xlu1 %v415_v27, %s4525_s11  ;;  %688 = vrot.lane.b32.xlu0 %v3880_v62, %s4523_s8  ;;  %s4533_s11 = smov [#allocation9]  }
  0x8a   : > { %561 = vrot.lane.b32.xlu1 %v4778_v20, %s7484_s12  ;;  %934 = vrot.lane.b32.xlu0 %v4347_v63, %s4524_s10 }
  0x8e   : > { %936 = vrot.lane.b32.xlu1 %v4348_v0, %s4524_s10  ;;  %932 = vrot.lane.b32.xlu0 %v4918_v2, %s4524_s10 }
  0x92   : > { %930 = vrot.lane.b32.xlu1 %v4923_v3, %s4524_s10  ;;  %926 = vrot.lane.b32.xlu0 %v4929_v4, %s4524_s10 }
  0x96   : > { %928 = vrot.lane.b32.xlu1 %v4935_v5, %s4524_s10  ;;  %924 = vrot.lane.b32.xlu0 %v4941_v6, %s4524_s10 }
  0x9a   : > { %922 = vrot.lane.b32.xlu1 %v4947_v7, %s4524_s10  ;;  %1184 = vrot.lane.b32.xlu0 %v4348_v0, %s4527_s28 }
  0x9e   : > { %1182 = vrot.lane.b32.xlu1 %v4347_v63, %s4527_s28 }
  0xa2   : > { %1186 = vrot.lane.b32.xlu1 %v3959_v10, %s4527_s28 }
  0xd6   : > { %v4962_v11 = vpop.permute.xlu1 %445  ;;  %v516_v12 = vpop.permute.xlu0 %515 }
  0xd7   : > { %v447_v14 = vrot.slane %v4962_v11, 4  ;;  %v517_v15 = vrot.slane %v516_v12, 4 }
  0xd9   : > { %vm4967_vm7 = vcmp.ne.s16.totalorder %v447_v14, 0  ;;  %vm4971_vm8 = vcmp.ne.s16.totalorder %v517_v15, 0  ;;  %v4975_v20 = vsel %vm518_vm6, %v517_v15, %v516_v12 }
  0xda   : > { %v7506_v17 = vsel %vm4967_vm7, 4294967295, %v7505_v17  ;;  %v7509_v18 = vsel %vm4971_vm8, 4294967295, %v7508_v18  ;;  %7511 = vst [vmem:[#allocation15_spill] sm:$0xff] %v4975_v20  ;;  %v469_v22 = vpop.permute.xlu0 %468  ;;  %v465_v23 = vsel %vm4967_vm7, %v4842_v36, 0  ;;  %v467_v24 = vsel %vm4967_vm7, %v4846_v38, 0 }
  0xdb   : > { %7507 = vst [vmem:[#allocation13_spill] sm:$0xff] %v7506_v17  ;;  %7510 = vst [vmem:[#allocation14_spill] sm:$0xff] %v7509_v18  ;;  %v470_v25 = vrot.slane %v469_v22, 4  ;;  %v3903_v27 = vcombine.low %v465_v23, %v467_v24  ;;  %v535_v29 = vsel %vm4971_vm8, %v4954_v8, 0  ;;  %v537_v30 = vsel %vm4971_vm8, %v4956_v9, 0 }
  0xdc   : > { %v3935_v31 = vcombine.low %v535_v29, %v537_v30  ;;  %v457_v32 = vsel %vm4967_vm7, %v4870_v49, 0  ;;  %v459_v40 = vsel %vm4967_vm7, %v4872_v50, 0  ;;  %vm520_vm10 = vcmp.ne.s16.totalorder %v4975_v20, 0  ;;  %v5050_v24 = vld [vmem:[#allocation2 + $0x2c] sm:$0xf] }
  0xdd   : > { %vm4996_vm11 = vcmp.ne.s16.totalorder %v470_v25, 0  ;;  %794 = vrot.lane.b32.xlu1 %v3903_v27, %s7482_s6  ;;  %v3897_v43 = vcombine.low %v457_v32, %v459_v40  ;;  %v5002_v44 = vsel %vm7476_vm9, %v470_v25, %v469_v22  ;;  %v5018_v60 = vsel %vm520_vm10, %v4753_v13, 0  ;;  %v5052_v25 = vld [vmem:[#allocation2 + $0x3c] sm:$0xf] }
  0xde   : > { %v7513_v41 = vsel %vm4996_vm11, 4294967295, %v7512_v41  ;;  %7515 = vst [vmem:[#allocation17_spill] sm:$0xff] %v5002_v44  ;;  %1016 = vrot.lane.b32.xlu0 %v3935_v31, %s4529_s7  ;;  %v488_v51 = vsel %vm4996_vm11, %v4842_v36, 0  ;;  %v490_v52 = vsel %vm4996_vm11, %v4846_v38, 0  ;;  %v5023_v61 = vsel %vm520_vm10, %v4765_v16, 0 }
  0xdf   : > { %7514 = vst [vmem:[#allocation16_spill] sm:$0xff] %v7513_v41  ;;  %v3915_v59 = vcombine.low %v488_v51, %v490_v52  ;;  %vm473_vm12 = vcmp.ne.s16.totalorder %v5002_v44, 0  ;;  %v531_v62 = vsel %vm4971_vm8, %v5011_v53, 0  ;;  %v533_v63 = vsel %vm4971_vm8, %v5013_v54, 0 }
  0xe0   : > { %v3934_v0 = vcombine.high %v5018_v60, %v5023_v61  ;;  %v3932_v10 = vcombine.low %v531_v62, %v533_v63  ;;  %v487_v12 = vsel %vm473_vm12, %v4840_v35, 0  ;;  %v489_v15 = vsel %vm473_vm12, %v4844_v37, 0  ;;  %v5076_v62 = vld [vmem:[#allocation2 + $0xc] sm:$0xf]  ;;  %v5078_v63 = vld [vmem:[#allocation2 + $0x1c] sm:$0xf] }
  0xe1   : > { %782 = vrot.lane.b32.xlu1 %v3897_v43, %s7482_s6  ;;  %v484_v22 = vsel %vm4996_vm11, %v4862_v45, 0  ;;  %v486_v23 = vsel %vm4996_vm11, %v4864_v46, 0  ;;  %v3914_v27 = vcombine.high %v487_v12, %v489_v15  ;;  %v527_v30 = vsel %vm4971_vm8, %v5050_v24, 0 }
  0xe2   : > { %879 = vrot.lane.b32.xlu0 %v3915_v59, %s7486_s9  ;;  %v3912_v29 = vcombine.low %v484_v22, %v486_v23  ;;  %v529_v31 = vsel %vm4971_vm8, %v5052_v25, 0  ;;  %v3913_v32 = vcombine.low %v487_v12, %v489_v15  ;;  %v530_v43 = vsel %vm520_vm10, %v4775_v19, 0 }
  0xe3   : > { %v3929_v40 = vcombine.low %v527_v30, %v529_v31  ;;  %v532_v51 = vsel %vm520_vm10, %v4787_v21, 0  ;;  %v480_v52 = vsel %vm4996_vm11, %v4870_v49, 0  ;;  %v482_v59 = vsel %vm4996_vm11, %v4872_v50, 0 }
  0xe4   : > { %v483_v12 = vsel %vm473_vm12, %v4848_v39, 0  ;;  %v485_v15 = vsel %vm473_vm12, %v4854_v42, 0  ;;  %v523_v22 = vsel %vm4971_vm8, %v5076_v62, 0  ;;  %v525_v23 = vsel %vm4971_vm8, %v5078_v63, 0 }
  0xe5   : > { %1014 = vrot.lane.b32.xlu1 %v3934_v0, %s4529_s7  ;;  %v3931_v0 = vcombine.high %v530_v43, %v532_v51  ;;  %v476_v30 = vsel %vm4996_vm11, %v4890_v57, 0  ;;  %v478_v31 = vsel %vm4996_vm11, %v4892_v58, 0 }
  0xe6   : > { %1010 = vrot.lane.b32.xlu0 %v3932_v10, %s4529_s7  ;;  %v3909_v10 = vcombine.low %v480_v52, %v482_v59  ;;  %v526_v52 = vsel %vm520_vm10, %v4807_v26, 0  ;;  %v528_v59 = vsel %vm520_vm10, %v4813_v28, 0 }
  0xe9   : > { %877 = vrot.lane.b32.xlu1 %v3914_v27, %s7486_s9  ;;  %v3911_v27 = vcombine.high %v483_v12, %v485_v15 }
  0xea   : > { %873 = vrot.lane.b32.xlu0 %v3912_v29, %s7486_s9  ;;  %v3926_v29 = vcombine.low %v523_v22, %v525_v23  ;;  %v479_v23 = vsel %vm473_vm12, %v4866_v47, 0 }
  0xed   : > { %875 = vrot.lane.b32.xlu1 %v3913_v32, %s7486_s9  ;;  %v3910_v32 = vcombine.low %v483_v12, %v485_v15  ;;  %v3928_v12 = vcombine.high %v526_v52, %v528_v59  ;;  %v5116_v15 = vpop.permute.xlu1 %708 }
  0xee   : > { %1004 = vrot.lane.b32.xlu0 %v3929_v40, %s4529_s7  ;;  %v3906_v40 = vcombine.low %v476_v30, %v478_v31  ;;  %v455_v30 = vsel %vm4967_vm7, %v4892_v58, 0 }
  0xf1   : > { %1008 = vrot.lane.b32.xlu1 %v3931_v0, %s4529_s7  ;;  %v461_v0 = vsel %vm4967_vm7, %v4862_v45, 0 }
  0xf2   : > { %867 = vrot.lane.b32.xlu0 %v3909_v10, %s7486_s9  ;;  %v463_v10 = vsel %vm4967_vm7, %v4864_v46, 0 }
  0xf3   : > { %v3900_v22 = vcombine.low %v461_v0, %v463_v10  ;;  %v3933_v10 = vcombine.low %v5018_v60, %v5023_v61  ;;  %v475_v60 = vsel %vm473_vm12, %v4886_v55, 0  ;;  %v477_v61 = vsel %vm473_vm12, %v4888_v56, 0 }
  0xf5   : > { %871 = vrot.lane.b32.xlu1 %v3911_v27, %s7486_s9  ;;  %v481_v27 = vsel %vm473_vm12, %v4868_v48, 0 }
  0xf6   : > { %998 = vrot.lane.b32.xlu0 %v3926_v29, %s4529_s7  ;;  %v453_v29 = vsel %vm4967_vm7, %v4890_v57, 0  ;;  %v3908_v31 = vcombine.high %v479_v23, %v481_v27  ;;  %v3907_v0 = vcombine.low %v479_v23, %v481_v27  ;;  %v5156_v23 = vsel %vm448_vm13, %v447_v14, %v4962_v11  ;;  %v711_v27 = vpop.permute.xlu0 %710 }
  0xf7   : > { %7516 = vst [vmem:[#allocation18_spill] sm:$0xff] %v5156_v23  ;;  %vm450_vm14 = vcmp.ne.s16.totalorder %v5156_v23, 0  ;;  %v719_v23 = vsel %vm7476_vm9, %v5116_v15, %v711_v27 }
  0xf8   : > { %v460_v11 = vsel %vm450_vm14, %v4848_v39, 0  ;;  %v462_v14 = vsel %vm450_vm14, %v4854_v42, 0 }
  0xf9   : > { %869 = vrot.lane.b32.xlu1 %v3910_v32, %s7486_s9  ;;  %v3894_v32 = vcombine.low %v453_v29, %v455_v30 }
  0xfa   : > { %861 = vrot.lane.b32.xlu0 %v3906_v40, %s7486_s9  ;;  %v5133_v40 = vpop.permute.xlu1 %706 }
  0xfd   : > { %1002 = vrot.lane.b32.xlu1 %v3928_v12, %s4529_s7  ;;  %v522_v12 = vsel %vm520_vm10, %v4830_v33, 0 }
  0xfe   : > { %788 = vrot.lane.b32.xlu0 %v3900_v22, %s7482_s6  ;;  %v524_v22 = vsel %vm520_vm10, %v4835_v34, 0  ;;  %v705_v30 = vpop.permute.xlu1 %704 }
  0xff   : > { %v3925_v29 = vcombine.high %v522_v12, %v524_v22 }
 0x101   : > { %865 = vrot.lane.b32.xlu1 %v3908_v31, %s7486_s9  ;;  %v3930_v31 = vcombine.low %v530_v43, %v532_v51  ;;  %v3927_v43 = vcombine.low %v526_v52, %v528_v59  ;;  %v464_v52 = vsel %vm450_vm14, %v4840_v35, 0  ;;  %v466_v59 = vsel %vm450_vm14, %v4844_v37, 0 }
 0x102   : > { %776 = vrot.lane.b32.xlu0 %v3894_v32, %s7482_s6  ;;  %v3905_v32 = vcombine.high %v475_v60, %v477_v61  ;;  %v5161_v51 = vpop.permute.xlu1 %696 }
 0x105   : > { %863 = vrot.lane.b32.xlu1 %v3907_v0, %s7486_s9  ;;  %v3904_v0 = vcombine.low %v475_v60, %v477_v61  ;;  %v3898_v61 = vcombine.low %v460_v11, %v462_v14 }
 0x106   : > { %1012 = vrot.lane.b32.xlu0 %v3933_v10, %s4529_s7  ;;  %v3924_v10 = vcombine.low %v522_v12, %v524_v22  ;;  %v3899_v12 = vcombine.high %v460_v11, %v462_v14  ;;  %v695_v22 = vpop.permute.xlu1 %694 }
 0x109   : > { %996 = vrot.lane.b32.xlu1 %v3925_v29, %s4529_s7  ;;  %v703_v29 = vpop.permute.xlu0 %702 }
 0x10a   : > { %1006 = vrot.lane.b32.xlu0 %v3930_v31, %s4529_s7  ;;  %v3902_v31 = vcombine.high %v464_v52, %v466_v59  ;;  %v5193_v11 = vpop.permute.xlu1 %690 }
 0x10d   : > { %859 = vrot.lane.b32.xlu1 %v3905_v32, %s7486_s9  ;;  %v701_v60 = vpop.permute.xlu0 %700  ;;  %v3901_v32 = vcombine.low %v464_v52, %v466_v59 }
 0x10e   : > { %1000 = vrot.lane.b32.xlu0 %v3927_v43, %s4529_s7  ;;  %v452_v43 = vsel %vm450_vm14, %v4886_v55, 0 }
 0x111   : > { %857 = vrot.lane.b32.xlu1 %v3904_v0, %s7486_s9  ;;  %v454_v0 = vsel %vm450_vm14, %v4888_v56, 0  ;;  %v699_v59 = vpop.permute.xlu0 %698 }
 0x112   : > { %994 = vrot.lane.b32.xlu0 %v3924_v10, %s4529_s7  ;;  %v456_v10 = vsel %vm450_vm14, %v4866_v47, 0  ;;  %v3893_v14 = vcombine.high %v452_v43, %v454_v0  ;;  %v3892_v44 = vcombine.low %v452_v43, %v454_v0  ;;  %v3956_v43 = vcombine.low %v5011_v53, %v5013_v54 }
 0x115   : > { %786 = vrot.lane.b32.xlu1 %v3899_v12, %s7482_s6  ;;  %v458_v12 = vsel %vm450_vm14, %v4868_v48, 0  ;;  %v417_v1 = vpop.permute.xlu0 %416 }
 0x116   : > { %792 = vrot.lane.b32.xlu0 %v3902_v31, %s7482_s6  ;;  %v3896_v52 = vcombine.high %v456_v10, %v458_v12  ;;  %v5198_v31 = vpop.permute.xlu1 %538 }
 0x119   : > { %784 = vrot.lane.b32.xlu1 %v3898_v61, %s7482_s6  ;;  %v3895_v61 = vcombine.low %v456_v10, %v458_v12  ;;  %v693_v10 = vpop.permute.xlu0 %692 }
 0x11a   : > { %790 = vrot.lane.b32.xlu0 %v3901_v32, %s7482_s6  ;;  %v5205_v32 = vpop.permute.xlu1 %561 }
 0x11d   : > { %774 = vrot.lane.b32.xlu1 %v3893_v14, %s7482_s6  ;;  %v718_v14 = vsel %vm7476_vm9, %v5133_v40, %v5116_v15  ;;  %v716_v15 = vsel %vm7476_vm9, %v701_v60, %v703_v29  ;;  %v3953_v60 = vcombine.low %v5050_v24, %v5052_v25 }
 0x11e   : > { %780 = vrot.lane.b32.xlu0 %v3896_v52, %s7482_s6  ;;  %v5213_v12 = vpop.permute.xlu1 %936 }
 0x121   : > { %1494 = vrot.lane.b32.xlu1 %v705_v30, %s7484_s12 }
 0x122   : > { %778 = vrot.lane.b32.xlu0 %v3895_v61, %s7482_s6  ;;  %v5223_v40 = vpop.permute.xlu1 %930 }
 0x125   : > { %1498 = vrot.lane.b32.xlu1 %v719_v23, %s7484_s12  ;;  %v717_v23 = vsel %vm7476_vm9, %v703_v29, %v705_v30  ;;  %v715_v29 = vsel %vm7476_vm9, %v5161_v51, %v699_v59 }
 0x126   : > { %772 = vrot.lane.b32.xlu0 %v3892_v44, %s7482_s6  ;;  %v689_v44 = vpop.permute.xlu0 %688 }
 0x129   : > { %1496 = vrot.lane.b32.xlu1 %v718_v14, %s7484_s12 }
 0x12a   : > { %1500 = vrot.lane.b32.xlu0 %v711_v27, %s7484_s12  ;;  %v5226_v27 = vpop.permute.xlu0 %934 }
 0x12d   : > { %1176 = vrot.lane.b32.xlu1 %v4923_v3, %s4527_s28  ;;  %v5231_v3 = vpop.permute.xlu1 %928 }
 0x12e   : > { %1492 = vrot.lane.b32.xlu0 %v717_v23, %s7484_s12  ;;  %v5233_v30 = vpop.permute.xlu0 %932 }
 0x131   : > { %1180 = vrot.lane.b32.xlu1 %v3956_v43, %s4527_s28  ;;  %v5245_v0 = vpop.permute.xlu1 %922 }
 0x132   : > { %1490 = vrot.lane.b32.xlu0 %v716_v15, %s7484_s12  ;;  %v5248_v52 = vpop.permute.xlu0 %926 }
 0x135   : > { %1488 = vrot.lane.b32.xlu1 %v699_v59, %s7484_s12  ;;  %v418_v59 = vrot.slane %v417_v1, 4  ;;  %v5254_v61 = vpop.permute.xlu1 %1182 }
 0x136   : > { %1178 = vrot.lane.b32.xlu0 %v4918_v2, %s4527_s28  ;;  %v714_v2 = vsel %vm7476_vm9, %v695_v22, %v5161_v51  ;;  %v5256_v14 = vpop.permute.xlu0 %924  ;;  %v713_v22 = vsel %vm7476_vm9, %v5193_v11, %v693_v10 }
 0x137   : > { %vm5258_vm1 = vcmp.ne.s16.totalorder %v418_v59, 0  ;;  %v5273_v43 = vsel %vm7480_vm0, %v418_v59, %v417_v1 }
 0x138   : > { %v436_v15 = vsel %vm5258_vm1, %v4842_v36, 0  ;;  %vm421_vm3 = vcmp.ne.s16.totalorder %v5273_v43, 0  ;;  %v432_v17 = vsel %vm5258_vm1, %v4862_v45, 0 }
 0x139   : > { %1170 = vrot.lane.b32.xlu1 %v4929_v4, %s4527_s28  ;;  %v540_v4 = vrot.slane %v5198_v31, 4 }
 0x13a   : > { %1486 = vrot.lane.b32.xlu0 %v715_v29, %s7484_s12  ;;  %v5289_v1 = vpop.permute.xlu0 %1184 }
 0x13b   : > { %v5269_v23 = vsel %vm541_vm15, %v540_v4, %v5198_v31  ;;  %v712_v31 = vsel %vm7476_vm9, %v689_v44, %v5193_v11  ;;  %vm5297_vm4 = vcmp.ne.s16.totalorder %v540_v4, 0  ;;  %v435_v11 = vsel %vm421_vm3, %v4840_v35, 0 }
 0x13c   : > { %vm543_vm2 = vcmp.ne.s16.totalorder %v5269_v23, 0  ;;  %v437_v44 = vsel %vm421_vm3, %v4844_v37, 0  ;;  %v558_v35 = vsel %vm5297_vm4, %v4954_v8, 0  ;;  %v560_v37 = vsel %vm5297_vm4, %v4956_v9, 0 }
 0x13d   : > { %1174 = vrot.lane.b32.xlu1 %v3953_v60, %s4527_s28  ;;  %v559_v29 = vsel %vm543_vm2, %v4765_v16, 0  ;;  %vm7477_vm15 = vcmask 900096   ;;  %vm7478_vm9 = vcmask 916480  }
 0x13e   : > { %1484 = vrot.lane.b32.xlu0 %v714_v2, %s7484_s12  ;;  %v563_v2 = vrot.slane %v5205_v32, 4 }
 0x140   : > { %vm5363_vm13 = vcmp.ne.s16.totalorder %v563_v2, 0 }
 0x141   : > { %1482 = vrot.lane.b32.xlu1 %v693_v10, %s7484_s12  ;;  %v5285_v10 = vpop.permute.xlu1 %1186 }
 0x142   : > { %1172 = vrot.lane.b32.xlu0 %v4935_v5, %s4527_s28  ;;  %v3950_v5 = vcombine.low %v5076_v62, %v5078_v63 }
 0x145   : > { %1164 = vrot.lane.b32.xlu1 %v4947_v7, %s4527_s28  ;;  %v438_v7 = vsel %vm5258_vm1, %v4846_v38, 0  ;;  %v557_v38 = vsel %vm543_vm2, %v4753_v13, 0 }
 0x146   : > { %1480 = vrot.lane.b32.xlu0 %v713_v22, %s7484_s12  ;;  %v3879_v36 = vcombine.low %v436_v15, %v438_v7  ;;  %v3945_v59 = vcombine.low %v557_v38, %v559_v29  ;;  %v3947_v7 = vcombine.low %v558_v35, %v560_v37 }
 0x149   : > { %1168 = vrot.lane.b32.xlu1 %v3950_v5, %s4527_s28  ;;  %v3878_v5 = vcombine.high %v435_v11, %v437_v44 }
 0x14a   : > { %1478 = vrot.lane.b32.xlu0 %v712_v31, %s7484_s12 }
 0x14d   : > { %1476 = vrot.lane.b32.xlu1 %v3879_v36, %s7484_s12  ;;  %v3877_v36 = vcombine.low %v435_v11, %v437_v44  ;;  %v3946_v11 = vcombine.high %v557_v38, %v559_v29  ;;  %v431_v44 = vsel %vm421_vm3, %v4848_v39, 0 }
 0x14e   : > { %1166 = vrot.lane.b32.xlu0 %v4941_v6, %s4527_s28  ;;  %v5324_v6 = vsel %vm564_vm5, %v563_v2, %v5205_v32  ;;  %v581_v2 = vsel %vm5363_vm13, %v4954_v8, 0  ;;  %v429_v8 = vsel %vm421_vm3, %v4868_v48, 0  ;;  %v554_v48 = vsel %vm5297_vm4, %v5011_v53, 0 }
 0x14f   : > { %v5311_v4 = vpop.permute.xlu1 %794  ;;  %vm566_vm6 = vcmp.ne.s16.totalorder %v5324_v6, 0 }
 0x150   : > { %v5313_v22 = vpop.permute.xlu0 %1016  ;;  %v580_v45 = vsel %vm566_vm6, %v4753_v13, 0 }
 0x151   : > { %1097 = vrot.lane.b32.xlu1 %v3945_v59, %s4531_s13  ;;  %v434_v59 = vsel %vm5258_vm1, %v4864_v46, 0  ;;  %v582_v46 = vsel %vm566_vm6, %v4765_v16, 0 }
 0x152   : > { %1474 = vrot.lane.b32.xlu0 %v3878_v5, %s7484_s12  ;;  %v3876_v5 = vcombine.low %v432_v17, %v434_v59  ;;  %v433_v17 = vsel %vm421_vm3, %v4854_v42, 0  ;;  %v3970_v29 = vcombine.high %v580_v45, %v582_v46  ;;  %v553_v59 = vsel %vm543_vm2, %v4775_v19, 0 }
 0x153   : > { %v5327_v15 = vpop.permute.xlu1 %782  ;;  %v3875_v37 = vcombine.high %v431_v44, %v433_v17  ;;  %v3874_v42 = vcombine.low %v431_v44, %v433_v17 }
 0x154   : > { %v5329_v31 = vpop.permute.xlu0 %879 }
 0x155   : > { %1101 = vrot.lane.b32.xlu1 %v3947_v7, %s4531_s13 }
 0x156   : > { %1472 = vrot.lane.b32.xlu0 %v3877_v36, %s7484_s12  ;;  %v3969_v36 = vcombine.low %v580_v45, %v582_v46 }
 0x157   : > { %v5340_v32 = vpop.permute.xlu1 %1014 }
 0x158   : > { %v5342_v35 = vpop.permute.xlu0 %1010 }
 0x159   : > { %1470 = vrot.lane.b32.xlu1 %v3876_v5, %s7484_s12  ;;  %v555_v5 = vsel %vm543_vm2, %v4787_v21, 0 }
 0x15a   : > { %1099 = vrot.lane.b32.xlu0 %v3946_v11, %s4531_s13  ;;  %v583_v11 = vsel %vm5363_vm13, %v4956_v9, 0  ;;  %v3943_v46 = vcombine.high %v553_v59, %v555_v5 }
 0x15b   : > { %v5358_v38 = vpop.permute.xlu1 %877  ;;  %v3971_v17 = vcombine.low %v581_v2, %v583_v11  ;;  %v576_v2 = vsel %vm566_vm6, %v4775_v19, 0  ;;  %v556_v11 = vsel %vm5297_vm4, %v5013_v54, 0 }
 0x15c   : > { %v5360_v13 = vpop.permute.xlu0 %873 }
 0x15d   : > { %1269 = vrot.lane.b32.xlu1 %v3970_v29, %s4532_s14  ;;  %v427_v29 = vsel %vm421_vm3, %v4866_v47, 0  ;;  %v578_v47 = vsel %vm566_vm6, %v4787_v21, 0  ;;  %v577_v21 = vsel %vm5363_vm13, %v5011_v53, 0 }
 0x15e   : > { %1468 = vrot.lane.b32.xlu0 %v3875_v37, %s7484_s12  ;;  %v3872_v37 = vcombine.high %v427_v29, %v429_v8  ;;  %v3871_v20 = vcombine.low %v427_v29, %v429_v8  ;;  %v572_v29 = vsel %vm566_vm6, %v4807_v26, 0 }
 0x15f   : > { %v5368_v39 = vpop.permute.xlu1 %875 }
 0x160   : > { %v5370_v7 = vpop.permute.xlu0 %1004 }
 0x161   : > { %1466 = vrot.lane.b32.xlu1 %v3874_v42, %s7484_s12 }
 0x162   : > { %1267 = vrot.lane.b32.xlu0 %v3969_v36, %s4532_s14  ;;  %v3942_v36 = vcombine.low %v553_v59, %v555_v5  ;;  %v3966_v5 = vcombine.low %v576_v2, %v578_v47 }
 0x163   : > { %v5386_v45 = vpop.permute.xlu1 %1008 }
 0x164   : > { %v5388_v44 = vpop.permute.xlu0 %867 }
 0x165   : > { %1093 = vrot.lane.b32.xlu1 %v3943_v46, %s4531_s13  ;;  %v3944_v46 = vcombine.low %v554_v48, %v556_v11 }
 0x166   : > { %1271 = vrot.lane.b32.xlu0 %v3971_v17, %s4532_s14  ;;  %v579_v17 = vsel %vm5363_vm13, %v5013_v54, 0  ;;  %v549_v54 = vsel %vm543_vm2, %v4807_v26, 0 }
 0x167   : > { %v5398_v9 = vpop.permute.xlu1 %871  ;;  %v3968_v11 = vcombine.low %v577_v21, %v579_v17  ;;  %v3967_v21 = vcombine.high %v576_v2, %v578_v47  ;;  %v550_v17 = vsel %vm5297_vm4, %v5050_v24, 0  ;;  %v424_v2 = vsel %vm5258_vm1, %v4890_v57, 0 }
 0x168   : > { %v5400_v42 = vpop.permute.xlu0 %998  ;;  %v426_v47 = vsel %vm5258_vm1, %v4892_v58, 0  ;;  %v574_v57 = vsel %vm566_vm6, %v4813_v28, 0  ;;  %v423_v58 = vsel %vm421_vm3, %v4886_v55, 0 }
 0x169   : > { %1462 = vrot.lane.b32.xlu1 %v3872_v37, %s7484_s12  ;;  %v428_v37 = vsel %vm5258_vm1, %v4870_v49, 0  ;;  %v551_v49 = vsel %vm543_vm2, %v4813_v28, 0 }
 0x16a   : > { %1091 = vrot.lane.b32.xlu0 %v3942_v36, %s4531_s13  ;;  %v430_v36 = vsel %vm5258_vm1, %v4872_v50, 0 }
 0x16b   : > { %v5416_v59 = vpop.permute.xlu1 %869  ;;  %v3873_v41 = vcombine.low %v428_v37, %v430_v36  ;;  %v552_v37 = vsel %vm5297_vm4, %v5052_v25, 0 }
 0x16c   : > { %v5418_v19 = vpop.permute.xlu0 %861 }
 0x16d   : > { %1261 = vrot.lane.b32.xlu1 %v3966_v5, %s4532_s14  ;;  %v3939_v5 = vcombine.low %v549_v54, %v551_v49 }
 0x16e   : > { %1095 = vrot.lane.b32.xlu0 %v3944_v46, %s4531_s13 }
 0x16f   : > { %v5434_v48 = vpop.permute.xlu1 %1002 }
 0x170   : > { %v5436_v53 = vpop.permute.xlu0 %788 }
 0x171   : > { %1265 = vrot.lane.b32.xlu1 %v3968_v11, %s4532_s14 }
 0x172   : > { %1464 = vrot.lane.b32.xlu0 %v3873_v41, %s7484_s12  ;;  %v3941_v41 = vcombine.low %v550_v17, %v552_v37  ;;  %v3940_v17 = vcombine.high %v549_v54, %v551_v49  ;;  %v3964_v54 = vcombine.high %v572_v29, %v574_v57 }
 0x173   : > { %v5446_v50 = vpop.permute.xlu1 %865 }
 0x174   : > { %v5448_v46 = vpop.permute.xlu0 %776 }
 0x175   : > { %1085 = vrot.lane.b32.xlu1 %v3939_v5, %s4531_s13 }
 0x176   : > { %1263 = vrot.lane.b32.xlu0 %v3967_v21, %s4532_s14  ;;  %v3870_v21 = vcombine.low %v424_v2, %v426_v47  ;;  %v547_v2 = vsel %vm543_vm2, %v4835_v34, 0  ;;  %v573_v47 = vsel %vm5363_vm13, %v5050_v24, 0  ;;  %v570_v24 = vsel %vm566_vm6, %v4835_v34, 0 }
 0x177   : > { %v5458_v36 = vpop.permute.xlu1 %863  ;;  %v548_v34 = vsel %vm5297_vm4, %v5078_v63, 0 }
 0x178   : > { %v5460_v11 = vpop.permute.xlu0 %1012 }
 0x179   : > { %1089 = vrot.lane.b32.xlu1 %v3941_v41, %s4531_s13  ;;  %v3963_v41 = vcombine.low %v572_v29, %v574_v57 }
 0x17a   : > { %1460 = vrot.lane.b32.xlu0 %v3871_v20, %s7484_s12  ;;  %v425_v20 = vsel %vm421_vm3, %v4888_v56, 0  ;;  %v545_v56 = vsel %vm543_vm2, %v4830_v33, 0 }
 0x17b   : > { %v5470_v5 = vpop.permute.xlu1 %996  ;;  %v3869_v49 = vcombine.high %v423_v58, %v425_v20  ;;  %v3868_v37 = vcombine.low %v423_v58, %v425_v20  ;;  %v3937_v29 = vcombine.high %v545_v56, %v547_v2  ;;  %v568_v20 = vsel %vm566_vm6, %v4830_v33, 0 }
 0x17c   : > { %v5472_v18 = vpop.permute.xlu0 %1006  ;;  %v546_v33 = vsel %vm5297_vm4, %v5076_v62, 0 }
 0x17d   : > { %1458 = vrot.lane.b32.xlu1 %v3870_v21, %s7484_s12  ;;  %v575_v21 = vsel %vm5363_vm13, %v5052_v25, 0 }
 0x17e   : > { %1087 = vrot.lane.b32.xlu0 %v3940_v17, %s4531_s13  ;;  %v3965_v58 = vcombine.low %v573_v47, %v575_v21  ;;  %v3938_v21 = vcombine.low %v546_v33, %v548_v34  ;;  %v1025_v33 = vsel %vm7477_vm15, %v5460_v11, %v5340_v32 }
 0x17f   : > { %v5488_v8 = vpop.permute.xlu1 %859 }
 0x180   : > { %v5490_v26 = vpop.permute.xlu0 %1000 }
 0x181   : > { %1257 = vrot.lane.b32.xlu1 %v3964_v54, %s4532_s14  ;;  %v3961_v54 = vcombine.high %v568_v20, %v570_v24 }
 0x182   : > { %1456 = vrot.lane.b32.xlu0 %v3869_v49, %s7484_s12 }
 0x183   : > { %v5494_v28 = vpop.permute.xlu1 %857 }
 0x184   : > { %v5496_v55 = vpop.permute.xlu0 %994 }
 0x185   : > { %1454 = vrot.lane.b32.xlu1 %v3868_v37, %s7484_s12  ;;  %v3936_v37 = vcombine.low %v545_v56, %v547_v2 }
 0x186   : > { %1255 = vrot.lane.b32.xlu0 %v3963_v41, %s4532_s14 }
 0x187   : > { %v5512_v17 = vpop.permute.xlu1 %786 }
 0x188   : > { %v5514_v57 = vpop.permute.xlu0 %792 }
 0x189   : > { %1081 = vrot.lane.b32.xlu1 %v3937_v29, %s4531_s13  ;;  %v3960_v29 = vcombine.low %v568_v20, %v570_v24  ;;  %v888_v24 = vsel %vm7478_vm9, %v5368_v39, %v5358_v38 }
 0x18a   : > { %1259 = vrot.lane.b32.xlu0 %v3965_v58, %s4532_s14 }
 0x18b   : > { %v5524_v25 = vpop.permute.xlu1 %784 }
 0x18c   : > { %v5526_v49 = vpop.permute.xlu0 %790 }
 0x18d   : > { %1251 = vrot.lane.b32.xlu1 %v3961_v54, %s4532_s14 }
 0x18e   : > { %1079 = vrot.lane.b32.xlu0 %v3936_v37, %s4531_s13  ;;  %v1026_v37 = vsel %vm7477_vm15, %v5340_v32, %v5313_v22  ;;  %v889_v22 = vsel %vm7478_vm9, %v5358_v38, %v5329_v31  ;;  %v569_v32 = vsel %vm5363_vm13, %v5076_v62, 0 }
 0x18f   : > { %v5536_v41 = vpop.permute.xlu1 %774 }
 0x190   : > { %v5538_v47 = vpop.permute.xlu0 %780 }
 0x191   : > { %1548 = vrot.lane.b32.xlu1 %v5329_v31, %s7484_s12  ;;  %v1024_v31 = vsel %vm7477_vm15, %v5386_v45, %v5342_v35  ;;  %v1023_v35 = vsel %vm7477_vm15, %v5472_v18, %v5386_v45 }
 0x192   : > { %1083 = vrot.lane.b32.xlu0 %v3938_v21, %s4531_s13 }
 0x193   : > { %v1495_v56 = vpop.permute.xlu1 %1494 }
 0x194   : > { %v5543_v2 = vpop.permute.xlu0 %778 }
 0x195   : > { %1592 = vrot.lane.b32.xlu1 %v5460_v11, %s7484_s12  ;;  %v571_v11 = vsel %vm5363_vm13, %v5078_v63, 0 }
 0x196   : > { %1249 = vrot.lane.b32.xlu0 %v3960_v29, %s4532_s14 }
 0x197   : > { %v1499_v58 = vpop.permute.xlu1 %1498 }
 0x198   : > { %v5548_v54 = vpop.permute.xlu0 %772 }
 0x199   : > { %1596 = vrot.lane.b32.xlu1 %v1026_v37, %s7484_s12  ;;  %v3962_v37 = vcombine.low %v569_v32, %v571_v11 }
 0x19a   : > { %1594 = vrot.lane.b32.xlu0 %v1025_v33, %s7484_s12  ;;  %v887_v33 = vsel %vm7478_vm9, %v5398_v9, %v5360_v13 }
 0x19b   : > { %v1497_v20 = vpop.permute.xlu1 %1496 }
 0x19c   : > { %v1501_v34 = vpop.permute.xlu0 %1500  ;;  %v1684_v21 = vsel %vm564_vm5, %v1497_v20, %v1499_v58 }
 0x19d   : > { %v1685_v29 = vsel %vm564_vm5, %v1499_v58, %v1501_v34  ;;  %1544 = vrot.lane.b32.xlu1 %v888_v24, %s7484_s12  ;;  %v886_v24 = vsel %vm7478_vm9, %v5416_v59, %v5398_v9 }
 0x19e   : > { %1827 = vmatprep.subr.bf16.mxu0 %v1685_v29  ;;  %1546 = vrot.lane.b32.xlu0 %v889_v22, %s7484_s12  ;;  %v1022_v29 = vsel %vm7477_vm15, %v5434_v48, %v5370_v7  ;;  %v1021_v7 = vsel %vm7477_vm15, %v5490_v26, %v5434_v48 }
 0x19f   : > { %1828 = vmatpush1.bf16.msra.mxu0 %v1684_v21  ;;  %v5574_v39 = vpop.permute.xlu1 %1176 }
 0x1a0   : > { %v1493_v58 = vpop.permute.xlu0 %1492 }
 0x1a1   : > { %v1683_v38 = vsel %vm564_vm5, %v1493_v58, %v1495_v56  ;;  %1590 = vrot.lane.b32.xlu1 %v1024_v31, %s7484_s12  ;;  %v1020_v31 = vsel %vm7477_vm15, %v5470_v5, %v5400_v42  ;;  %v1019_v42 = vsel %vm7477_vm15, %v5496_v55, %v5470_v5  ;;  %vm7479_vm15 = vcmask 1031168  }
 0x1a2   : > { %1829 = vmatprep.subr.bf16.mxu0 %v1683_v38  ;;  %1253 = vrot.lane.b32.xlu0 %v3962_v37, %s4532_s14 }
 0x1a3   : > { %v5582_v62 = vpop.permute.xlu1 %1180 }
 0x1a4   : > { %v1491_v63 = vpop.permute.xlu0 %1490 }
 0x1a5   : > { %v1682_v20 = vsel %vm564_vm5, %v1491_v63, %v1493_v58  ;;  %1540 = vrot.lane.b32.xlu1 %v887_v33, %s7484_s12 }
 0x1a6   : > { %1830 = vmatpush1.bf16.msra.mxu0 %v1682_v20  ;;  %1588 = vrot.lane.b32.xlu0 %v1023_v35, %s7484_s12 }
 0x1a7   : > { %v1489_v56 = vpop.permute.xlu1 %1488 }
 0x1a8   : > { %v5596_v34 = vpop.permute.xlu0 %1178 }
 0x1a9   : > { %1538 = vrot.lane.b32.xlu1 %v886_v24, %s7484_s12 }
 0x1aa   : > { %1586 = vrot.lane.b32.xlu0 %v5472_v18, %s7484_s12  ;;  %v885_v18 = vsel %vm7478_vm9, %v5446_v50, %v5388_v44 }
 0x1ab   : > { %v5601_v21 = vpop.permute.xlu1 %1170 }
 0x1ac   : > { %v1487_v45 = vpop.permute.xlu0 %1486 }
 0x1ad   : > { %v1681_v22 = vsel %vm564_vm5, %v1487_v45, %v1489_v56  ;;  %1584 = vrot.lane.b32.xlu1 %v1022_v29, %s7484_s12 }
 0x1ae   : > { %1831 = vmatprep.subr.bf16.mxu0 %v1681_v22  ;;  %1542 = vrot.lane.b32.xlu0 %v5360_v13, %s7484_s12  ;;  %v884_v13 = vsel %vm7478_vm9, %v5458_v36, %v5446_v50 }
 0x1af   : > { %v5610_v9 = vpop.permute.xlu1 %1174 }
 0x1b0   : > { %v1485_v59 = vpop.permute.xlu0 %1484 }
 0x1b1   : > { %v1680_v32 = vsel %vm564_vm5, %v1485_v59, %v1487_v45  ;;  %1534 = vrot.lane.b32.xlu1 %v885_v18, %s7484_s12  ;;  %v941_v45 = vsel %vm7480_vm0, %v5226_v27, %v5213_v12 }
 0x1b2   : > { %1832 = vmatpush1.bf16.msra.mxu0 %v1680_v32  ;;  %1582 = vrot.lane.b32.xlu0 %v1021_v7, %s7484_s12  ;;  %v940_v7 = vsel %vm7480_vm0, %v5223_v40, %v5233_v30 }
 0x1b3   : > { %v1483_v11 = vpop.permute.xlu1 %1482 }
 0x1b4   : > { %v5624_v58 = vpop.permute.xlu0 %1172 }
 0x1b5   : > { %1532 = vrot.lane.b32.xlu1 %v884_v13, %s7484_s12 }
 0x1b6   : > { %1580 = vrot.lane.b32.xlu0 %v5490_v26, %s7484_s12  ;;  %v883_v26 = vsel %vm7478_vm9, %v5488_v8, %v5418_v19 }
 0x1b7   : > { %v5629_v37 = vpop.permute.xlu1 %1164 }
 0x1b8   : > { %v1481_v48 = vpop.permute.xlu0 %1480 }
 0x1b9   : > { %v1679_v38 = vsel %vm564_vm5, %v1481_v48, %v1483_v11  ;;  %1578 = vrot.lane.b32.xlu1 %v1020_v31, %s7484_s12 }
 0x1ba   : > { %1833 = vmatprep.subr.bf16.mxu0 %v1679_v38  ;;  %1536 = vrot.lane.b32.xlu0 %v5388_v44, %s7484_s12  ;;  %v882_v44 = vsel %vm7478_vm9, %v5494_v28, %v5488_v8  ;;  %vm1188_vm9 = vcmask 777216  }
 0x1bb   : > { %v5638_v50 = vpop.permute.xlu1 %1168 }
 0x1bc   : > { %v1479_v36 = vpop.permute.xlu0 %1478 }
 0x1bd   : > { %v1678_v63 = vsel %vm564_vm5, %v1479_v36, %v1481_v48  ;;  %1528 = vrot.lane.b32.xlu1 %v883_v26, %s7484_s12 }
 0x1be   : > { %1834 = vmatpush1.bf16.msra.mxu0 %v1678_v63  ;;  %1576 = vrot.lane.b32.xlu0 %v1019_v42, %s7484_s12  ;;  %v798_v42 = vsel %vm7479_vm15, %v5536_v41, %v5448_v46 }
 0x1bf   : > { %v1477_v33 = vpop.permute.xlu1 %1476 }
 0x1c0   : > { %v5652_v20 = vpop.permute.xlu0 %1166 }
 0x1c1   : > { %1526 = vrot.lane.b32.xlu1 %v882_v44, %s7484_s12 }
 0x1c2   : > { %1574 = vrot.lane.b32.xlu0 %v5496_v55, %s7484_s12  ;;  %v804_v55 = vsel %vm7479_vm15, %v5514_v57, %v5311_v4 }
 0x1c3   : > { %v5657_v35 = vpop.permute.xlu1 %1097 }
 0x1c4   : > { %v1475_v5 = vpop.permute.xlu0 %1474 }
 0x1c5   : > { %v1677_v56 = vsel %vm564_vm5, %v1475_v5, %v1477_v33  ;;  %1572 = vrot.lane.b32.xlu1 %v5213_v12, %s7484_s12 }
 0x1c6   : > { %1835 = vmatprep.subr.bf16.mxu0 %v1677_v56  ;;  %1530 = vrot.lane.b32.xlu0 %v5418_v19, %s7484_s12  ;;  %v803_v19 = vsel %vm7479_vm15, %v5526_v49, %v5514_v57 }
 0x1c7   : > { %v5664_v8 = vpop.permute.xlu1 %1101 }
 0x1c8   : > { %v1473_v28 = vpop.permute.xlu0 %1472 }
 0x1c9   : > { %v1676_v24 = vsel %vm564_vm5, %v1473_v28, %v1475_v5  ;;  %1522 = vrot.lane.b32.xlu1 %v804_v55, %s7484_s12  ;;  %v1196_v28 = vsel %vm1188_vm9, %v5289_v1, %v5285_v10  ;;  %v1195_v10 = vsel %vm1188_vm9, %v5254_v61, %v5289_v1  ;;  %v1192_v1 = vsel %vm1188_vm9, %v5624_v58, %v5610_v9 }
 0x1ca   : > { %1836 = vmatpush1.bf16.msra.mxu0 %v1676_v24  ;;  %1570 = vrot.lane.b32.xlu0 %v941_v45, %s7484_s12 }
 0x1cb   : > { %v1471_v29 = vpop.permute.xlu1 %1470 }
 0x1cc   : > { %v5678_v22 = vpop.permute.xlu0 %1099 }
 0x1cd   : > { %1520 = vrot.lane.b32.xlu1 %v803_v19, %s7484_s12 }
 0x1ce   : > { %1568 = vrot.lane.b32.xlu0 %v5226_v27, %s7484_s12  ;;  %v802_v27 = vsel %vm7479_vm15, %v5512_v17, %v5436_v53 }
 0x1cf   : > { %v5683_v59 = vpop.permute.xlu1 %1269 }
 0x1d0   : > { %v1469_v12 = vpop.permute.xlu0 %1468 }
 0x1d1   : > { %v1675_v18 = vsel %vm564_vm5, %v1469_v12, %v1471_v29  ;;  %1566 = vrot.lane.b32.xlu1 %v5233_v30, %s7484_s12 }
 0x1d2   : > { %1837 = vmatprep.subr.bf16.mxu0 %v1675_v18  ;;  %1524 = vrot.lane.b32.xlu0 %v5311_v4, %s7484_s12  ;;  %v801_v4 = vsel %vm7479_vm15, %v5524_v25, %v5512_v17  ;;  %v800_v17 = vsel %vm7479_vm15, %v5538_v47, %v5327_v15 }
 0x1d3   : > { %v1467_v57 = vpop.permute.xlu1 %1466 }
 0x1d4   : > { %v5690_v49 = vpop.permute.xlu0 %1267  ;;  %v1674_v32 = vsel %vm564_vm5, %v1467_v57, %v1469_v12  ;;  %v1194_v12 = vsel %vm1188_vm9, %v5596_v34, %v5582_v62  ;;  %v1191_v57 = vsel %vm1188_vm9, %v5601_v21, %v5624_v58 }
 0x1d5   : > { %1838 = vmatpush1.bf16.msra.mxu0 %v1674_v32  ;;  %1516 = vrot.lane.b32.xlu1 %v802_v27, %s7484_s12  ;;  %v4265_v27 = vld [vmem:[#allocation6 + $0x4] ss:$20 sps:$4 sm:$0xff]  }
 0x1d6   : > { %1564 = vrot.lane.b32.xlu0 %v940_v7, %s7484_s12  ;;  %v1190_v7 = vsel %vm1188_vm9, %v5652_v20, %v5638_v50  ;;  %1859 = vmatprep.mubr.bf16.mxu0 %v4265_v27  ;;  %v1313_v27 = vld [vmem:[%s7454_s2 + $0x38] sm:$0xff] }
 0x1d7   : > { %v5701_v11 = vpop.permute.xlu1 %1093 }
 0x1d8   : > { %v5706_v13 = vpop.permute.xlu0 %1271 }
 0x1d9   : > { %1514 = vrot.lane.b32.xlu1 %v801_v4, %s7484_s12 }
 0x1da   : > { %1562 = vrot.lane.b32.xlu0 %v5223_v40, %s7484_s12  ;;  %v939_v40 = vsel %vm7480_vm0, %v5248_v52, %v5231_v3 }
 0x1db   : > { %v1463_v48 = vpop.permute.xlu1 %1462 }
 0x1dc   : > { %v5711_v31 = vpop.permute.xlu0 %1091 }
 0x1dd   : > { %1560 = vrot.lane.b32.xlu1 %v5231_v3, %s7484_s12 }
 0x1de   : > { %1518 = vrot.lane.b32.xlu0 %v5436_v53, %s7484_s12  ;;  %v799_v53 = vsel %vm7479_vm15, %v5543_v2, %v5538_v47 }
 0x1df   : > { %v5717_v30 = vpop.permute.xlu1 %1261 }
 0x1e0   : > { %v5719_v38 = vpop.permute.xlu0 %1095 }
 0x1e1   : > { %1510 = vrot.lane.b32.xlu1 %v800_v17, %s7484_s12 }
 0x1e2   : > { %1558 = vrot.lane.b32.xlu0 %v939_v40, %s7484_s12 }
 0x1e3   : > { %v5729_v25 = vpop.permute.xlu1 %1265 }
 0x1e4   : > { %v1465_v36 = vpop.permute.xlu0 %1464 }
 0x1e5   : > { %v1673_v26 = vsel %vm564_vm5, %v1463_v48, %v1465_v36  ;;  %1508 = vrot.lane.b32.xlu1 %v799_v53, %s7484_s12 }
 0x1e6   : > { %1839 = vmatprep.subr.bf16.mxu0 %v1673_v26  ;;  %1556 = vrot.lane.b32.xlu0 %v5248_v52, %s7484_s12  ;;  %v938_v52 = vsel %vm7480_vm0, %v5245_v0, %v5256_v14  ;;  %vm1273_vm0 = vcmask 769024  }
 0x1e7   : > { %v5738_v3 = vpop.permute.xlu1 %1085 }
 0x1e8   : > { %v5740_v63 = vpop.permute.xlu0 %1263 }
 0x1e9   : > { %1554 = vrot.lane.b32.xlu1 %v5256_v14, %s7484_s12 }
 0x1ea   : > { %1512 = vrot.lane.b32.xlu0 %v5327_v15, %s7484_s12  ;;  %v797_v15 = vsel %vm7479_vm15, %v5548_v54, %v5536_v41  ;;  %vm1103_vm15 = vcmask 785408  }
 0x1eb   : > { %v5746_v47 = vpop.permute.xlu1 %1089  ;;  %v1111_v58 = vsel %vm1103_vm15, %v5678_v22, %v5664_v8  ;;  %v1280_v8 = vsel %vm1273_vm0, %v5690_v49, %v5683_v59  ;;  %v1110_v50 = vsel %vm1103_vm15, %v5657_v35, %v5678_v22  ;;  %v1109_v36 = vsel %vm1103_vm15, %v5701_v11, %v5719_v38 }
 0x1ec   : > { %v1461_v2 = vpop.permute.xlu0 %1460  ;;  %v1108_v38 = vsel %vm1103_vm15, %v5711_v31, %v5701_v11 }
 0x1ed   : > { %v1672_v33 = vsel %vm564_vm5, %v1461_v2, %v1463_v48  ;;  %1504 = vrot.lane.b32.xlu1 %v798_v42, %s7484_s12  ;;  %v1281_v2 = vsel %vm1273_vm0, %v5683_v59, %v5706_v13 }
 0x1ee   : > { %1840 = vmatpush1.bf16.msra.mxu0 %v1672_v33  ;;  %1552 = vrot.lane.b32.xlu0 %v938_v52, %s7484_s12 }
 0x1ef   : > { %v1459_v44 = vpop.permute.xlu1 %1458 }
 0x1f0   : > { %v5760_v5 = vpop.permute.xlu0 %1087 }
 0x1f1   : > { %1502 = vrot.lane.b32.xlu1 %v797_v15, %s7484_s12 }
 0x1f2   : > { %1550 = vrot.lane.b32.xlu0 %v5245_v0, %s7484_s12  ;;  %v1193_v0 = vsel %vm1188_vm9, %v5574_v39, %v5596_v34 }
 0x1f3   : > { %v5765_v56 = vpop.permute.xlu1 %1257 }
 0x1f4   : > { %v1457_v14 = vpop.permute.xlu0 %1456 }
 0x1f5   : > { %v1671_v55 = vsel %vm564_vm5, %v1457_v14, %v1459_v44  ;;  %1644 = vrot.lane.b32.xlu1 %v1196_v28, %s7484_s12  ;;  %v1107_v28 = vsel %vm1103_vm15, %v5760_v5, %v5746_v47  ;;  %v1106_v47 = vsel %vm1103_vm15, %v5738_v3, %v5760_v5 }
 0x1f6   : > { %1506 = vrot.lane.b32.xlu0 %v5448_v46, %s7484_s12  ;;  %1841 = vmatprep.subr.bf16.mxu0 %v1671_v55  ;;  %v1279_v55 = vsel %vm1273_vm0, %v5740_v63, %v5729_v25 }
 0x1f7   : > { %v1455_v41 = vpop.permute.xlu1 %1454 }
 0x1f8   : > { %v5774_v54 = vpop.permute.xlu0 %1255  ;;  %v1670_v24 = vsel %vm564_vm5, %v1455_v41, %v1457_v14 }
 0x1f9   : > { %1636 = vrot.lane.b32.xlu1 %v1193_v0, %s7484_s12  ;;  %1842 = vmatpush1.bf16.msra.mxu0 %v1670_v24  ;;  %v1276_v0 = vsel %vm1273_vm0, %v5774_v54, %v5765_v56 }
 0x1fa   : > { %1642 = vrot.lane.b32.xlu0 %v1195_v10, %s7484_s12 }
 0x1fb   : > { %v5785_v46 = vpop.permute.xlu1 %1081 }
 0x1fc   : > { %v5787_v45 = vpop.permute.xlu0 %1259 }
 0x1fd   : > { %1634 = vrot.lane.b32.xlu1 %v5574_v39, %s7484_s12 }
 0x1fe   : > { %1640 = vrot.lane.b32.xlu0 %v5254_v61, %s7484_s12  ;;  %v1189_v61 = vsel %vm1188_vm9, %v5629_v37, %v5652_v20 }
 0x1ff   : > { %v5793_v29 = vpop.permute.xlu1 %1251 }
 0x200   : > { %v5795_v19 = vpop.permute.xlu0 %1079 }
 0x201   : > { %1632 = vrot.lane.b32.xlu1 %v1192_v1, %s7484_s12  ;;  %v4277_v1 = vld [vmem:[#allocation6 + $0xc] ss:$20 sps:$4 sm:$0xff]  }
 0x202   : > { %1638 = vrot.lane.b32.xlu0 %v1194_v12, %s7484_s12  ;;  %1932 = vmatprep.mubr.bf16.mxu1 %v4277_v1 }
 0x203   : > { %v1549_v39 = vpop.permute.xlu1 %1548 }
 0x204   : > { %v5805_v18 = vpop.permute.xlu0 %1083 }
 0x205   : > { %1624 = vrot.lane.b32.xlu1 %v1189_v61, %s7484_s12 }
 0x206   : > { %1630 = vrot.lane.b32.xlu0 %v1191_v57, %s7484_s12 }
 0x207   : > { %v1593_v62 = vpop.permute.xlu1 %1592 }
 0x208   : > { %v5815_v34 = vpop.permute.xlu0 %1249 }
 0x209   : > { %1622 = vrot.lane.b32.xlu1 %v5629_v37, %s7484_s12 }
 0x20a   : > { %1628 = vrot.lane.b32.xlu0 %v5601_v21, %s7484_s12 }
 0x20b   : > { %v1597_v9 = vpop.permute.xlu1 %1596 }
 0x20c   : > { %v1595_v32 = vpop.permute.xlu0 %1594 }
 0x20d   : > { %1620 = vrot.lane.b32.xlu1 %v1111_v58, %s7484_s12  ;;  %v1717_v4 = vsel %vm564_vm5, %v1595_v32, %v1597_v9  ;;  %v1716_v37 = vsel %vm564_vm5, %v1593_v62, %v1595_v32  ;;  %v1274_v9 = vsel %vm1273_vm0, %v5815_v34, %v5793_v29 }
 0x20e   : > { %1626 = vrot.lane.b32.xlu0 %v1190_v7, %s7484_s12  ;;  %1900 = vmatprep.subr.bf16.mxu1 %v1717_v4 }
 0x20f   : > { %1901 = vmatpush1.bf16.msra.mxu1 %v1716_v37  ;;  %v1545_v21 = vpop.permute.xlu1 %1544 }
 0x210   : > { %v1547_v48 = vpop.permute.xlu0 %1546 }
 0x211   : > { %1666 = vrot.lane.b32.xlu1 %v1280_v8, %s7484_s12  ;;  %v1701_v20 = vsel %vm564_vm5, %v1547_v48, %v1549_v39  ;;  %v1700_v17 = vsel %vm564_vm5, %v1545_v21, %v1547_v48  ;;  %v1105_v39 = vsel %vm1103_vm15, %v5785_v46, %v5805_v18  ;;  %v1104_v18 = vsel %vm1103_vm15, %v5795_v19, %v5785_v46  ;;  %v1312_v48 = vld [vmem:[%s7454_s2 + $0x30] sm:$0xff] }
 0x212   : > { %1618 = vrot.lane.b32.xlu0 %v1110_v50, %s7484_s12  ;;  %1843 = vmatprep.subr.bf16.mxu0 %v1701_v20 }
 0x213   : > { %1844 = vmatpush2.bf16.msra.mxu0 %v1700_v17  ;;  %v1591_v40 = vpop.permute.xlu1 %1590  ;;  %v1311_v17 = vld [vmem:[%s7454_s2 + $0x28] sm:$0xff] }
 0x214   : > { %v5841_v53 = vpop.permute.xlu0 %1253 }
 0x215   : > { %1664 = vrot.lane.b32.xlu1 %v5690_v49, %s7484_s12  ;;  %v1275_v37 = vsel %vm1273_vm0, %v5793_v29, %v5841_v53  ;;  %v1308_v29 = vld [vmem:[%s7454_s2 + $0x10] sm:$0xff] }
 0x216   : > { %1616 = vrot.lane.b32.xlu0 %v5657_v35, %s7484_s12  ;;  %v1278_v35 = vsel %vm1273_vm0, %v5717_v30, %v5740_v63 }
 0x217   : > { %v1541_v22 = vpop.permute.xlu1 %1540 }
 0x218   : > { %v1589_v26 = vpop.permute.xlu0 %1588 }
 0x219   : > { %1614 = vrot.lane.b32.xlu1 %v1109_v36, %s7484_s12  ;;  %v1715_v42 = vsel %vm564_vm5, %v1589_v26, %v1591_v40  ;;  %v5943_v36 = vld [vmem:[#allocation2 + $0x7c] sm:$0xf] }
 0x21a   : > { %1668 = vrot.lane.b32.xlu0 %v1281_v2, %s7484_s12  ;;  %1902 = vmatprep.subr.bf16.mxu1 %v1715_v42  ;;  %v1306_v2 = vld [vmem:[%s7454_s2] sm:$0xff] }
 0x21b   : > { %v1539_v49 = vpop.permute.xlu1 %1538 }
 0x21c   : > { %v1587_v33 = vpop.permute.xlu0 %1586  ;;  %v1698_v11 = vsel %vm564_vm5, %v1539_v49, %v1541_v22  ;;  %v1309_v49 = vld [vmem:[%s7454_s2 + $0x18] sm:$0xff] }
 0x21d   : > { %1660 = vrot.lane.b32.xlu1 %v1278_v35, %s7484_s12  ;;  %v1714_v59 = vsel %vm564_vm5, %v1587_v33, %v1589_v26 }
 0x21e   : > { %1612 = vrot.lane.b32.xlu0 %v1108_v38, %s7484_s12  ;;  %1903 = vmatpush1.bf16.msra.mxu1 %v1714_v59  ;;  %v2221_v59 = vsel %vm4971_vm8, %v5943_v36, 0 }
 0x21f   : > { %v1585_v13 = vpop.permute.xlu1 %1584 }
 0x220   : > { %v1543_v52 = vpop.permute.xlu0 %1542 }
 0x221   : > { %1658 = vrot.lane.b32.xlu1 %v5717_v30, %s7484_s12  ;;  %v1699_v44 = vsel %vm564_vm5, %v1541_v22, %v1543_v52  ;;  %v5941_v22 = vld [vmem:[#allocation2 + $0x6c] sm:$0xf] }
 0x222   : > { %1610 = vrot.lane.b32.xlu0 %v5711_v31, %s7484_s12  ;;  %1845 = vmatprep.subr.bf16.mxu0 %v1699_v44  ;;  %v2219_v38 = vsel %vm4971_vm8, %v5941_v22, 0  ;;  %v5959_v52 = vld [vmem:[#allocation2 + $0x4c] sm:$0xf]  ;;  %v5961_v44 = vld [vmem:[#allocation2 + $0x5c] sm:$0xf] }
 0x223   : > { %1846 = vmatpush2.bf16.msra.mxu0 %v1698_v11  ;;  %v1535_v15 = vpop.permute.xlu1 %1534 }
 0x224   : > { %v1583_v14 = vpop.permute.xlu0 %1582 }
 0x225   : > { %1608 = vrot.lane.b32.xlu1 %v1107_v28, %s7484_s12  ;;  %v1713_v30 = vsel %vm564_vm5, %v1583_v14, %v1585_v13 }
 0x226   : > { %1662 = vrot.lane.b32.xlu0 %v1279_v55, %s7484_s12  ;;  %1904 = vmatprep.subr.bf16.mxu1 %v1713_v30  ;;  %v2215_v55 = vsel %vm4971_vm8, %v5959_v52, 0  ;;  %v2217_v30 = vsel %vm4971_vm8, %v5961_v44, 0 }
 0x227   : > { %v1533_v31 = vpop.permute.xlu1 %1532 }
 0x228   : > { %v1581_v41 = vpop.permute.xlu0 %1580  ;;  %v1696_v5 = vsel %vm564_vm5, %v1533_v31, %v1535_v15 }
 0x229   : > { %1654 = vrot.lane.b32.xlu1 %v1276_v0, %s7484_s12  ;;  %v1712_v25 = vsel %vm564_vm5, %v1581_v41, %v1583_v14  ;;  %v4071_v14 = vcombine.low %v2219_v38, %v2221_v59  ;;  %v5974_v41 = vld [vmem:[#allocation2 + $0x2c] sm:$0xf]  ;;  %v5976_v0 = vld [vmem:[#allocation2 + $0x3c] sm:$0xf] }
 0x22a   : > { %1606 = vrot.lane.b32.xlu0 %v1106_v47, %s7484_s12  ;;  %1905 = vmatpush1.bf16.msra.mxu1 %v1712_v25  ;;  %v4095_v47 = vcombine.low %v5941_v22, %v5943_v36 }
 0x22b   : > { %v1579_v63 = vpop.permute.xlu1 %1578 }
 0x22c   : > { %v1537_v24 = vpop.permute.xlu0 %1536 }
 0x22d   : > { %1652 = vrot.lane.b32.xlu1 %v5774_v54, %s7484_s12  ;;  %v1697_v10 = vsel %vm564_vm5, %v1535_v15, %v1537_v24  ;;  %v1277_v54 = vsel %vm1273_vm0, %v5765_v56, %v5787_v45  ;;  %v1307_v15 = vld [vmem:[%s7454_s2 + $0x8] sm:$0xff] }
 0x22e   : > { %1604 = vrot.lane.b32.xlu0 %v5738_v3, %s7484_s12  ;;  %1847 = vmatprep.subr.bf16.mxu0 %v1697_v10  ;;  %v2211_v10 = vsel %vm4971_vm8, %v5974_v41, 0 }
 0x22f   : > { %1848 = vmatpush2.bf16.msra.mxu0 %v1696_v5  ;;  %v1529_v12 = vpop.permute.xlu1 %1528  ;;  %v2213_v5 = vsel %vm4971_vm8, %v5976_v0, 0 }
 0x230   : > { %v1577_v61 = vpop.permute.xlu0 %1576 }
 0x231   : > { %1602 = vrot.lane.b32.xlu1 %v1105_v39, %s7484_s12  ;;  %v1711_v3 = vsel %vm564_vm5, %v1577_v61, %v1579_v63  ;;  %v4068_v63 = vcombine.low %v2215_v55, %v2217_v30  ;;  %v5990_v39 = vld [vmem:[#allocation2 + $0x1c] sm:$0xf] }
 0x232   : > { %1656 = vrot.lane.b32.xlu0 %v1277_v54, %s7484_s12  ;;  %1906 = vmatprep.subr.bf16.mxu1 %v1711_v3  ;;  %v4092_v54 = vcombine.low %v5959_v52, %v5961_v44 }
 0x233   : > { %v1527_v57 = vpop.permute.xlu1 %1526 }
 0x234   : > { %v1575_v62 = vpop.permute.xlu0 %1574  ;;  %v1694_v46 = vsel %vm564_vm5, %v1527_v57, %v1529_v12  ;;  %v4065_v57 = vcombine.low %v2211_v10, %v2213_v5  ;;  %v4266_v10 = vld [vmem:[#allocation6 + $0x2c] ss:$20 sps:$4 sm:$0xff]  }
 0x235   : > { %1648 = vrot.lane.b32.xlu1 %v1274_v9, %s7484_s12  ;;  %v1710_v56 = vsel %vm564_vm5, %v1575_v62, %v1577_v61 }
 0x236   : > { %1600 = vrot.lane.b32.xlu0 %v1104_v18, %s7484_s12  ;;  %1907 = vmatpush1.bf16.msra.mxu1 %v1710_v56  ;;  %v2209_v18 = vsel %vm4971_vm8, %v5990_v39, 0 }
 0x237   : > { %v1573_v45 = vpop.permute.xlu1 %1572 }
 0x238   : > { %v1531_v32 = vpop.permute.xlu0 %1530 }
 0x239   : > { %1646 = vrot.lane.b32.xlu1 %v5815_v34, %s7484_s12  ;;  %v1695_v58 = vsel %vm564_vm5, %v1529_v12, %v1531_v32  ;;  %v5988_v12 = vld [vmem:[#allocation2 + $0xc] sm:$0xf] }
 0x23a   : > { %1598 = vrot.lane.b32.xlu0 %v5795_v19, %s7484_s12  ;;  %1849 = vmatprep.subr.bf16.mxu0 %v1695_v58  ;;  %v1310_v19 = vld [vmem:[%s7454_s2 + $0x20] sm:$0xff]  ;;  %v2207_v9 = vsel %vm4971_vm8, %v5988_v12, 0  ;;  %vm1814_vm8 = vcmask 523264  }
 0x23b   : > { %1850 = vmatpush2.bf16.msra.mxu0 %v1694_v46  ;;  %v1523_v7 = vpop.permute.xlu1 %1522  ;;  %v4062_v58 = vcombine.low %v2207_v9, %v2209_v18 }
 0x23c   : > { %v1571_v4 = vpop.permute.xlu0 %1570 }
 0x23d   : > { %1351 = vperm.xlu1 %4242, %v1313_v27   ;;  %v1709_v34 = vsel %vm564_vm5, %v1571_v4, %v1573_v45  ;;  %v4089_v45 = vcombine.low %v5974_v41, %v5976_v0  ;;  %v2251_v27 = vsel %vm5363_vm13, %v5941_v22, 0 }
 0x23e   : > { %1650 = vrot.lane.b32.xlu0 %v1275_v37, %s7484_s12  ;;  %1908 = vmatprep.subr.bf16.mxu1 %v1709_v34  ;;  %v4086_v37 = vcombine.low %v5988_v12, %v5990_v39 }
 0x23f   : > { %v1521_v21 = vpop.permute.xlu1 %1520 }
 0x240   : > { %v1569_v8 = vpop.permute.xlu0 %1568  ;;  %v1692_v26 = vsel %vm564_vm5, %v1521_v21, %v1523_v7 }
 0x241   : > { %1336 = vperm.xlu1 %4242, %v1310_v19   ;;  %v1708_v50 = vsel %vm564_vm5, %v1569_v8, %v1571_v4  ;;  %v2233_v8 = vsel %vm5297_vm4, %v5961_v44, 0 }
 0x242   : > { %1346 = vperm.xlu0 %4241, %v1312_v48   ;;  %1909 = vmatpush1.bf16.msra.mxu1 %v1708_v50  ;;  %v2231_v48 = vsel %vm5297_vm4, %v5959_v52, 0 }
 0x243   : > { %v1567_v20 = vpop.permute.xlu1 %1566 }
 0x244   : > { %v1525_v40 = vpop.permute.xlu0 %1524 }
 0x245   : > { %1326 = vperm.xlu1 %4242, %v1308_v29   ;;  %v1693_v53 = vsel %vm564_vm5, %v1523_v7, %v1525_v40  ;;  %v2253_v7 = vsel %vm5363_vm13, %v5943_v36, 0  ;;  %v2235_v29 = vsel %vm5297_vm4, %v5941_v22, 0  ;;  %v2245_v22 = vsel %vm5363_vm13, %v5976_v0, 0 }
 0x246   : > { %1341 = vperm.xlu0 %4241, %v1311_v17   ;;  %1851 = vmatprep.subr.bf16.mxu0 %v1693_v53  ;;  %v4107_v19 = vcombine.low %v2251_v27, %v2253_v7  ;;  %v4080_v53 = vcombine.low %v2231_v48, %v2233_v8 }
 0x247   : > { %1852 = vmatpush2.bf16.msra.mxu0 %v1692_v26  ;;  %v1517_v42 = vpop.permute.xlu1 %1516 }
 0x248   : > { %v1565_v33 = vpop.permute.xlu0 %1564 }
 0x249   : > { %1316 = vperm.xlu1 %4242, %v1306_v2   ;;  %v1707_v13 = vsel %vm564_vm5, %v1565_v33, %v1567_v20  ;;  %v2237_v20 = vsel %vm5297_vm4, %v5943_v36, 0 }
 0x24a   : > { %1331 = vperm.xlu0 %4241, %v1309_v49   ;;  %1910 = vmatprep.subr.bf16.mxu1 %v1707_v13  ;;  %v4083_v2 = vcombine.low %v2235_v29, %v2237_v20  ;;  %v2247_v49 = vsel %vm5363_vm13, %v5959_v52, 0  ;;  %v7524_v20 = vmov 0  }
 0x24b   : > { %v1515_v11 = vpop.permute.xlu1 %1514 }
 0x24c   : > { %v1563_v28 = vpop.permute.xlu0 %1562  ;;  %v1690_v61 = vsel %vm564_vm5, %v1515_v11, %v1517_v42  ;;  %v2223_v11 = vsel %vm5297_vm4, %v5988_v12, 0 }
 0x24d   : > { %2684 = vrot.lane.b32.xlu1 %v4071_v14, %s4529_s7  ;;  %v1706_v31 = vsel %vm564_vm5, %v1563_v28, %v1565_v33  ;;  %v2249_v33 = vsel %vm5363_vm13, %v5961_v44, 0  ;;  %v2227_v44 = vsel %vm5297_vm4, %v5974_v41, 0  ;;  %v2229_v14 = vsel %vm5297_vm4, %v5976_v0, 0  ;;  %v4263_v0 = vld [vmem:[#allocation6] ss:$20 sps:$4 sm:$0xff]  }
 0x24e   : > { %1321 = vperm.xlu0 %4241, %v1307_v15   ;;  %1911 = vmatpush1.bf16.msra.mxu1 %v1706_v31  ;;  %v4104_v13 = vcombine.low %v2247_v49, %v2249_v33  ;;  %v2225_v15 = vsel %vm5297_vm4, %v5990_v39, 0  ;;  %v4077_v31 = vcombine.low %v2227_v44, %v2229_v14 }
 0x24f   : > { %v1561_v25 = vpop.permute.xlu1 %1560  ;;  %v4074_v55 = vcombine.low %v2223_v11, %v2225_v15 }
 0x250   : > { %v1519_v24 = vpop.permute.xlu0 %1518 }
 0x251   : > { %2678 = vrot.lane.b32.xlu1 %v4068_v63, %s4529_s7  ;;  %v1691_v1 = vsel %vm564_vm5, %v1517_v42, %v1519_v24  ;;  %v2243_v42 = vsel %vm5363_vm13, %v5974_v41, 0 }
 0x252   : > { %2852 = vrot.lane.b32.xlu0 %v4095_v47, %s4527_s28  ;;  %1853 = vmatprep.subr.bf16.mxu0 %v1691_v1  ;;  %v4101_v38 = vcombine.low %v2243_v42, %v2245_v22  ;;  %v2239_v47 = vsel %vm5363_vm13, %v5988_v12, 0 }
 0x253   : > { %1854 = vmatpush2.bf16.msra.mxu0 %v1690_v61  ;;  %v1511_v3 = vpop.permute.xlu1 %1510  ;;  %v4268_v61 = vld [vmem:[#allocation6 + $0x28] ss:$20 sps:$4 sm:$0xff]  }
 0x254   : > { %v1559_v62 = vpop.permute.xlu0 %1558 }
 0x255   : > { %2672 = vrot.lane.b32.xlu1 %v4065_v57, %s4529_s7  ;;  %v1705_v56 = vsel %vm564_vm5, %v1559_v62, %v1561_v25  ;;  %v2241_v25 = vsel %vm5363_vm13, %v5990_v39, 0 }
 0x256   : > { %2846 = vrot.lane.b32.xlu0 %v4092_v54, %s4527_s28  ;;  %1912 = vmatprep.subr.bf16.mxu1 %v1705_v56  ;;  %v4098_v24 = vcombine.low %v2239_v47, %v2241_v25 }
 0x257   : > { %v1509_v32 = vpop.permute.xlu1 %1508 }
 0x258   : > { %v1557_v46 = vpop.permute.xlu0 %1556  ;;  %v1688_v17 = vsel %vm564_vm5, %v1509_v32, %v1511_v3  ;;  %v4271_v32 = vld [vmem:[#allocation6 + $0x50] ss:$20 sps:$4 sm:$0xff]  }
 0x259   : > { %2666 = vrot.lane.b32.xlu1 %v4062_v58, %s4529_s7  ;;  %v1704_v4 = vsel %vm564_vm5, %v1557_v46, %v1559_v62  ;;  %v4272_v46 = vld [vmem:[#allocation6 + $0x7c] ss:$20 sps:$4 sm:$0xff]  }
 0x25a   : > { %2840 = vrot.lane.b32.xlu0 %v4089_v45, %s4527_s28  ;;  %1913 = vmatpush1.bf16.msra.mxu1 %v1704_v4 }
 0x25b   : > { %v1555_v34 = vpop.permute.xlu1 %1554 }
 0x25c   : > { %v1513_v21 = vpop.permute.xlu0 %1512 }
 0x25d   : > { %2936 = vrot.lane.b32.xlu1 %v4107_v19, %s4532_s14  ;;  %v1689_v50 = vsel %vm564_vm5, %v1511_v3, %v1513_v21  ;;  %v4269_v3 = vld [vmem:[#allocation6 + $0x54] ss:$20 sps:$4 sm:$0xff]   ;;  %v4274_v21 = vld [vmem:[#allocation6 + $0x78] ss:$20 sps:$4 sm:$0xff]  }
 0x25e   : > { %2834 = vrot.lane.b32.xlu0 %v4086_v37, %s4527_s28  ;;  %1855 = vmatprep.subr.bf16.mxu0 %v1689_v50 }
 0x25f   : > { %1856 = vmatpush2.bf16.msra.mxu0 %v1688_v17  ;;  %v1505_v40 = vpop.permute.xlu1 %1504 }
 0x260   : > { %v1553_v26 = vpop.permute.xlu0 %1552 }
 0x261   : > { %2762 = vrot.lane.b32.xlu1 %v4080_v53, %s4531_s13  ;;  %v1703_v36 = vsel %vm564_vm5, %v1553_v26, %v1555_v34 }
 0x262   : > { %2768 = vrot.lane.b32.xlu0 %v4083_v2, %s4531_s13  ;;  %1914 = vmatprep.subr.bf16.mxu1 %v1703_v36 }
 0x263   : > { %v1503_v35 = vpop.permute.xlu1 %1502 }
 0x264   : > { %v1551_v59 = vpop.permute.xlu0 %1550  ;;  %v1686_v41 = vsel %vm564_vm5, %v1503_v35, %v1505_v40 }
 0x265   : > { %2924 = vrot.lane.b32.xlu1 %v4101_v38, %s4532_s14  ;;  %v1702_v52 = vsel %vm564_vm5, %v1551_v59, %v1553_v26 }
 0x266   : > { %2930 = vrot.lane.b32.xlu0 %v4104_v13, %s4532_s14  ;;  %1915 = vmatpush1.bf16.msra.mxu1 %v1702_v52 }
 0x267   : > { %v1645_v28 = vpop.permute.xlu1 %1644 }
 0x268   : > { %v1507_v30 = vpop.permute.xlu0 %1506 }
 0x269   : > { %2750 = vrot.lane.b32.xlu1 %v4074_v55, %s4531_s13  ;;  %v1687_v60 = vsel %vm564_vm5, %v1505_v40, %v1507_v30 }
 0x26a   : > { %2756 = vrot.lane.b32.xlu0 %v4077_v31, %s4531_s13  ;;  %1857 = vmatprep.subr.bf16.mxu0 %v1687_v60 }
 0x26b   : > { %1858 = vmatpush2.bf16.msra.mxu0 %v1686_v41  ;;  %v1637_v63 = vpop.permute.xlu1 %1636 }
 0x26c   : > { %v1643_v5 = vpop.permute.xlu0 %1642 }
 0x26d   : > { %2918 = vrot.lane.b32.xlu1 %v4098_v24, %s4532_s14  ;;  %v1733_v16 = vsel %vm564_vm5, %v1643_v5, %v1645_v28 }
 0x26e   : > { %1916 = vmatprep.subr.bf16.mxu1 %v1733_v16  ;;  %1860 = vmatmul.mubr.bf16.vlgmr.msra.gmra.mxu0 %v4263_v0  ;;  %v4279_v16 = vld [vmem:[#allocation6 + $0x34] ss:$20 sps:$4 sm:$0xff]  }
 0x26f   : > { %v1635_v1 = vpop.permute.xlu1 %1634  ;;  %1869 = vmatprep.mubr.bf16.mxu0 %v4266_v10 }
 0x270   : > { %v1641_v12 = vpop.permute.xlu0 %1640  ;;  %v1730_v9 = vsel %vm564_vm5, %v1635_v1, %v1637_v63 }
 0x271   : > { %v1732_v39 = vsel %vm564_vm5, %v1641_v12, %v1643_v5  ;;  %v4275_v5 = vld [vmem:[#allocation6 + $0x8] ss:$20 sps:$4 sm:$0xff]  }
 0x272   : > { %1917 = vmatpush2.bf16.msra.mxu1 %v1732_v39 }
 0x273   : > { %v1633_v54 = vpop.permute.xlu1 %1632 }
 0x274   : > { %v1639_v57 = vpop.permute.xlu0 %1638 }
 0x275   : > { %v1731_v62 = vsel %vm564_vm5, %v1637_v63, %v1639_v57  ;;  %v4283_v57 = vld [vmem:[#allocation6 + $0x5c] ss:$20 sps:$4 sm:$0xff]  }
 0x276   : > { %1918 = vmatprep.subr.bf16.mxu1 %v1731_v62  ;;  %1870 = vmatmul.mubr.bf16.gmra.mxu0 %v4268_v61  ;;  %v4282_v62 = vld [vmem:[#allocation6 + $0x38] ss:$20 sps:$4 sm:$0xff]  }
 0x277   : > { %1919 = vmatpush2.bf16.msra.mxu1 %v1730_v9  ;;  %v1625_v18 = vpop.permute.xlu1 %1624  ;;  %1879 = vmatprep.mubr.bf16.mxu0 %v4269_v3  ;;  %v4281_v3 = vld [vmem:[#allocation6 + $0x30] ss:$20 sps:$4 sm:$0xff]   ;;  %v4285_v9 = vld [vmem:[#allocation6 + $0x58] ss:$20 sps:$4 sm:$0xff]  }
 0x278   : > { %v1631_v56 = vpop.permute.xlu0 %1630 }
 0x279   : > { %v1729_v45 = vsel %vm564_vm5, %v1631_v56, %v1633_v54  ;;  %v4278_v54 = vld [vmem:[#allocation6 + $0x10] ss:$20 sps:$4 sm:$0xff]  }
 0x27a   : > { %1920 = vmatprep.subr.bf16.mxu1 %v1729_v45  ;;  %v4289_v45 = vld [vmem:[#allocation6 + $0x80] ss:$20 sps:$4 sm:$0xff]  }
 0x27b   : > { %v1623_v58 = vpop.permute.xlu1 %1622 }
 0x27c   : > { %v1629_v27 = vpop.permute.xlu0 %1628  ;;  %v1726_v19 = vsel %vm564_vm5, %v1623_v58, %v1625_v18 }
 0x27d   : > { %v1728_v7 = vsel %vm564_vm5, %v1629_v27, %v1631_v56  ;;  %v4286_v56 = vld [vmem:[#allocation6 + $0x60] ss:$20 sps:$4 sm:$0xff]  }
 0x27e   : > { %1921 = vmatpush2.bf16.msra.mxu1 %v1728_v7  ;;  %1880 = vmatmul.mubr.bf16.gmra.mxu0 %v4271_v32  ;;  %v4290_v32 = vld [vmem:[#allocation6 + $0x88] ss:$20 sps:$4 sm:$0xff]  }
 0x27f   : > { %v1621_v4 = vpop.permute.xlu1 %1620  ;;  %1889 = vmatprep.mubr.bf16.mxu0 %v4272_v46 }
 0x280   : > { %v1627_v37 = vpop.permute.xlu0 %1626 }
 0x281   : > { %v1727_v34 = vsel %vm564_vm5, %v1625_v18, %v1627_v37  ;;  %v4287_v18 = vld [vmem:[#allocation6 + $0x84] ss:$20 sps:$4 sm:$0xff]  }
 0x282   : > { %1922 = vmatprep.subr.bf16.mxu1 %v1727_v34 }
 0x283   : > { %1923 = vmatpush2.bf16.msra.mxu1 %v1726_v19  ;;  %v1667_v48 = vpop.permute.xlu1 %1666 }
 0x284   : > { %v1619_v8 = vpop.permute.xlu0 %1618 }
 0x285   : > { %v1725_v50 = vsel %vm564_vm5, %v1619_v8, %v1621_v4 }
 0x286   : > { %1924 = vmatprep.subr.bf16.mxu1 %v1725_v50  ;;  %1890 = vmatmul.mubr.bf16.gmra.mxu0 %v4274_v21 }
 0x287   : > { %v1665_v29 = vpop.permute.xlu1 %1664  ;;  %2005 = vmatprep.mubr.bf16.mxu0 %v7524_v20 }
 0x288   : > { %v1617_v17 = vpop.permute.xlu0 %1616  ;;  %v1740_v42 = vsel %vm564_vm5, %v1665_v29, %v1667_v48 }
 0x289   : > { %v1724_v40 = vsel %vm564_vm5, %v1617_v17, %v1619_v8 }
 0x28a   : > { %1925 = vmatpush2.bf16.msra.mxu1 %v1724_v40 }
 0x28b   : > { %v1615_v53 = vpop.permute.xlu1 %1614 }
 0x28c   : > { %v1669_v26 = vpop.permute.xlu0 %1668 }
 0x28d   : > { %v1741_v2 = vsel %vm564_vm5, %v1667_v48, %v1669_v26 }
 0x28e   : > { %1981 = vmatprep.subr.bf16.mxu0 %v1741_v2 }
 0x28f   : > { %1982 = vmatpush1.bf16.msra.mxu0 %v1740_v42  ;;  %v1661_v22 = vpop.permute.xlu1 %1660 }
 0x290   : > { %v1613_v36 = vpop.permute.xlu0 %1612 }
 0x291   : > { %v1723_v49 = vsel %vm564_vm5, %v1613_v36, %v1615_v53 }
 0x292   : > { %1926 = vmatprep.subr.bf16.mxu1 %v1723_v49 }
 0x293   : > { %v1659_v33 = vpop.permute.xlu1 %1658 }
 0x294   : > { %v1611_v35 = vpop.permute.xlu0 %1610  ;;  %v1738_v15 = vsel %vm564_vm5, %v1659_v33, %v1661_v22 }
 0x295   : > { %v1722_v38 = vsel %vm564_vm5, %v1611_v35, %v1613_v36 }
 0x296   : > { %1927 = vmatpush2.bf16.msra.mxu1 %v1722_v38 }
 0x297   : > { %v1609_v59 = vpop.permute.xlu1 %1608 }
 0x298   : > { %v1663_v13 = vpop.permute.xlu0 %1662 }
 0x299   : > { %v1739_v11 = vsel %vm564_vm5, %v1661_v22, %v1663_v13 }
 0x29a   : > { %1983 = vmatprep.subr.bf16.mxu0 %v1739_v11 }
 0x29b   : > { %1984 = vmatpush1.bf16.msra.mxu0 %v1738_v15  ;;  %v1655_v52 = vpop.permute.xlu1 %1654 }
 0x29c   : > { %v1607_v44 = vpop.permute.xlu0 %1606 }
 0x29d   : > { %v1721_v14 = vsel %vm564_vm5, %v1607_v44, %v1609_v59 }
 0x29e   : > { %1928 = vmatprep.subr.bf16.mxu1 %v1721_v14 }
 0x29f   : > { %v1653_v28 = vpop.permute.xlu1 %1652 }
 0x2a0   : > { %v1605_v55 = vpop.permute.xlu0 %1604  ;;  %v1736_v60 = vsel %vm564_vm5, %v1653_v28, %v1655_v52 }
 0x2a1   : > { %v1720_v30 = vsel %vm564_vm5, %v1605_v55, %v1607_v44 }
 0x2a2   : > { %1929 = vmatpush2.bf16.msra.mxu1 %v1720_v30 }
 0x2a3   : > { %v1603_v31 = vpop.permute.xlu1 %1602 }
 0x2a4   : > { %v1657_v47 = vpop.permute.xlu0 %1656 }
 0x2a5   : > { %v1737_v25 = vsel %vm564_vm5, %v1655_v52, %v1657_v47 }
 0x2a6   : > { %1985 = vmatprep.subr.bf16.mxu0 %v1737_v25 }
 0x2a7   : > { %1986 = vmatpush1.bf16.msra.mxu0 %v1736_v60  ;;  %v1649_v0 = vpop.permute.xlu1 %1648 }
 0x2a8   : > { %v1601_v41 = vpop.permute.xlu0 %1600 }
 0x2a9   : > { %v1719_v63 = vsel %vm564_vm5, %v1601_v41, %v1603_v31 }
 0x2aa   : > { %1930 = vmatprep.subr.bf16.mxu1 %v1719_v63 }
 0x2ab   : > { %v1647_v1 = vpop.permute.xlu1 %1646 }
 0x2ac   : > { %v1599_v24 = vpop.permute.xlu0 %1598  ;;  %v1734_v61 = vsel %vm564_vm5, %v1647_v1, %v1649_v0 }
 0x2ad   : > { %v1718_v10 = vsel %vm564_vm5, %v1599_v24, %v1601_v41 }
 0x2ae   : > { %1931 = vmatpush2.bf16.msra.mxu1 %v1718_v10 }
 0x2b0   : > { %v1651_v12 = vpop.permute.xlu0 %1650 }
 0x2b1   : > { %1933 = vmatmul.mubr.bf16.vlgmr.msra.gmra.mxu1 %v4275_v5  ;;  %v1735_v39 = vsel %vm564_vm5, %v1649_v0, %v1651_v12 }
 0x2b2   : > { %1987 = vmatprep.subr.bf16.mxu0 %v1735_v39  ;;  %1942 = vmatprep.mubr.bf16.mxu1 %v4279_v16 }
 0x2b3   : > { %1988 = vmatpush1.bf16.msra.mxu0 %v1734_v61 }
 0x2b6   : > { %3992 = vmatmul.mubr.msk.bf16.vlgmr.msra.gmra.mxu0 %vm1814_vm8, %v4278_v54 }
 0x2b7   : > { %2015 = vmatprep.mubr.bf16.mxu0 %v7524_v20 }
 0x2b8   : > { %v6109_v8 = vpop.permute.xlu1 %1351 }
 0x2b9   : > { %1943 = vmatmul.mubr.bf16.gmra.mxu1 %v4281_v3 }
 0x2ba   : > { %1952 = vmatprep.mubr.bf16.mxu1 %v4283_v57 }
 0x2bc   : > { %v1337_v40 = vpop.permute.xlu1 %1336 }
 0x2bd   : > { %v6113_v29 = vpop.permute.xlu0 %1346 }
 0x2be   : > { %3993 = vmatmul.mubr.msk.bf16.gmra.mxu0 %vm1814_vm8, %v4282_v62 }
 0x2bf   : > { %2025 = vmatprep.mubr.bf16.mxu0 %v7524_v20 }
 0x2c0   : > { %v1327_v2 = vpop.permute.xlu1 %1326 }
 0x2c1   : > { %1953 = vmatmul.mubr.bf16.gmra.mxu1 %v4285_v9  ;;  %v6119_v26 = vpop.permute.xlu0 %1341 }
 0x2c2   : > { %1962 = vmatprep.mubr.bf16.mxu1 %v4287_v18 }
 0x2c4   : > { %v1317_v33 = vpop.permute.xlu1 %1316 }
 0x2c5   : > { %v1332_v22 = vpop.permute.xlu0 %1331 }
 0x2c6   : > { %3994 = vmatmul.mubr.msk.bf16.gmra.mxu0 %vm1814_vm8, %v4286_v56 }
 0x2c7   : > { %2035 = vmatprep.mubr.bf16.mxu0 %v7524_v20 }
 0x2c9   : > { %1963 = vmatmul.mubr.bf16.gmra.mxu1 %v4289_v45  ;;  %v1322_v52 = vpop.permute.xlu0 %1321 }
 0x2ce   : > { %3995 = vmatmul.mubr.msk.bf16.gmra.mxu0 %vm1814_vm8, %v4290_v32 }
 0x32e   : > { %v1861_v58 = vpop.f32.mrf.mxu0 }
 0x32f   : > { %v1862_v35 = vadd.f32 %v1861_v58, %v1317_v33 }
 0x330   : > { %v1863_v46 = vpop.f32.mrf.mxu0 }
 0x331   : > { %v1864_v13 = vadd.f32 %v1863_v46, %v1317_v33 }
 0x332   : > { %v1865_v27 = vpop.f32.mrf.mxu0 }
 0x333   : > { %v1866_v14 = vadd.f32 %v1865_v27, %v1322_v52 }
 0x334   : > { %v1867_v7 = vpop.f32.mrf.mxu0 }
 0x335   : > { %v1868_v47 = vadd.f32 %v1867_v7, %v1322_v52 }
 0x336   : > { %v1871_v4 = vpop.f32.mrf.mxu0 }
 0x337   : > { %v1872_v0 = vadd.f32 %v1871_v4, %v1327_v2 }
 0x338   : > { %v1873_v37 = vpop.f32.mrf.mxu0 }
 0x339   : > { %v1874_v39 = vadd.f32 %v1873_v37, %v1327_v2 }
 0x33a   : > { %v1875_v34 = vpop.f32.mrf.mxu0 }
 0x33b   : > { %v1876_v62 = vadd.f32 %v1875_v34, %v1332_v22 }
 0x33c   : > { %v1877_v19 = vpop.f32.mrf.mxu0 }
 0x33d   : > { %v1878_v27 = vadd.f32 %v1877_v19, %v1332_v22 }
 0x33e   : > { %v1881_v21 = vpop.f32.mrf.mxu0 }
 0x33f   : > { %v1882_v2 = vadd.f32 %v1881_v21, %v1337_v40 }
 0x340   : > { %v6107_v48 = vpop.f32.mrf.mxu0 }
 0x342   : > { %v6111_v50 = vpop.f32.mrf.mxu0 }
 0x344   : > { %v6115_v17 = vpop.f32.mrf.mxu0 }
 0x346   : > { %v6117_v53 = vpop.f32.mrf.mxu0 }
 0x348   : > { %v6121_v42 = vpop.f32.mrf.mxu0 }
 0x34a   : > { %v6123_v36 = vpop.f32.mrf.mxu0 }
 0x34c   : > { %v6125_v59 = vpop.f32.mrf.mxu0 }
 0x371   : > { %v1934_v49 = vpop.f32.mrf.mxu1 }
 0x372   : > { %v1935_v11 = vadd.f32 %v1934_v49, %v1862_v35 }
 0x373   : > { %v1936_v38 = vpop.f32.mrf.mxu1 }
 0x374   : > { %v1937_v28 = vadd.f32 %v1936_v38, %v1864_v13 }
 0x375   : > { %v1938_v15 = vpop.f32.mrf.mxu1 }
 0x376   : > { %v2007_v44 = vpop.f32.mrf.mxu0  ;;  %v1939_v25 = vadd.f32 %v1938_v15, %v1866_v14  ;;  %v1886_v14 = vadd.f32 %v6111_v50, %v6119_v26 }
 0x377   : > { %v6127_v55 = vadd.f32 %v2007_v44, %v1935_v11  ;;  %v1940_v30 = vpop.f32.mrf.mxu1  ;;  %v1884_v11 = vadd.f32 %v6107_v48, %v1337_v40 }
 0x378   : > { %v2009_v31 = vpop.f32.mrf.mxu0  ;;  %v1941_v10 = vadd.f32 %v1940_v30, %v1868_v47 }
 0x379   : > { %v6129_v60 = vadd.f32 %v2009_v31, %v1937_v28  ;;  %v1944_v41 = vpop.f32.mrf.mxu1  ;;  %v2046_v24 = vmax.f32 %v6127_v55, 0.0 }
 0x37a   : > { %v2011_v63 = vpop.f32.mrf.mxu0  ;;  %v1945_v54 = vadd.f32 %v1944_v41, %v1872_v0 }
 0x37b   : > { %v2047_v5 = vmax.f32 %v6129_v60, 0.0  ;;  %v6133_v16 = vadd.f32 %v2011_v63, %v1939_v25  ;;  %v1946_v1 = vpop.f32.mrf.mxu1  ;;  %v1888_v25 = vadd.f32 %v6115_v17, %v6119_v26 }
 0x37c   : > { %v2013_v12 = vpop.f32.mrf.mxu0  ;;  %v1947_v56 = vadd.f32 %v1946_v1, %v1874_v39 }
 0x37d   : > { %v6139_v61 = vpack.c.bf16 %v2047_v5, %v2046_v24  ;;  %v6141_v3 = vadd.f32 %v2013_v12, %v1941_v10  ;;  %v1948_v57 = vpop.f32.mrf.mxu1  ;;  %v2048_v18 = vmax.f32 %v6133_v16, 0.0  ;;  %v1892_v12 = vadd.f32 %v6117_v53, %v6113_v29 }
 0x37e   : > { %v2017_v9 = vpop.f32.mrf.mxu0  ;;  %v1949_v4 = vadd.f32 %v1948_v57, %v1876_v62 }
 0x37f   : > { %2110 = vst [vmem:[#allocation2 + $0x4] sm:$0xff] %v6139_v61  ;;  %v2049_v45 = vmax.f32 %v6141_v3, 0.0  ;;  %v6146_v32 = vadd.f32 %v2017_v9, %v1945_v54  ;;  %v1950_v58 = vpop.f32.mrf.mxu1  ;;  %v2206_v16 = vsel %vm520_vm10, %v6139_v61, 0 }
 0x380   : > { %v2019_v46 = vpop.f32.mrf.mxu0  ;;  %v1951_v35 = vadd.f32 %v1950_v58, %v1878_v27 }
 0x381   : > { %v6150_v7 = vpack.c.bf16 %v2049_v45, %v2048_v18  ;;  %v6152_v37 = vadd.f32 %v2019_v46, %v1947_v56  ;;  %v1954_v34 = vpop.f32.mrf.mxu1  ;;  %v2050_v33 = vmax.f32 %v6146_v32, 0.0  ;;  %v1894_v46 = vadd.f32 %v6121_v42, %v6113_v29 }
 0x382   : > { %v2021_v49 = vpop.f32.mrf.mxu0  ;;  %v1955_v21 = vadd.f32 %v1954_v34, %v1882_v2  ;;  %v4355_v42 = vpack.c.bf16 %v2049_v45, %v2047_v5 }
 0x383   : > { %2111 = vst [vmem:[#allocation2 + $0x14] sm:$0xff] %v6150_v7  ;;  %v2051_v38 = vmax.f32 %v6152_v37, 0.0  ;;  %v6157_v13 = vadd.f32 %v2021_v49, %v1949_v4  ;;  %v1956_v19 = vpop.f32.mrf.mxu1 }
 0x384   : > { %v2023_v22 = vpop.f32.mrf.mxu0  ;;  %v1957_v31 = vadd.f32 %v1956_v19, %v1884_v11 }
 0x385   : > { %v6164_v15 = vpack.c.bf16 %v2051_v38, %v2050_v33  ;;  %v6166_v52 = vadd.f32 %v2023_v22, %v1951_v35  ;;  %v1958_v44 = vpop.f32.mrf.mxu1  ;;  %v2052_v30 = vmax.f32 %v6157_v13, 0.0  ;;  %v1896_v35 = vadd.f32 %v6123_v36, %v6109_v8 }
 0x386   : > { %v2027_v28 = vpop.f32.mrf.mxu0  ;;  %v1959_v0 = vadd.f32 %v1958_v44, %v1886_v14  ;;  %v6185_v1 = vld [vmem:[#allocation2 + $0x8] sm:$0xf]  ;;  %v6192_v3 = vld [vmem:[#allocation2] sm:$0xff]  ;;  %v1898_v14 = vadd.f32 %v6125_v59, %v6109_v8 }
 0x387   : > { %2112 = vst [vmem:[#allocation2 + $0x24] sm:$0xff] %v6164_v15  ;;  %v2053_v48 = vmax.f32 %v6166_v52, 0.0  ;;  %v6173_v40 = vadd.f32 %v2027_v28, %v1955_v21  ;;  %v1960_v47 = vpop.f32.mrf.mxu1  ;;  %v2210_v32 = vsel %vm520_vm10, %v6164_v15, 0 }
 0x388   : > { %v2029_v41 = vpop.f32.mrf.mxu0  ;;  %v1961_v54 = vadd.f32 %v1960_v47, %v1888_v25  ;;  %v4356_v47 = vpack.c.bf16 %v2048_v18, %v2046_v24 }
 0x389   : > { %v6181_v50 = vpack.c.bf16 %v2053_v48, %v2052_v30  ;;  %v6183_v63 = vadd.f32 %v2029_v41, %v1957_v31  ;;  %v1964_v10 = vpop.f32.mrf.mxu1  ;;  %v2054_v39 = vmax.f32 %v6173_v40, 0.0 }
 0x38a   : > { %v2031_v17 = vpop.f32.mrf.mxu0  ;;  %v6190_v26 = vld [vmem:[#allocation2 + $0x18] sm:$0xf]  ;;  %v6194_v57 = vld [vmem:[#allocation2 + $0x10] sm:$0xff]  ;;  %v1965_v34 = vadd.f32 %v1964_v10, %v1892_v12  ;;  %v2208_v12 = vsel %vm520_vm10, %v6150_v7, 0  ;;  %v6488_v10 = vpop.permute.xlu1 %2684 }
 0x38b   : > { %2113 = vst [vmem:[#allocation2 + $0x34] sm:$0xff] %v6181_v50  ;;  %v2055_v62 = vmax.f32 %v6183_v63, 0.0  ;;  %v6198_v9 = vadd.f32 %v2031_v17, %v1959_v0  ;;  %v1966_v56 = vpop.f32.mrf.mxu1  ;;  %v4018_v53 = vcombine.low %v6185_v1, %v6190_v26  ;;  %v4017_v58 = vcombine.high %v6192_v3, %v6194_v57 }
 0x38c   : > { %v2033_v27 = vpop.f32.mrf.mxu0  ;;  %v1967_v19 = vadd.f32 %v1966_v56, %v1894_v46  ;;  %v4016_v44 = vcombine.low %v6192_v3, %v6194_v57  ;;  %v4060_v17 = vcombine.low %v2206_v16, %v2208_v12  ;;  %v2169_v56 = vsel %vm4996_vm11, %v6190_v26, 0 }
 0x38d   : > { %v6210_v4 = vpack.c.bf16 %v2055_v62, %v2054_v39  ;;  %v6212_v2 = vadd.f32 %v2033_v27, %v1961_v54  ;;  %v1968_v49 = vpop.f32.mrf.mxu1  ;;  %2362 = vrot.lane.b32.xlu1 %v4018_v53, %s4523_s8  ;;  %2360 = vrot.lane.b32.xlu0 %v4017_v58, %s4523_s8  ;;  %v2056_v22 = vmax.f32 %v6198_v9, 0.0  ;;  %v2167_v58 = vsel %vm4996_vm11, %v6185_v1, 0 }
 0x38e   : > { %v2037_v29 = vpop.f32.mrf.mxu0  ;;  %v1969_v60 = vadd.f32 %v1968_v49, %v1896_v35  ;;  %v4042_v46 = vcombine.low %v2167_v58, %v2169_v56  ;;  %v4061_v27 = vcombine.high %v2206_v16, %v2208_v12  ;;  %v2168_v35 = vsel %vm473_vm12, %v6194_v57, 0 }
 0x38f   : > { %2114 = vst [vmem:[#allocation2 + $0x44] sm:$0xff] %v6210_v4  ;;  %v2057_v11 = vmax.f32 %v6212_v2, 0.0  ;;  %v6223_v21 = vadd.f32 %v2037_v29, %v1965_v34  ;;  %v1970_v36 = vpop.f32.mrf.mxu1  ;;  %v2153_v2 = vsel %vm4967_vm7, %v6190_v26, 0  ;;  %v6282_v29 = vsel %vm543_vm2, %v6181_v50, 0 }
 0x390   : > { %v2039_v28 = vpop.f32.mrf.mxu0  ;;  %v1971_v59 = vadd.f32 %v1970_v36, %v1898_v14  ;;  %v2151_v14 = vsel %vm4967_vm7, %v6185_v1, 0  ;;  %v6316_v12 = vpack.c.bf16 %v2056_v22, %v2054_v39  ;;  %v2152_v63 = vsel %vm450_vm14, %v6194_v57, 0 }
 0x391   : > { %v6229_v31 = vpack.c.bf16 %v2057_v11, %v2056_v22  ;;  %v6231_v5 = vadd.f32 %v2039_v28, %v1967_v19  ;;  %2592 = vrot.lane.b32.xlu1 %v4355_v42, %s4524_s10  ;;  %2358 = vrot.lane.b32.xlu0 %v4016_v44, %s4523_s8  ;;  %v2058_v8 = vmax.f32 %v6223_v21, 0.0  ;;  %v6277_v19 = vsel %vm543_vm2, %v6164_v15, 0 }
 0x392   : > { %v2041_v45 = vpop.f32.mrf.mxu0  ;;  %v6292_v44 = vsel %vm566_vm6, %v6181_v50, 0  ;;  %v4076_v36 = vcombine.high %v6277_v19, %v6282_v29  ;;  %v4075_v28 = vcombine.low %v6277_v19, %v6282_v29  ;;  %v2150_v39 = vsel %vm450_vm14, %v6192_v3, 0  ;;  %v2125_v23 = vld [vmem:[#allocation2 + $0x38] sm:$0xf] }
 0x393   : > { %2115 = vst [vmem:[#allocation2 + $0x54] sm:$0xff] %v6229_v31  ;;  %v2059_v25 = vmax.f32 %v6231_v5, 0.0  ;;  %v2042_v41 = vadd.f32 %v2041_v45, %v1969_v60  ;;  %v4030_v45 = vcombine.low %v2151_v14, %v2153_v2  ;;  %v6326_v16 = vsel %vm520_vm10, %v6229_v31, 0 }
 0x394   : > { %v2043_v0 = vpop.f32.mrf.mxu0  ;;  %v6343_v56 = vsel %vm543_vm2, %v6210_v4, 0  ;;  %v6348_v58 = vsel %vm543_vm2, %v6229_v31, 0  ;;  %v6358_v2 = vsel %vm566_vm6, %v6210_v4, 0  ;;  %v4029_v14 = vcombine.high %v2150_v39, %v2152_v63 }
 0x395   : > { %v6249_v55 = vpack.c.bf16 %v2059_v25, %v2058_v8  ;;  %v2044_v24 = vadd.f32 %v2043_v0, %v1971_v59  ;;  %2832 = vrot.lane.b32.xlu1 %v4355_v42, %s4527_s28  ;;  %2590 = vrot.lane.b32.xlu0 %v4356_v47, %s4524_s10  ;;  %v2060_v18 = vmax.f32 %v2042_v41, 0.0  ;;  %v6287_v42 = vsel %vm566_vm6, %v6164_v15, 0 }
 0x396   : > { %v4099_v60 = vcombine.low %v6287_v42, %v6292_v44  ;;  %v4100_v59 = vcombine.high %v6287_v42, %v6292_v44  ;;  %v6312_v41 = vpack.c.bf16 %v2057_v11, %v2055_v62  ;;  %v4028_v11 = vcombine.low %v2150_v39, %v2152_v63 }
 0x397   : > { %2116 = vst [vmem:[#allocation2 + $0x64] sm:$0xff] %v6249_v55  ;;  %v2061_v54 = vmax.f32 %v2044_v24, 0.0  ;;  %v6321_v24 = vsel %vm520_vm10, %v6210_v4, 0  ;;  %v2224_v4 = vsel %vm543_vm2, %v6150_v7, 0  ;;  %v6393_v21 = vsel %vm520_vm10, %v6249_v55, 0 }
 0x398   : > { %v4066_v62 = vcombine.low %v6321_v24, %v6326_v16  ;;  %v4067_v40 = vcombine.high %v6321_v24, %v6326_v16  ;;  %v2135_v5 = vsel %vm5258_vm1, %v6185_v1, 0  ;;  %v2238_v1 = vsel %vm566_vm6, %v6139_v61, 0 }
 0x399   : > { %v6260_v53 = vpack.c.bf16 %v2061_v54, %v2060_v18  ;;  %2662 = vrot.lane.b32.xlu1 %v4060_v17, %s4529_s7  ;;  %2830 = vrot.lane.b32.xlu0 %v4356_v47, %s4527_s28  ;;  %v2166_v47 = vsel %vm473_vm12, %v6192_v3, 0  ;;  %v2173_v13 = vsel %vm4996_vm11, %v2125_v23, 0 }
 0x39a   : > { %v4041_v0 = vcombine.high %v2166_v47, %v2168_v35  ;;  %v4040_v22 = vcombine.low %v2166_v47, %v2168_v35  ;;  %v6363_v35 = vsel %vm566_vm6, %v6229_v31, 0  ;;  %v6377_v31 = vpack.c.bf16 %v2060_v18, %v2058_v8 }
 0x39b   : > { %2117 = vst [vmem:[#allocation2 + $0x74] sm:$0xff] %v6260_v53  ;;  %v4102_v63 = vcombine.low %v6358_v2, %v6363_v35  ;;  %v6398_v8 = vsel %vm520_vm10, %v6260_v53, 0 }
 0x39d   : > { %2530 = vrot.lane.b32.xlu1 %v4042_v46, %s7529_s29  ;;  %2664 = vrot.lane.b32.xlu0 %v4061_v27, %s4529_s7  ;;  %v2136_v46 = vsel %vm421_vm3, %v6194_v57, 0  ;;  %v4078_v27 = vcombine.low %v6343_v56, %v6348_v58  ;;  %v4103_v57 = vcombine.high %v6358_v2, %v6363_v35 }
 0x3a1   : > { %2446 = vrot.lane.b32.xlu1 %v4030_v45, %s7531_s24  ;;  %2528 = vrot.lane.b32.xlu0 %v4041_v0, %s7529_s29  ;;  %v2134_v45 = vsel %vm421_vm3, %v6192_v3, 0  ;;  %v4079_v0 = vcombine.high %v6343_v56, %v6348_v58  ;;  %v2137_v3 = vsel %vm5258_vm1, %v6190_v26, 0  ;;  %v4069_v26 = vcombine.low %v6393_v21, %v6398_v8 }
 0x3a2   : > { %v4005_v47 = vcombine.high %v2134_v45, %v2136_v46 }
 0x3a5   : > { %2526 = vrot.lane.b32.xlu0 %v4040_v22, %s7529_s29  ;;  %2442 = vrot.lane.b32.xlu1 %v4028_v11, %s7531_s24  ;;  %v6383_v22 = vpack.c.bf16 %v2061_v54, %v2059_v25  ;;  %v2222_v25 = vsel %vm543_vm2, %v6139_v61, 0  ;;  %v4006_v54 = vcombine.low %v2135_v5, %v2137_v3  ;;  %v2240_v11 = vsel %vm566_vm6, %v6150_v7, 0 }
 0x3a6   : > { %v4072_v39 = vcombine.low %v2222_v25, %v2224_v4  ;;  %v6428_v3 = vsel %vm543_vm2, %v6260_v53, 0  ;;  %v4004_v7 = vcombine.low %v2134_v45, %v2136_v46  ;;  %v6440_v61 = vsel %vm566_vm6, %v6260_v53, 0  ;;  %v2123_v46 = vld [vmem:[#allocation2 + $0x28] sm:$0xf] }
 0x3a7   : > { %v4073_v18 = vcombine.high %v2222_v25, %v2224_v4  ;;  %v4097_v53 = vcombine.high %v2238_v1, %v2240_v11  ;;  %v4362_v4 = vpack.c.bf16 %v2053_v48, %v2051_v38  ;;  %v2212_v25 = vsel %vm520_vm10, %v6181_v50, 0 }
 0x3a8   : > { %v2171_v37 = vsel %vm4996_vm11, %v2123_v46, 0  ;;  %v4064_v52 = vcombine.high %v2210_v32, %v2212_v25 }
 0x3a9   : > { %2444 = vrot.lane.b32.xlu0 %v4029_v14, %s7531_s24  ;;  %3120 = vrot.lane.b32.xlu1 %v4005_v47, %s7532_s26  ;;  %v4096_v14 = vcombine.low %v2238_v1, %v2240_v11  ;;  %v6423_v47 = vsel %vm543_vm2, %v6249_v55, 0  ;;  %v4045_v38 = vcombine.low %v2171_v37, %v2173_v13  ;;  %v6510_v13 = vpop.permute.xlu0 %2852  ;;  %vm7543_vm2 = vcmask 1031168  }
 0x3aa   : > { %v7536_v51 = vcombine.low %v6423_v47, %v6428_v3  ;;  %vm7545_vm4 = vmmov %vm7543_vm2 }
 0x3ad   : > { %3122 = vrot.lane.b32.xlu0 %v4006_v54, %s7532_s26  ;;  %2746 = vrot.lane.b32.xlu1 %v4072_v39, %s4531_s13  ;;  %v6435_v54 = vsel %vm566_vm6, %v6249_v55, 0  ;;  %v2124_v39 = vld [vmem:[#allocation2 + $0x30] sm:$0xff]  ;;  %v2122_v55 = vld [vmem:[#allocation2 + $0x20] sm:$0xff] }
 0x3ae   : > { %v4106_v45 = vcombine.high %v6435_v54, %v6440_v61  ;;  %v4020_v5 = vcombine.high %v2122_v55, %v2124_v39  ;;  %v4019_v6 = vcombine.low %v2122_v55, %v2124_v39  ;;  %v2172_v48 = vsel %vm473_vm12, %v2124_v39, 0 }
 0x3af   : > { %v2154_v15 = vsel %vm450_vm14, %v2122_v55, 0  ;;  %v2170_v50 = vsel %vm473_vm12, %v2122_v55, 0 }
 0x3b0   : > { %v4044_v11 = vcombine.high %v2170_v50, %v2172_v48 }
 0x3b1   : > { %2914 = vrot.lane.b32.xlu1 %v4096_v14, %s4532_s14  ;;  %3118 = vrot.lane.b32.xlu0 %v4004_v7, %s7532_s26  ;;  %v4361_v14 = vpack.c.bf16 %v2052_v30, %v2050_v33  ;;  %v4021_v7 = vcombine.low %v2123_v46, %v2125_v23  ;;  %v4063_v33 = vcombine.low %v2210_v32, %v2212_v25  ;;  %v2156_v30 = vsel %vm450_vm14, %v2124_v39, 0 }
 0x3b2   : > { %v4031_v1 = vcombine.low %v2154_v15, %v2156_v30 }
 0x3b5   : > { %2366 = vrot.lane.b32.xlu1 %v4020_v5, %s4523_s8  ;;  %2748 = vrot.lane.b32.xlu0 %v4073_v18, %s4531_s13  ;;  %v4032_v18 = vcombine.high %v2154_v15, %v2156_v30  ;;  %v4043_v5 = vcombine.low %v2170_v50, %v2172_v48  ;;  %v2128_v30 = vld [vmem:[#allocation2 + $0x50] sm:$0xff]  ;;  %v2127_v48 = vld [vmem:[#allocation2 + $0x48] sm:$0xf] }
 0x3b9   : > { %2364 = vrot.lane.b32.xlu1 %v4019_v6, %s4523_s8  ;;  %2916 = vrot.lane.b32.xlu0 %v4097_v53, %s4532_s14  ;;  %v2141_v6 = vsel %vm5258_vm1, %v2125_v23, 0  ;;  %v2157_v53 = vsel %vm4967_vm7, %v2125_v23, 0  ;;  %v2138_v23 = vsel %vm421_vm3, %v2122_v55, 0  ;;  %v6528_v55 = vld [vmem:[#allocation2 + $0x58] sm:$0xf] }
 0x3ba   : > { %v4024_v19 = vcombine.low %v2127_v48, %v6528_v55 }
 0x3bd   : > { %2594 = vrot.lane.b32.xlu1 %v4361_v14, %s4524_s10  ;;  %2368 = vrot.lane.b32.xlu0 %v4021_v7, %s4523_s8  ;;  %v2139_v7 = vsel %vm5258_vm1, %v2123_v46, 0 }
 0x3be   : > { %v4009_v25 = vcombine.low %v2139_v7, %v2141_v6 }
 0x3c1   : > { %2838 = vrot.lane.b32.xlu1 %v4362_v4, %s4527_s28  ;;  %2596 = vrot.lane.b32.xlu0 %v4362_v4, %s4524_s10  ;;  %v2155_v4 = vsel %vm4967_vm7, %v2123_v46, 0  ;;  %v6516_v46 = vpop.permute.xlu0 %2846 }
 0x3c2   : > { %v4033_v32 = vcombine.low %v2155_v4, %v2157_v53 }
 0x3c5   : > { %2668 = vrot.lane.b32.xlu1 %v4063_v33, %s4529_s7  ;;  %2836 = vrot.lane.b32.xlu0 %v4361_v14, %s4527_s28  ;;  %v6496_v14 = vpop.permute.xlu1 %2678  ;;  %v2140_v33 = vsel %vm421_vm3, %v2124_v39, 0  ;;  %v6538_v15 = vpop.permute.xlu0 %2840 }
 0x3c9   : > { %2536 = vrot.lane.b32.xlu1 %v4045_v38, %s7529_s29  ;;  %2670 = vrot.lane.b32.xlu0 %v4064_v52, %s4529_s7  ;;  %v6512_v37 = vpop.permute.xlu1 %2672  ;;  %v4007_v38 = vcombine.low %v2138_v23, %v2140_v33  ;;  %v4008_v52 = vcombine.high %v2138_v23, %v2140_v33  ;;  %v2160_v23 = vsel %vm450_vm14, %v2128_v30, 0 }
 0x3cd   : > { %2450 = vrot.lane.b32.xlu1 %v4032_v18, %s7531_s24  ;;  %2534 = vrot.lane.b32.xlu0 %v4044_v11, %s7529_s29  ;;  %v6518_v39 = vpop.permute.xlu1 %2666 }
 0x3d1   : > { %2448 = vrot.lane.b32.xlu1 %v4031_v1, %s7531_s24  ;;  %2532 = vrot.lane.b32.xlu0 %v4043_v5, %s7529_s29  ;;  %v6540_v50 = vpop.permute.xlu1 %2936  ;;  %v2161_v1 = vsel %vm4967_vm7, %v6528_v55, 0  ;;  %v2176_v5 = vsel %vm473_vm12, %v2128_v30, 0 }
 0x3d5   : > { %3128 = vrot.lane.b32.xlu1 %v4009_v25, %s7532_s26  ;;  %2452 = vrot.lane.b32.xlu0 %v4033_v32, %s7531_s24  ;;  %v6547_v18 = vpop.permute.xlu1 %2762  ;;  %v2144_v25 = vsel %vm421_vm3, %v2128_v30, 0 }
 0x3d9   : > { %3124 = vrot.lane.b32.xlu1 %v4007_v38, %s7532_s26  ;;  %3126 = vrot.lane.b32.xlu0 %v4008_v52, %s7532_s26  ;;  %v6558_v44 = vpop.permute.xlu1 %2924 }
 0x3dd   : > { %2754 = vrot.lane.b32.xlu1 %v4076_v36, %s4531_s13  ;;  %2752 = vrot.lane.b32.xlu0 %v4075_v28, %s4531_s13  ;;  %v2126_v36 = vld [vmem:[#allocation2 + $0x40] sm:$0xff]  ;;  %v6578_v53 = vpop.permute.xlu1 %2750 }
 0x3de   : > { %v4023_v29 = vcombine.high %v2126_v36, %v2128_v30  ;;  %v4022_v28 = vcombine.low %v2126_v36, %v2128_v30  ;;  %v2142_v32 = vsel %vm421_vm3, %v2126_v36, 0  ;;  %v2158_v38 = vsel %vm450_vm14, %v2126_v36, 0 }
 0x3e1   : > { %2920 = vrot.lane.b32.xlu1 %v4099_v60, %s4532_s14  ;;  %2922 = vrot.lane.b32.xlu0 %v4100_v59, %s4532_s14  ;;  %v6545_v60 = vpop.permute.xlu0 %2834  ;;  %v2177_v59 = vsel %vm4996_vm11, %v6528_v55, 0  ;;  %v6597_v16 = vpop.permute.xlu1 %2918 }
 0x3e5   : > { %2374 = vrot.lane.b32.xlu1 %v4024_v19, %s4523_s8  ;;  %2372 = vrot.lane.b32.xlu0 %v4023_v29, %s4523_s8  ;;  %v6556_v42 = vpop.permute.xlu0 %2768  ;;  %v4035_v29 = vcombine.high %v2158_v38, %v2160_v23 }
 0x3e9   : > { %2600 = vrot.lane.b32.xlu1 %v6312_v41, %s4524_s10  ;;  %2370 = vrot.lane.b32.xlu0 %v4022_v28, %s4523_s8  ;;  %v6576_v6 = vpop.permute.xlu0 %2930 }
 0x3ed   : > { %2844 = vrot.lane.b32.xlu1 %v6312_v41, %s4527_s28  ;;  %2598 = vrot.lane.b32.xlu0 %v6316_v12, %s4524_s10  ;;  %v2175_v41 = vsel %vm4996_vm11, %v2127_v48, 0  ;;  %v6595_v24 = vpop.permute.xlu0 %2756 }
 0x3ee   : > { %v4048_v11 = vcombine.low %v2175_v41, %v2177_v59  ;;  %v4034_v59 = vcombine.low %v2158_v38, %v2160_v23  ;;  %v2132_v41 = vld [vmem:[#allocation2 + $0x70] sm:$0xff] }
 0x3ef   : > { %v2180_v17 = vsel %vm473_vm12, %v2132_v41, 0 }
 0x3f1   : > { %2674 = vrot.lane.b32.xlu1 %v4066_v62, %s4529_s7  ;;  %2842 = vrot.lane.b32.xlu0 %v6316_v12, %s4527_s28  ;;  %v2159_v12 = vsel %vm4967_vm7, %v2127_v48, 0  ;;  %v2174_v62 = vsel %vm473_vm12, %v2126_v36, 0  ;;  %v2145_v36 = vsel %vm5258_vm1, %v6528_v55, 0 }
 0x3f2   : > { %v4036_v7 = vcombine.low %v2159_v12, %v2161_v1  ;;  %v4047_v4 = vcombine.high %v2174_v62, %v2176_v5  ;;  %v4046_v33 = vcombine.low %v2174_v62, %v2176_v5 }
 0x3f5   : > { %2542 = vrot.lane.b32.xlu1 %v4048_v11, %s7529_s29  ;;  %2676 = vrot.lane.b32.xlu0 %v4067_v40, %s4529_s7  ;;  %v4011_v40 = vcombine.high %v2142_v32, %v2144_v25  ;;  %v2143_v11 = vsel %vm5258_vm1, %v2127_v48, 0 }
 0x3f6   : > { %v4012_v62 = vcombine.low %v2143_v11, %v2145_v36 }
 0x3f9   : > { %2458 = vrot.lane.b32.xlu1 %v4036_v7, %s7531_s24  ;;  %2540 = vrot.lane.b32.xlu0 %v4047_v4, %s7529_s29  ;;  %v4010_v4 = vcombine.low %v2142_v32, %v2144_v25  ;;  %v2133_v25 = vld [vmem:[#allocation2 + $0x78] sm:$0xf]  ;;  %v2131_v32 = vld [vmem:[#allocation2 + $0x68] sm:$0xf] }
 0x3fa   : > { %v4027_v56 = vcombine.low %v2131_v32, %v2133_v25  ;;  %v2181_v58 = vsel %vm4996_vm11, %v2133_v25, 0  ;;  %v2179_v2 = vsel %vm4996_vm11, %v2131_v32, 0  ;;  %v2165_v49 = vsel %vm4967_vm7, %v2133_v25, 0 }
 0x3fb   : > { %vm7539_vm11 = vcmask 900096  }
 0x3fd   : > { %3132 = vrot.lane.b32.xlu1 %v4011_v40, %s7532_s26  ;;  %2538 = vrot.lane.b32.xlu0 %v4046_v33, %s7529_s29 }
 0x3ff   : > { %v6605_v52 = vpop.permute.xlu0 %2360  ;;  %v6607_v19 = vpop.permute.xlu1 %2362 }
 0x401   : > { %2758 = vrot.lane.b32.xlu1 %v4078_v27, %s4531_s13  ;;  %2456 = vrot.lane.b32.xlu0 %v4035_v29, %s7531_s24  ;;  %v2130_v27 = vld [vmem:[#allocation2 + $0x60] sm:$0xff] }
 0x402   : > { %v4026_v12 = vcombine.high %v2130_v27, %v2132_v41 }
 0x403   : > { %v6614_v30 = vpop.permute.xlu0 %2358  ;;  %v6616_v28 = vpop.permute.xlu1 %2592 }
 0x405   : > { %2928 = vrot.lane.b32.xlu1 %v4103_v57, %s4532_s14  ;;  %2454 = vrot.lane.b32.xlu0 %v4034_v59, %s7531_s24  ;;  %v4025_v57 = vcombine.low %v2130_v27, %v2132_v41  ;;  %v2164_v59 = vsel %vm450_vm14, %v2132_v41, 0 }
 0x407   : > { %v6628_v1 = vpop.permute.xlu0 %2590  ;;  %v6630_v5 = vpop.permute.xlu1 %2832 }
 0x409   : > { %2378 = vrot.lane.b32.xlu1 %v4026_v12, %s4523_s8  ;;  %3134 = vrot.lane.b32.xlu0 %v4012_v62, %s7532_s26 }
 0x40b   : > { %v6634_v55 = vpop.permute.xlu0 %2830  ;;  %v6636_v7 = vpop.permute.xlu1 %2662 }
 0x40d   : > { %2376 = vrot.lane.b32.xlu1 %v4025_v57, %s4523_s8  ;;  %3130 = vrot.lane.b32.xlu0 %v4010_v4, %s7532_s26  ;;  %v7533_v4 = vcombine.high %v6393_v21, %v6398_v8 }
 0x40f   : > { %v6640_v48 = vpop.permute.xlu0 %2664  ;;  %v6642_v40 = vpop.permute.xlu1 %2530 }
 0x411   : > { %2602 = vrot.lane.b32.xlu1 %v6377_v31, %s4524_s10  ;;  %2760 = vrot.lane.b32.xlu0 %v4079_v0, %s4531_s13 }
 0x413   : > { %v6650_v33 = vpop.permute.xlu0 %2528  ;;  %v6652_v23 = vpop.permute.xlu1 %2446 }
 0x415   : > { %2850 = vrot.lane.b32.xlu1 %v6383_v22, %s4527_s28  ;;  %2926 = vrot.lane.b32.xlu0 %v4102_v63, %s4532_s14  ;;  %v4051_v63 = vcombine.low %v2179_v2, %v2181_v58 }
 0x417   : > { %v6660_v38 = vpop.permute.xlu0 %2526  ;;  %v6662_v29 = vpop.permute.xlu1 %2442 }
 0x419   : > { %2680 = vrot.lane.b32.xlu1 %v4069_v26, %s4529_s7  ;;  %2380 = vrot.lane.b32.xlu0 %v4027_v56, %s4523_s8  ;;  %v2162_v26 = vsel %vm450_vm14, %v2130_v27, 0  ;;  %v2178_v56 = vsel %vm473_vm12, %v2130_v27, 0  ;;  %vm7540_vm12 = vcmask 916480   ;;  %vm7541_vm14 = vcmask 908288  }
 0x41a   : > { %v4038_v11 = vcombine.high %v2162_v26, %v2164_v59  ;;  %v4037_v57 = vcombine.low %v2162_v26, %v2164_v59  ;;  %v4050_v59 = vcombine.high %v2178_v56, %v2180_v17  ;;  %v4049_v8 = vcombine.low %v2178_v56, %v2180_v17 }
 0x41b   : > { %v6673_v35 = vpop.permute.xlu0 %2444  ;;  %v6675_v0 = vpop.permute.xlu1 %3120  ;;  %v2147_v17 = vsel %vm5258_vm1, %v2131_v32, 0 }
 0x41d   : > { %2548 = vrot.lane.b32.xlu1 %v4051_v63, %s7529_s29  ;;  %2604 = vrot.lane.b32.xlu0 %v6383_v22, %s4524_s10  ;;  %v2148_v22 = vsel %vm421_vm3, %v2132_v41, 0 }
 0x41f   : > { %v6684_v36 = vpop.permute.xlu0 %3122  ;;  %v6686_v9 = vpop.permute.xlu1 %2746 }
 0x421   : > { %2462 = vrot.lane.b32.xlu1 %v4038_v11, %s7531_s24  ;;  %2848 = vrot.lane.b32.xlu0 %v6377_v31, %s4527_s28  ;;  %v2146_v31 = vsel %vm421_vm3, %v2130_v27, 0  ;;  %v2163_v27 = vsel %vm4967_vm7, %v2131_v32, 0  ;;  %vm7537_vm7 = vcmask 1039360   ;;  %vm7544_vm3 = vmmov %vm7539_vm11  ;;  %s7572_s28 = sshll.u32 %s4693_s16, 7 }
 0x422   : > { %v4014_v63 = vcombine.high %v2146_v31, %v2148_v22  ;;  %v4013_v43 = vcombine.low %v2146_v31, %v2148_v22  ;;  %v7534_v22 = vcombine.high %v6423_v47, %v6428_v3  ;;  %vm7538_vm10 = vmmov %vm7537_vm7 }
 0x423   : > { %v6691_v12 = vpop.permute.xlu0 %3118  ;;  %v6693_v62 = vpop.permute.xlu1 %2914  ;;  %v2382_v3 = vsel %vm7538_vm10, %v6614_v30, %v6605_v52  ;;  %v2551_v30 = vsel %vm7540_vm12, %v6650_v33, %v6642_v40  ;;  %vm7546_vm6 = vmmov %vm7537_vm7 }
 0x424   : > { %vm7547_vm13 = vmmov %vm7546_vm6 }
 0x425   : > { %2460 = vrot.lane.b32.xlu1 %v4037_v57, %s7531_s24  ;;  %2682 = vrot.lane.b32.xlu0 %v7533_v4, %s4529_s7  ;;  %v4039_v57 = vcombine.low %v2163_v27, %v2165_v49  ;;  %v2149_v4 = vsel %vm5258_vm1, %v2133_v25, 0  ;;  %v7535_v25 = vcombine.low %v6435_v54, %v6440_v61  ;;  %vm7542_vm1 = vmmov %vm7540_vm12  ;;  %s7361_s7 = scalar_lea.vmem [#allocation9], %s7572_s28 }
 0x426   : > { %v4015_v56 = vcombine.low %v2147_v17, %v2149_v4  ;;  %v2606_v4 = vsel %vm7541_vm14, %v6628_v1, %v6616_v28  ;;  %v2550_v17 = vsel %vm7542_vm1, %v6660_v38, %v6650_v33  ;;  %vm7549_vm10 = vmmov %vm7542_vm1 }
 0x427   : > { %v6708_v58 = vpop.permute.xlu0 %2748  ;;  %v6710_v2 = vpop.permute.xlu1 %2366  ;;  %vm7551_vm12 = vmmov %vm7541_vm14 }
 0x428   : > { %vm7552_vm14 = vmmov %vm7543_vm2 }
 0x429   : > { %3138 = vrot.lane.b32.xlu1 %v4014_v63, %s7532_s26  ;;  %2546 = vrot.lane.b32.xlu0 %v4050_v59, %s7529_s29 }
 0x42b   : > { %v6714_v41 = vpop.permute.xlu0 %2916  ;;  %v6716_v21 = vpop.permute.xlu1 %2364 }
 0x42d   : > { %2544 = vrot.lane.b32.xlu0 %v4049_v8, %s7529_s29  ;;  %3136 = vrot.lane.b32.xlu1 %v4013_v43, %s7532_s26  ;;  %v2383_v43 = vsel %vm7537_vm7, %v6605_v52, %v6607_v19  ;;  %vm7548_vm7 = vmmov %vm7544_vm3  ;;  %s4447_s29 = sshll.u32 %s4533_s11, 4  ;;  %s4448_s29 = int_to_ptr.vmem [resolvable:$false] %s4447_s29 }
 0x42f   : > { %v2369_v26 = vpop.permute.xlu0 %2368  ;;  %v6724_v11 = vpop.permute.xlu1 %2594 }
 0x431   : > { %2464 = vrot.lane.b32.xlu0 %v4039_v57, %s7531_s24  ;;  %2766 = vrot.lane.b32.xlu1 %v7534_v22, %s4531_s13  ;;  %s4449_s24 = scalar_lea.vmem %s4448_s29, 4096 }
 0x433   : > { %v6735_v31 = vpop.permute.xlu0 %2596  ;;  %v6737_v34 = vpop.permute.xlu1 %2838 }
 0x435   : > { %3140 = vrot.lane.b32.xlu0 %v4015_v56, %s7532_s26  ;;  %2932 = vrot.lane.b32.xlu1 %v7535_v25, %s4532_s14  ;;  %v2686_v56 = vsel %vm7544_vm3, %v6636_v7, %v6640_v48  ;;  %v2466_v25 = vsel %vm7545_vm4, %v6662_v29, %v6673_v35  ;;  %v2384_v29 = vsel %vm7547_vm13, %v6716_v21, %v6710_v2  ;;  %vm7558_vm13 = vmmov %vm7549_vm10 }
 0x437   : > { %v6744_v63 = vpop.permute.xlu0 %2836  ;;  %v6746_v59 = vpop.permute.xlu1 %2668 }
 0x439   : > { %2764 = vrot.lane.b32.xlu0 %v7536_v51, %s4531_s13  ;;  %3214 = vrot.lane.b32.xlu1 %v6628_v1, %s7532_s26  ;;  %v2467_v1 = vsel %vm7543_vm2, %v6673_v35, %v6652_v23  ;;  %s4154_s13 = sshll.u32 %s4587_s22, 11  ;;  %s3742_s22 = scalar_lea.sflag [#allocation5], %s4693_s16 }
 0x43a   : > { %s7404_s6 = scalar_lea.hbm %s7457_s5, %s4154_s13 }
 0x43b   : > { %v6754_v32 = vpop.permute.xlu0 %2670  ;;  %v2537_v8 = vpop.permute.xlu1 %2536 }
 0x43d   : > { %2934 = vrot.lane.b32.xlu0 %v4106_v45, %s4532_s14  ;;  %3144 = vrot.lane.b32.xlu1 %v2383_v43, %s7532_s26  ;;  %v2687_v45 = vsel %vm7539_vm11, %v6640_v48, %v6518_v39  ;;  %vm7550_vm11 = vmmov %vm7542_vm1  ;;  %s3755_s14 = sshll.u32 %s7361_s7, 4  ;;  %s7406_s14 = int_to_ptr.vmem [resolvable:$true] %s3755_s14 }
 0x43e   : > { %vm7553_vm1 = vmmov %vm7543_vm2  ;;  %s4443_s9 = scalar_lea.vmem %s7406_s14, 2048  ;;  %p4450_p6 = scmp.lt.s32.totalorder %s7406_s14, %s4448_s29 }
 0x43f   : > { %v2535_v49 = vpop.permute.xlu0 %2534  ;;  %v6764_v47 = vpop.permute.xlu1 %2450  ;;  %vm7554_vm2 = vmmov %vm7544_vm3  ;;  %p4444_p11 = scmp.ne.s32.totalorder %s7406_s14, %s4443_s9  ;;  %p4451_p12 = scmp.lt.s32.totalorder %s4449_s24, %s4443_s9 }
 0x440   : > { %v2553_v21 = vsel %vm7549_vm10, %v2535_v49, %v2537_v8  ;;  %vm7555_vm3 = vmmov %vm7546_vm6 }
 0x441   : > { %3142 = vrot.lane.b32.xlu1 %v2382_v3, %s7532_s26  ;;  %3146 = vrot.lane.b32.xlu0 %v6607_v19, %s7532_s26  ;;  %vm7556_vm4 = vmmov %vm7555_vm3  ;;  %p4445_p1 = pnand %p4444_p11, %p7573_p10  ;;  %p4452_p7 = por %p4451_p12, %p4450_p6 }
 0x443   : > { %v2533_v27 = vpop.permute.xlu0 %2532  ;;  %v6772_v57 = vpop.permute.xlu1 %2448  ;;  %p4446_p2 = pneg %p4445_p1 }
 0x445   : > { %3218 = vrot.lane.b32.xlu0 %v6616_v28, %s7532_s26  ;;  %3238 = vrot.lane.b32.xlu1 %v6636_v7, %s7532_s26  ;;  %v2385_v7 = vsel %vm7546_vm6, %v6710_v2, %v2369_v26  ;;  %vm7557_vm6 = vmmov %vm7554_vm2  ;;  %p4453_p9 = pnand %p4452_p7, %p4446_p2 }
 0x447   : > { %v2453_v54 = vpop.permute.xlu0 %2452  ;;  %v6778_v61 = vpop.permute.xlu1 %3128 }
 0x449   : > { %3242 = vrot.lane.b32.xlu0 %v2687_v45, %s7532_s26  ;;  %3194 = vrot.lane.b32.xlu1 %v6642_v40, %s7532_s26 }
 0x44b   : > { %v6786_v52 = vpop.permute.xlu0 %3126  ;;  %v6788_v19 = vpop.permute.xlu1 %3124 }
 0x44d   : > { %3192 = vrot.lane.b32.xlu0 %v2551_v30, %s7532_s26  ;;  %3216 = vrot.lane.b32.xlu1 %v2606_v4, %s7532_s26 }
 0x44f   : > { %v6798_v39 = vpop.permute.xlu0 %2752  ;;  %v6800_v22 = vpop.permute.xlu1 %2754 }
 0x451   : > { %3190 = vrot.lane.b32.xlu0 %v2550_v17, %s7532_s26  ;;  %3170 = vrot.lane.b32.xlu1 %v6652_v23, %s7532_s26  ;;  %v2552_v17 = vsel %vm7550_vm11, %v2533_v27, %v2535_v49  ;;  %vm7561_vm11 = vmmov %vm7553_vm1 }
 0x453   : > { %v6808_v40 = vpop.permute.xlu0 %2922  ;;  %v6810_v28 = vpop.permute.xlu1 %2920 }
 0x455   : > { %3168 = vrot.lane.b32.xlu0 %v2467_v1, %s7532_s26  ;;  %3240 = vrot.lane.b32.xlu1 %v2686_v56, %s7532_s26 }
 0x457   : > { %v2373_v33 = vpop.permute.xlu0 %2372  ;;  %v2375_v38 = vpop.permute.xlu1 %2374 }
 0x459   : > { %3166 = vrot.lane.b32.xlu0 %v2466_v25, %s7532_s26  ;;  %3220 = vrot.lane.b32.xlu1 %v6724_v11, %s7532_s26  ;;  %v2469_v25 = vsel %vm7552_vm14, %v6764_v47, %v2453_v54  ;;  %vm7563_vm14 = vmmov %vm7554_vm2 }
 0x45b   : > { %v2371_v23 = vpop.permute.xlu0 %2370  ;;  %v6826_v51 = vpop.permute.xlu1 %2600 }
 0x45d   : > { %3152 = vrot.lane.b32.xlu0 %v2369_v26, %s7532_s26  ;;  %3150 = vrot.lane.b32.xlu1 %v2385_v7, %s7532_s26  ;;  %v2689_v26 = vsel %vm7548_vm7, %v6754_v32, %v6512_v37  ;;  %v2607_v37 = vsel %vm7551_vm12, %v6724_v11, %v6735_v31  ;;  %v2468_v11 = vsel %vm7553_vm1, %v6772_v57, %v6764_v47  ;;  %vm7559_vm7 = vmmov %vm7549_vm10 }
 0x45e   : > { %v2387_v47 = vsel %vm7555_vm3, %v2373_v33, %v2375_v38  ;;  %v2386_v57 = vsel %vm7556_vm4, %v2371_v23, %v2373_v33  ;;  %vm7560_vm10 = vmmov %vm7551_vm12 }
 0x45f   : > { %v2599_v48 = vpop.permute.xlu0 %2598  ;;  %v6832_v43 = vpop.permute.xlu1 %2844  ;;  %vm7562_vm12 = vmmov %vm7553_vm1 }
 0x460   : > { %vm7564_vm1 = vmmov %vm7555_vm3 }
 0x461   : > { %3224 = vrot.lane.b32.xlu0 %v6735_v31, %s7532_s26  ;;  %3148 = vrot.lane.b32.xlu1 %v2384_v29, %s7532_s26  ;;  %v2688_v31 = vsel %vm7554_vm2, %v6746_v59, %v6754_v32  ;;  %vm7565_vm2 = vmmov %vm7564_vm1 }
 0x462   : > { %vm7566_vm3 = vmmov %vm7560_vm10 }
 0x463   : > { %v6840_v35 = vpop.permute.xlu0 %2842  ;;  %v6842_v3 = vpop.permute.xlu1 %2674  ;;  %vm7567_vm4 = vmmov %vm7557_vm6 }
 0x465   : > { %3248 = vrot.lane.b32.xlu0 %v2689_v26, %s7532_s26  ;;  %3244 = vrot.lane.b32.xlu1 %v6746_v59, %s7532_s26  ;;  %v2858_v26 = vsel %vm1188_vm9, %v6840_v35, %v6832_v43 }
 0x467   : > { %v2677_v45 = vpop.permute.xlu0 %2676  ;;  %v2543_v2 = vpop.permute.xlu1 %2542 }
 0x469   : > { %3198 = vrot.lane.b32.xlu0 %v2553_v21, %s7532_s26  ;;  %3200 = vrot.lane.b32.xlu1 %v2537_v8, %s7532_s26 }
 0x46b   : > { %v2541_v30 = vpop.permute.xlu0 %2540  ;;  %v2459_v4 = vpop.permute.xlu1 %2458 }
 0x46d   : > { %3196 = vrot.lane.b32.xlu0 %v2552_v17, %s7532_s26  ;;  %3222 = vrot.lane.b32.xlu1 %v2607_v37, %s7532_s26  ;;  %v2691_v17 = vsel %vm7557_vm6, %v2677_v45, %v6496_v14  ;;  %v2555_v37 = vsel %vm7558_vm13, %v2541_v30, %v2543_v2  ;;  %v2608_v14 = vsel %vm7560_vm10, %v2599_v48, %v6826_v51  ;;  %vm7568_vm6 = vmmov %vm7567_vm4 }
 0x46e   : > { %vm7569_vm13 = vmmov %vm7559_vm7 }
 0x46f   : > { %v2539_v1 = vpop.permute.xlu0 %2538  ;;  %v6859_v56 = vpop.permute.xlu1 %3132  ;;  %vm7570_vm10 = vmmov %vm7561_vm11 }
 0x471   : > { %3176 = vrot.lane.b32.xlu1 %v2453_v54, %s7532_s26  ;;  %3174 = vrot.lane.b32.xlu0 %v2469_v25, %s7532_s26 }
 0x473   : > { %v2457_v8 = vpop.permute.xlu0 %2456  ;;  %v6865_v49 = vpop.permute.xlu1 %2758 }
 0x475   : > { %3246 = vrot.lane.b32.xlu1 %v2688_v31, %s7532_s26  ;;  %3172 = vrot.lane.b32.xlu0 %v2468_v11, %s7532_s26  ;;  %v2554_v31 = vsel %vm7559_vm7, %v2539_v1, %v2541_v30 }
 0x477   : > { %v2455_v27 = vpop.permute.xlu0 %2454  ;;  %v6875_v7 = vpop.permute.xlu1 %2928 }
 0x478   : > { %v2470_v30 = vsel %vm7562_vm12, %v2455_v27, %v2457_v8 }
 0x479   : > { %3226 = vrot.lane.b32.xlu1 %v2599_v48, %s7532_s26  ;;  %3158 = vrot.lane.b32.xlu0 %v2375_v38, %s7532_s26 }
 0x47b   : > { %v6879_v54 = vpop.permute.xlu0 %3134  ;;  %v2379_v29 = vpop.permute.xlu1 %2378 }
 0x47d   : > { %3156 = vrot.lane.b32.xlu1 %v2387_v47, %s7532_s26  ;;  %3230 = vrot.lane.b32.xlu0 %v6826_v51, %s7532_s26  ;;  %v2690_v51 = vsel %vm7563_vm14, %v6842_v3, %v2677_v45 }
 0x47f   : > { %v6885_v59 = vpop.permute.xlu0 %3130  ;;  %v2377_v32 = vpop.permute.xlu1 %2376 }
 0x481   : > { %3154 = vrot.lane.b32.xlu1 %v2386_v57, %s7532_s26  ;;  %3300 = vrot.lane.b32.xlu0 %v2858_v26, %s7532_s26  ;;  %v2471_v26 = vsel %vm7561_vm11, %v2457_v8, %v2459_v4  ;;  %v2859_v8 = vsel %vm1188_vm9, %v6832_v43, %v6516_v46 }
 0x483   : > { %v6893_v21 = vpop.permute.xlu0 %2760  ;;  %v2603_v38 = vpop.permute.xlu1 %2602 }
 0x485   : > { %3254 = vrot.lane.b32.xlu0 %v2691_v17, %s7532_s26  ;;  %3250 = vrot.lane.b32.xlu1 %v6842_v3, %s7532_s26 }
 0x487   : > { %v6900_v33 = vpop.permute.xlu0 %2926  ;;  %v2851_v23 = vpop.permute.xlu1 %2850 }
 0x489   : > { %3204 = vrot.lane.b32.xlu0 %v2555_v37, %s7532_s26  ;;  %3206 = vrot.lane.b32.xlu1 %v2543_v2, %s7532_s26 }
 0x48b   : > { %v2381_v25 = vpop.permute.xlu0 %2380  ;;  %v2681_v11 = vpop.permute.xlu1 %2680 }
 0x48c   : > { %v2389_v3 = vsel %vm7564_vm1, %v2379_v29, %v2381_v25 }
 0x48d   : > { %3202 = vrot.lane.b32.xlu0 %v2554_v31, %s7532_s26  ;;  %3228 = vrot.lane.b32.xlu1 %v2608_v14, %s7532_s26  ;;  %v2388_v31 = vsel %vm7565_vm2, %v2377_v32, %v2379_v29 }
 0x48f   : > { %v2605_v47 = vpop.permute.xlu0 %2604  ;;  %v2549_v57 = vpop.permute.xlu1 %2548 }
 0x491   : > { %3180 = vrot.lane.b32.xlu0 %v2471_v26, %s7532_s26  ;;  %3182 = vrot.lane.b32.xlu1 %v2459_v4, %s7532_s26 }
 0x493   : > { %v2849_v2 = vpop.permute.xlu0 %2848  ;;  %v6913_v17 = vpop.permute.xlu1 %2462 }
 0x495   : > { %3178 = vrot.lane.b32.xlu0 %v2470_v30, %s7532_s26  ;;  %3252 = vrot.lane.b32.xlu1 %v2690_v51, %s7532_s26  ;;  %v2860_v51 = vsel %vm1188_vm9, %v2849_v2, %v2851_v23 }
 0x497   : > { %v2683_v48 = vpop.permute.xlu0 %2682  ;;  %v6920_v1 = vpop.permute.xlu1 %2460 }
 0x499   : > { %3236 = vrot.lane.b32.xlu0 %v2605_v47, %s7532_s26  ;;  %3164 = vrot.lane.b32.xlu1 %v2381_v25, %s7532_s26  ;;  %v2609_v25 = vsel %vm7566_vm3, %v2603_v38, %v2605_v47 }
 0x49b   : > { %v2547_v4 = vpop.permute.xlu0 %2546  ;;  %v6924_v37 = vpop.permute.xlu1 %3138 }
 0x49d   : > { %3302 = vrot.lane.b32.xlu1 %v2859_v8, %s7532_s26  ;;  %3162 = vrot.lane.b32.xlu0 %v2389_v3, %s7532_s26  ;;  %v2692_v3 = vsel %vm7567_vm4, %v2681_v11, %v2683_v48 }
 0x49f   : > { %v2545_v45 = vpop.permute.xlu0 %2544  ;;  %v6932_v27 = vpop.permute.xlu1 %3136 }
 0x4a1   : > { %3160 = vrot.lane.b32.xlu0 %v2388_v31, %s7532_s26  ;;  %3232 = vrot.lane.b32.xlu1 %v2603_v38, %s7532_s26  ;;  %v2861_v38 = vsel %vm1188_vm9, %v2851_v23, %v6510_v13  ;;  %v2693_v31 = vsel %vm7568_vm6, %v2683_v48, %v6488_v10  ;;  %v2557_v23 = vsel %vm7569_vm13, %v2547_v4, %v2549_v57 }
 0x4a2   : > { %v2856_v48 = vsel %vm1188_vm9, %v6744_v63, %v6737_v34 }
 0x4a3   : > { %v2465_v14 = vpop.permute.xlu0 %2464  ;;  %v6937_v26 = vpop.permute.xlu1 %2766 }
 0x4a5   : > { %3298 = vrot.lane.b32.xlu0 %v6840_v35, %s7532_s26  ;;  %3304 = vrot.lane.b32.xlu1 %v2849_v2, %s7532_s26 }
 0x4a7   : > { %v6942_v46 = vpop.permute.xlu0 %3140  ;;  %v6944_v43 = vpop.permute.xlu1 %2932 }
 0x4a9   : > { %3234 = vrot.lane.b32.xlu1 %v2609_v25, %s7532_s26  ;;  %3256 = vrot.lane.b32.xlu0 %v2681_v11, %s7532_s26  ;;  %v2857_v25 = vsel %vm1188_vm9, %v6737_v34, %v6538_v15 }
 0x4ab   : > { %v2765_v29 = vpop.permute.xlu0 %2764  ;;  %v6949_v32 = vpop.permute.xlu1 %3214 }
 0x4ad   : > { %3188 = vrot.lane.b32.xlu1 %v2465_v14, %s7532_s26  ;;  %3212 = vrot.lane.b32.xlu0 %v2549_v57, %s7532_s26 }
 0x4af   : > { %v6953_v35 = vpop.permute.xlu0 %2934  ;;  %v6955_v30 = vpop.permute.xlu1 %3144 }
 0x4b1   : > { %3306 = vrot.lane.b32.xlu1 %v2860_v51, %s7532_s26  ;;  %3308 = vrot.lane.b32.xlu0 %v2861_v38, %s7532_s26  ;;  %v2854_v51 = vsel %vm1188_vm9, %v6634_v55, %v6630_v5  ;;  %v2556_v38 = vsel %vm7559_vm7, %v2545_v45, %v2547_v4 }
 0x4b3   : > { %v6962_v47 = vpop.permute.xlu0 %3146  ;;  %v6964_v8 = vpop.permute.xlu1 %3142 }
 0x4b5   : > { %3258 = vrot.lane.b32.xlu1 %v2692_v3, %s7532_s26  ;;  %3260 = vrot.lane.b32.xlu0 %v2693_v31, %s7532_s26 }
 0x4b7   : > { %v6971_v2 = vpop.permute.xlu0 %3218  ;;  %v3239_v13 = vpop.permute.xlu1 %3238 }
 0x4b9   : > { %3210 = vrot.lane.b32.xlu1 %v2557_v23, %s7532_s26  ;;  %3296 = vrot.lane.b32.xlu0 %v2857_v25, %s7532_s26  ;;  %v2855_v25 = vsel %vm1188_vm9, %v6630_v5, %v6545_v60  ;;  %vm7571_vm9 = vmmov %vm7570_vm10 }
 0x4bb   : > { %v6979_v11 = vpop.permute.xlu0 %3242  ;;  %v3195_v10 = vpop.permute.xlu1 %3194 }
 0x4bd   : > { %3294 = vrot.lane.b32.xlu1 %v2856_v48, %s7532_s26  ;;  %3288 = vrot.lane.b32.xlu0 %v2854_v51, %s7532_s26 }
 0x4bf   : > { %v3193_v15 = vpop.permute.xlu0 %3192  ;;  %v6989_v57 = vpop.permute.xlu1 %3216 }
 0x4c0   : > { %v6993_v3 = vsel %vm564_vm5, %v3193_v15, %v3195_v10  ;;  %v2473_v10 = vsel %vm7570_vm10, %v6913_v17, %v2465_v14 }
 0x4c1   : > { %3292 = vrot.lane.b32.xlu1 %v6744_v63, %s7532_s26  ;;  %3208 = vrot.lane.b32.xlu0 %v2556_v38, %s7532_s26  ;;  %v2777_v38 = vsel %vm1103_vm15, %v6937_v26, %v6556_v42  ;;  %v2774_v42 = vsel %vm1103_vm15, %v6865_v49, %v6893_v21 }
 0x4c3   : > { %v3191_v34 = vpop.permute.xlu0 %3190  ;;  %v3171_v31 = vpop.permute.xlu1 %3170 }
 0x4c4   : > { %v6999_v23 = vsel %vm564_vm5, %v3191_v34, %v3193_v15 }
 0x4c5   : > { %3290 = vrot.lane.b32.xlu1 %v2855_v25, %s7532_s26  ;;  %3286 = vrot.lane.b32.xlu0 %v6634_v55, %s7532_s26  ;;  %v2472_v55 = vsel %vm7571_vm9, %v6920_v1, %v6913_v17  ;;  %v2945_v17 = vsel %vm1273_vm0, %v6953_v35, %v6540_v50  ;;  %v2944_v50 = vsel %vm1273_vm0, %v6944_v43, %v6953_v35 }
 0x4c6   : > { %v2775_v35 = vsel %vm1103_vm15, %v6893_v21, %v6547_v18  ;;  %v2942_v18 = vsel %vm1273_vm0, %v6900_v33, %v6875_v7 }
 0x4c7   : > { %v3169_v4 = vpop.permute.xlu0 %3168  ;;  %v7007_v45 = vpop.permute.xlu1 %3240 }
 0x4c8   : > { %v7011_v63 = vsel %vm564_vm5, %v3239_v13, %v7007_v45  ;;  %v7016_v48 = vsel %vm564_vm5, %v3169_v4, %v3171_v31  ;;  %v2776_v13 = vsel %vm1103_vm15, %v2765_v29, %v6937_v26 }
 0x4c9   : > { %3280 = vrot.lane.b32.xlu1 %v2765_v29, %s7532_s26  ;;  %3186 = vrot.lane.b32.xlu0 %v2473_v10, %s7532_s26  ;;  %v4305_v29 = vld [vmem:[#allocation8 + $0x4] ss:$20 sps:$4 sm:$0xff]  }
 0x4ca   : > { %3522 = vmatprep.mubr.bf16.mxu1 %v4305_v29 }
 0x4cb   : > { %v3167_v60 = vpop.permute.xlu0 %3166  ;;  %v3221_v5 = vpop.permute.xlu1 %3220 }
 0x4cc   : > { %v7024_v51 = vsel %vm564_vm5, %v3167_v60, %v3169_v4 }
 0x4cd   : > { %3184 = vrot.lane.b32.xlu0 %v2472_v55, %s7532_s26  ;;  %3282 = vrot.lane.b32.xlu1 %v2776_v13, %s7532_s26  ;;  %v2943_v55 = vsel %vm1273_vm0, %v6875_v7, %v6576_v6 }
 0x4cf   : > { %v3153_v14 = vpop.permute.xlu0 %3152  ;;  %v3151_v15 = vpop.permute.xlu1 %3150 }
 0x4d0   : > { %v7037_v1 = vsel %vm564_vm5, %v3151_v15, %v3153_v14 }
 0x4d1   : > { %3284 = vrot.lane.b32.xlu0 %v2777_v38, %s7532_s26  ;;  %3332 = vrot.lane.b32.xlu1 %v2945_v17, %s7532_s26 }
 0x4d3   : > { %v3225_v34 = vpop.permute.xlu0 %3224  ;;  %v3149_v31 = vpop.permute.xlu1 %3148 }
 0x4d4   : > { %v7042_v25 = vsel %vm564_vm5, %v3149_v31, %v3151_v15 }
 0x4d5   : > { %3276 = vrot.lane.b32.xlu1 %v2774_v42, %s7532_s26  ;;  %3330 = vrot.lane.b32.xlu0 %v2944_v50, %s7532_s26  ;;  %v2941_v50 = vsel %vm1273_vm0, %v6808_v40, %v6558_v44 }
 0x4d7   : > { %v3249_v26 = vpop.permute.xlu0 %3248  ;;  %v3245_v4 = vpop.permute.xlu1 %3244 }
 0x4d9   : > { %3274 = vrot.lane.b32.xlu1 %v6865_v49, %s7532_s26  ;;  %3328 = vrot.lane.b32.xlu0 %v6944_v43, %s7532_s26  ;;  %v2772_v43 = vsel %vm1103_vm15, %v6798_v39, %v6800_v22 }
 0x4db   : > { %v3199_v10 = vpop.permute.xlu0 %3198  ;;  %v3201_v60 = vpop.permute.xlu1 %3200 }
 0x4dc   : > { %v7063_v13 = vsel %vm564_vm5, %v3199_v10, %v3201_v60 }
 0x4dd   : > { %3326 = vrot.lane.b32.xlu1 %v2943_v55, %s7532_s26  ;;  %3278 = vrot.lane.b32.xlu0 %v2775_v35, %s7532_s26  ;;  %v2771_v35 = vsel %vm1103_vm15, %v6708_v58, %v6578_v53  ;;  %v2972_v53 = vld [vmem:[%s7456_s4 + $0x10] sm:$0xff] }
 0x4df   : > { %v3197_v49 = vpop.permute.xlu0 %3196  ;;  %v3223_v14 = vpop.permute.xlu1 %3222 }
 0x4e0   : > { %v7071_v15 = vsel %vm564_vm5, %v3197_v49, %v3199_v10  ;;  %v7074_v6 = vsel %vm564_vm5, %v3221_v5, %v3223_v14  ;;  %v7080_v21 = vsel %vm564_vm5, %v3223_v14, %v3225_v34  ;;  %v2773_v34 = vsel %vm1103_vm15, %v6800_v22, %v6595_v24 }
 0x4e1   : > { %3270 = vrot.lane.b32.xlu1 %v2772_v43, %s7532_s26  ;;  %3324 = vrot.lane.b32.xlu0 %v2942_v18, %s7532_s26  ;;  %v2770_v24 = vsel %vm1103_vm15, %v6686_v9, %v6708_v58  ;;  %v2940_v22 = vsel %vm1273_vm0, %v6810_v28, %v6808_v40  ;;  %v2939_v40 = vsel %vm1273_vm0, %v6714_v41, %v6597_v16  ;;  %v2971_v43 = vld [vmem:[%s7456_s4 + $0x8] sm:$0xff] }
 0x4e2   : > { %v2938_v16 = vsel %vm1273_vm0, %v6693_v62, %v6714_v41  ;;  %v2974_v41 = vld [vmem:[%s7456_s4 + $0x20] sm:$0xff] }
 0x4e3   : > { %v3175_v38 = vpop.permute.xlu0 %3174  ;;  %v3177_v17 = vpop.permute.xlu1 %3176 }
 0x4e4   : > { %v7085_v29 = vsel %vm564_vm5, %v3175_v38, %v3177_v17  ;;  %v2973_v17 = vld [vmem:[%s7456_s4 + $0x18] sm:$0xff] }
 0x4e5   : > { %3268 = vrot.lane.b32.xlu1 %v6798_v39, %s7532_s26  ;;  %3322 = vrot.lane.b32.xlu0 %v6900_v33, %s7532_s26 }
 0x4e7   : > { %v3173_v5 = vpop.permute.xlu0 %3172  ;;  %v3247_v7 = vpop.permute.xlu1 %3246 }
 0x4e8   : > { %v7095_v31 = vsel %vm564_vm5, %v3173_v5, %v3175_v38  ;;  %v7098_v42 = vsel %vm564_vm5, %v3245_v4, %v3247_v7  ;;  %v7104_v39 = vsel %vm564_vm5, %v3247_v7, %v3249_v26  ;;  %v4317_v4 = vld [vmem:[#allocation8 + $0xc] ss:$20 sps:$4 sm:$0xff]  }
 0x4e9   : > { %3320 = vrot.lane.b32.xlu1 %v2941_v50, %s7532_s26  ;;  %3272 = vrot.lane.b32.xlu0 %v2773_v34, %s7532_s26  ;;  %v2975_v50 = vld [vmem:[%s7456_s4 + $0x28] sm:$0xff] }
 0x4ea   : > { %3595 = vmatprep.mubr.bf16.mxu0 %v4317_v4 }
 0x4eb   : > { %v3159_v33 = vpop.permute.xlu0 %3158  ;;  %v7108_v10 = vpop.permute.xlu1 %3226 }
 0x4ed   : > { %3264 = vrot.lane.b32.xlu1 %v2770_v24, %s7532_s26  ;;  %3318 = vrot.lane.b32.xlu0 %v2940_v22, %s7532_s26 }
 0x4ef   : > { %v7118_v44 = vpop.permute.xlu0 %3230  ;;  %v3157_v26 = vpop.permute.xlu1 %3156 }
 0x4f1   : > { %3262 = vrot.lane.b32.xlu1 %v6686_v9, %s7532_s26  ;;  %3316 = vrot.lane.b32.xlu0 %v6810_v28, %s7532_s26  ;;  %v2970_v9 = vld [vmem:[%s7456_s4] sm:$0xff] }
 0x4f3   : > { %v7124_v60 = vpop.permute.xlu0 %3300  ;;  %v3155_v55 = vpop.permute.xlu1 %3154 }
 0x4f5   : > { %3314 = vrot.lane.b32.xlu1 %v2939_v40, %s7532_s26  ;;  %3266 = vrot.lane.b32.xlu0 %v2771_v35, %s7532_s26  ;;  %v2977_v40 = vld [vmem:[%s7456_s4 + $0x38] sm:$0xff] }
 0x4f7   : > { %v7137_v28 = vpop.permute.xlu0 %3254  ;;  %v7139_v49 = vpop.permute.xlu1 %3250 }
 0x4f9   : > { %3312 = vrot.lane.b32.xlu0 %v2938_v16, %s7532_s26  ;;  %2980 = vperm.xlu1 %4242, %v2970_v9  }
 0x4fb   : > { %v7148_v58 = vpop.permute.xlu0 %3204  ;;  %v7150_v14 = vpop.permute.xlu1 %3206 }
 0x4fd   : > { %3310 = vrot.lane.b32.xlu0 %v6693_v62, %s7532_s26  ;;  %2990 = vperm.xlu1 %4242, %v2972_v53   ;;  %v2976_v62 = vld [vmem:[%s7456_s4 + $0x30] sm:$0xff] }
 0x4ff   : > { %v7160_v18 = vpop.permute.xlu0 %3202  ;;  %v7162_v38 = vpop.permute.xlu1 %3228 }
 0x501   : > { %2985 = vperm.xlu0 %4241, %v2971_v43   ;;  %3000 = vperm.xlu1 %4242, %v2974_v41  }
 0x503   : > { %v3181_v5 = vpop.permute.xlu0 %3180  ;;  %v3183_v7 = vpop.permute.xlu1 %3182 }
 0x504   : > { %v7171_v34 = vsel %vm564_vm5, %v3181_v5, %v3183_v7 }
 0x505   : > { %2995 = vperm.xlu0 %4241, %v2973_v17   ;;  %3010 = vperm.xlu1 %4242, %v2976_v62  }
 0x507   : > { %v3179_v24 = vpop.permute.xlu0 %3178  ;;  %v3253_v22 = vpop.permute.xlu1 %3252 }
 0x508   : > { %v7177_v4 = vsel %vm564_vm5, %v3179_v24, %v3181_v5  ;;  %v3347_v5 = vsel %vm564_vm5, %v3157_v26, %v3159_v33  ;;  %v3346_v24 = vsel %vm564_vm5, %v3155_v55, %v3157_v26  ;;  %v3339_v55 = vsel %vm564_vm5, %v6859_v56, %v6879_v54 }
 0x509   : > { %3005 = vperm.xlu0 %4241, %v2975_v50   ;;  %v3379_v54 = vsel %vm564_vm5, %v3253_v22, %v7137_v28 }
 0x50b   : > { %v7182_v35 = vpop.permute.xlu0 %3236  ;;  %v3165_v9 = vpop.permute.xlu1 %3164 }
 0x50d   : > { %3015 = vperm.xlu0 %4241, %v2977_v40  }
 0x50f   : > { %v3163_v16 = vpop.permute.xlu0 %3162  ;;  %v7184_v53 = vpop.permute.xlu1 %3302 }
 0x510   : > { %v3349_v43 = vsel %vm564_vm5, %v3163_v16, %v3165_v9 }
 0x511   : > { %3490 = vmatprep.subr.bf16.mxu1 %v3349_v43 }
 0x513   : > { %v3161_v41 = vpop.permute.xlu0 %3160  ;;  %v7187_v17 = vpop.permute.xlu1 %3232 }
 0x514   : > { %v3348_v62 = vsel %vm564_vm5, %v3161_v41, %v3163_v16  ;;  %v3343_v16 = vsel %vm564_vm5, %v6955_v30, %v6962_v47  ;;  %v3342_v41 = vsel %vm564_vm5, %v6964_v8, %v6955_v30  ;;  %v3340_v47 = vsel %vm564_vm5, %v6932_v27, %v6924_v37 }
 0x515   : > { %3491 = vmatpush1.bf16.msra.mxu1 %v3348_v62 }
 0x516   : > { %3492 = vmatprep.subr.bf16.mxu1 %v3347_v5 }
 0x517   : > { %v7191_v7 = vpop.permute.xlu0 %3298  ;;  %v7193_v50 = vpop.permute.xlu1 %3304 }
 0x519   : > { %3493 = vmatpush1.bf16.msra.mxu1 %v3346_v24 }
 0x51a   : > { %3494 = vmatprep.subr.bf16.mxu1 %v7037_v1  ;;  %v3341_v1 = vsel %vm564_vm5, %v6924_v37, %v6942_v46  ;;  %v3338_v46 = vsel %vm564_vm5, %v6885_v59, %v6859_v56  ;;  %v3337_v37 = vsel %vm564_vm5, %v6786_v52, %v6778_v61  ;;  %v3336_v56 = vsel %vm564_vm5, %v6788_v19, %v6786_v52 }
 0x51b   : > { %v3257_v40 = vpop.permute.xlu0 %3256  ;;  %v3235_v9 = vpop.permute.xlu1 %3234  ;;  %v3378_v59 = vsel %vm564_vm5, %v7139_v49, %v3253_v22  ;;  %v3335_v61 = vsel %vm564_vm5, %v6675_v0, %v6684_v36  ;;  %v3334_v52 = vsel %vm564_vm5, %v6691_v12, %v6675_v0  ;;  %v3375_v36 = vsel %vm564_vm5, %v7007_v45, %v6979_v11 }
 0x51c   : > { %v3363_v0 = vsel %vm564_vm5, %v7148_v58, %v7150_v14  ;;  %v3373_v12 = vsel %vm564_vm5, %v3235_v9, %v7182_v35  ;;  %v3362_v45 = vsel %vm564_vm5, %v7160_v18, %v7148_v58 }
 0x51d   : > { %3495 = vmatpush1.bf16.msra.mxu1 %v7042_v25 }
 0x51e   : > { %3496 = vmatprep.subr.bf16.mxu1 %v3343_v16  ;;  %v3372_v16 = vsel %vm564_vm5, %v7187_v17, %v3235_v9  ;;  %v3394_v17 = vsel %vm564_vm5, %v7191_v7, %v7124_v60  ;;  %v4306_v7 = vld [vmem:[#allocation8 + $0x2c] ss:$20 sps:$4 sm:$0xff]  }
 0x51f   : > { %v3213_v33 = vpop.permute.xlu0 %3212  ;;  %v7201_v43 = vpop.permute.xlu1 %3188 }
 0x521   : > { %3497 = vmatpush1.bf16.msra.mxu1 %v3342_v41 }
 0x522   : > { %3498 = vmatprep.subr.bf16.mxu1 %v3341_v1 }
 0x523   : > { %v7209_v26 = vpop.permute.xlu0 %3308  ;;  %v7211_v25 = vpop.permute.xlu1 %3306 }
 0x525   : > { %3499 = vmatpush1.bf16.msra.mxu1 %v3340_v47 }
 0x526   : > { %3500 = vmatprep.subr.bf16.mxu1 %v3339_v55 }
 0x527   : > { %v3261_v30 = vpop.permute.xlu0 %3260  ;;  %v3259_v8 = vpop.permute.xlu1 %3258 }
 0x528   : > { %v3380_v62 = vsel %vm564_vm5, %v3257_v40, %v3259_v8  ;;  %v3381_v5 = vsel %vm564_vm5, %v3259_v8, %v3261_v30  ;;  %v4308_v30 = vld [vmem:[#allocation8 + $0x28] ss:$20 sps:$4 sm:$0xff]  }
 0x529   : > { %3501 = vmatpush1.bf16.msra.mxu1 %v3338_v46  ;;  %3563 = vmatprep.subr.bf16.mxu0 %v3381_v5  ;;  %v4309_v46 = vld [vmem:[#allocation8 + $0x54] ss:$20 sps:$4 sm:$0xff]  }
 0x52a   : > { %3502 = vmatprep.subr.bf16.mxu1 %v3337_v37  ;;  %3564 = vmatpush1.bf16.msra.mxu0 %v3380_v62 }
 0x52b   : > { %v7229_v27 = vpop.permute.xlu0 %3296  ;;  %3565 = vmatprep.subr.bf16.mxu0 %v3379_v54  ;;  %v3211_v24 = vpop.permute.xlu1 %3210 }
 0x52c   : > { %v3365_v19 = vsel %vm564_vm5, %v3211_v24, %v3213_v33  ;;  %v3370_v33 = vsel %vm564_vm5, %v7108_v10, %v7162_v38  ;;  %v3367_v10 = vsel %vm564_vm5, %v6989_v57, %v6971_v2 }
 0x52d   : > { %3503 = vmatpush1.bf16.msra.mxu1 %v3336_v56 }
 0x52e   : > { %3504 = vmatprep.subr.bf16.mxu1 %v3335_v61  ;;  %3566 = vmatpush1.bf16.msra.mxu0 %v3378_v59  ;;  %v4311_v61 = vld [vmem:[#allocation8 + $0x50] ss:$20 sps:$4 sm:$0xff]  }
 0x52f   : > { %v7239_v40 = vpop.permute.xlu0 %3288  ;;  %3567 = vmatprep.subr.bf16.mxu0 %v7104_v39  ;;  %v7242_v28 = vpop.permute.xlu1 %3294 }
 0x531   : > { %3505 = vmatpush1.bf16.msra.mxu1 %v3334_v52 }
 0x532   : > { %3506 = vmatprep.subr.bf16.mxu1 %v3365_v19  ;;  %3568 = vmatpush1.bf16.msra.mxu0 %v7098_v42 }
 0x533   : > { %v3209_v49 = vpop.permute.xlu0 %3208  ;;  %3569 = vmatprep.subr.bf16.mxu0 %v3375_v36  ;;  %v3293_v22 = vpop.permute.xlu1 %3292 }
 0x534   : > { %v3364_v39 = vsel %vm564_vm5, %v3209_v49, %v3211_v24  ;;  %v3392_v9 = vsel %vm564_vm5, %v3293_v22, %v7242_v28 }
 0x535   : > { %3507 = vmatpush2.bf16.msra.mxu1 %v3364_v39  ;;  %v4314_v39 = vld [vmem:[#allocation8 + $0x78] ss:$20 sps:$4 sm:$0xff]  }
 0x536   : > { %3508 = vmatprep.subr.bf16.mxu1 %v3363_v0  ;;  %3570 = vmatpush1.bf16.msra.mxu0 %v7011_v63  ;;  %v3371_v63 = vsel %vm564_vm5, %v7162_v38, %v7118_v44  ;;  %v3396_v38 = vsel %vm564_vm5, %v7193_v50, %v7211_v25 }
 0x537   : > { %v7259_v42 = vpop.permute.xlu0 %3286  ;;  %3571 = vmatprep.subr.bf16.mxu0 %v3373_v12  ;;  %v3291_v11 = vpop.permute.xlu1 %3290  ;;  %v4315_v12 = vld [vmem:[#allocation8 + $0x8] ss:$20 sps:$4 sm:$0xff]  }
 0x539   : > { %3509 = vmatpush2.bf16.msra.mxu1 %v3362_v45 }
 0x53a   : > { %3510 = vmatprep.subr.bf16.mxu1 %v7063_v13  ;;  %3572 = vmatpush1.bf16.msra.mxu0 %v3372_v16 }
 0x53b   : > { %v3187_v14 = vpop.permute.xlu0 %3186  ;;  %3573 = vmatprep.subr.bf16.mxu0 %v3371_v63  ;;  %v7270_v35 = vpop.permute.xlu1 %3280 }
 0x53c   : > { %v3357_v44 = vsel %vm564_vm5, %v3187_v14, %v7201_v43 }
 0x53d   : > { %3511 = vmatpush2.bf16.msra.mxu1 %v7071_v15 }
 0x53e   : > { %3512 = vmatprep.subr.bf16.mxu1 %v6993_v3  ;;  %3574 = vmatpush1.bf16.msra.mxu0 %v3370_v33  ;;  %v4321_v33 = vld [vmem:[#allocation8 + $0x30] ss:$20 sps:$4 sm:$0xff]  }
 0x53f   : > { %v3185_v58 = vpop.permute.xlu0 %3184  ;;  %3575 = vmatprep.subr.bf16.mxu0 %v7080_v21  ;;  %v3283_v13 = vpop.permute.xlu1 %3282  ;;  %v3366_v21 = vsel %vm564_vm5, %v6949_v32, %v6989_v57  ;;  %v3395_v32 = vsel %vm564_vm5, %v7124_v60, %v7184_v53  ;;  %v4303_v53 = vld [vmem:[#allocation8] ss:$20 sps:$4 sm:$0xff]  }
 0x540   : > { %v3356_v18 = vsel %vm564_vm5, %v3185_v58, %v3187_v14  ;;  %v3388_v8 = vsel %vm564_vm5, %v7270_v35, %v3283_v13  ;;  %v4320_v35 = vld [vmem:[#allocation8 + $0x10] ss:$20 sps:$4 sm:$0xff]  }
 0x541   : > { %3513 = vmatpush2.bf16.msra.mxu1 %v6999_v23  ;;  %v3397_v23 = vsel %vm564_vm5, %v7211_v25, %v7209_v26  ;;  %v4322_v58 = vld [vmem:[#allocation8 + $0x5c] ss:$20 sps:$4 sm:$0xff]  }
 0x542   : > { %3514 = vmatprep.subr.bf16.mxu1 %v3357_v44  ;;  %3576 = vmatpush1.bf16.msra.mxu0 %v7074_v6  ;;  %v4325_v44 = vld [vmem:[#allocation8 + $0x58] ss:$20 sps:$4 sm:$0xff]  }
 0x543   : > { %v3285_v15 = vpop.permute.xlu0 %3284  ;;  %3577 = vmatprep.subr.bf16.mxu0 %v3367_v10  ;;  %v3333_v3 = vpop.permute.xlu1 %3332  ;;  %v4326_v10 = vld [vmem:[#allocation8 + $0x84] ss:$20 sps:$4 sm:$0xff]  }
 0x544   : > { %v3389_v26 = vsel %vm564_vm5, %v3283_v13, %v3285_v15  ;;  %v4324_v13 = vld [vmem:[#allocation8 + $0x38] ss:$20 sps:$4 sm:$0xff]   ;;  %v4328_v15 = vld [vmem:[#allocation8 + $0x60] ss:$20 sps:$4 sm:$0xff]  }
 0x545   : > { %3515 = vmatpush2.bf16.msra.mxu1 %v3356_v18  ;;  %v4330_v18 = vld [vmem:[#allocation8 + $0x88] ss:$20 sps:$4 sm:$0xff]  }
 0x546   : > { %3516 = vmatprep.subr.bf16.mxu1 %v7171_v34  ;;  %3578 = vmatpush1.bf16.msra.mxu0 %v3366_v21 }
 0x547   : > { %v3331_v6 = vpop.permute.xlu0 %3330  ;;  %3579 = vmatprep.subr.bf16.mxu0 %v3397_v23  ;;  %v3277_v2 = vpop.permute.xlu1 %3276 }
 0x548   : > { %v3405_v60 = vsel %vm564_vm5, %v3331_v6, %v3333_v3  ;;  %v4329_v3 = vld [vmem:[#allocation8 + $0x80] ss:$20 sps:$4 sm:$0xff]  }
 0x549   : > { %3517 = vmatpush2.bf16.msra.mxu1 %v7177_v4 }
 0x54a   : > { %3518 = vmatprep.subr.bf16.mxu1 %v7085_v29  ;;  %3580 = vmatpush2.bf16.msra.mxu0 %v3396_v38  ;;  %v3393_v29 = vsel %vm564_vm5, %v7242_v28, %v7229_v27  ;;  %v4312_v28 = vld [vmem:[#allocation8 + $0x7c] ss:$20 sps:$4 sm:$0xff]  }
 0x54b   : > { %v3329_v57 = vpop.permute.xlu0 %3328  ;;  %3581 = vmatprep.subr.bf16.mxu0 %v3395_v32  ;;  %v3275_v34 = vpop.permute.xlu1 %3274 }
 0x54c   : > { %v3404_v41 = vsel %vm564_vm5, %v3329_v57, %v3331_v6  ;;  %v3386_v54 = vsel %vm564_vm5, %v3275_v34, %v3277_v2 }
 0x54d   : > { %3519 = vmatpush2.bf16.msra.mxu1 %v7095_v31 }
 0x54e   : > { %3520 = vmatprep.subr.bf16.mxu1 %v7016_v48  ;;  %3582 = vmatpush2.bf16.msra.mxu0 %v3394_v17  ;;  %v3391_v48 = vsel %vm564_vm5, %v7239_v40, %v3291_v11 }
 0x54f   : > { %v3279_v4 = vpop.permute.xlu0 %3278  ;;  %3583 = vmatprep.subr.bf16.mxu0 %v3393_v29  ;;  %v3327_v50 = vpop.permute.xlu1 %3326 }
 0x550   : > { %v3387_v62 = vsel %vm564_vm5, %v3277_v2, %v3279_v4 }
 0x551   : > { %3521 = vmatpush2.bf16.msra.mxu1 %v7024_v51  ;;  %v3390_v51 = vsel %vm564_vm5, %v7259_v42, %v7239_v40  ;;  %v4318_v42 = vld [vmem:[#allocation8 + $0x34] ss:$20 sps:$4 sm:$0xff]  }
 0x552   : > { %3584 = vmatpush2.bf16.msra.mxu0 %v3392_v9  ;;  %3644 = vmatprep.subr.bf16.mxu1 %v3405_v60 }
 0x553   : > { %v3325_v31 = vpop.permute.xlu0 %3324  ;;  %3585 = vmatprep.subr.bf16.mxu0 %v3391_v48  ;;  %v3271_v43 = vpop.permute.xlu1 %3270 }
 0x554   : > { %3523 = vmatmul.mubr.bf16.vlgmr.msra.gmra.mxu1 %v4303_v53  ;;  %v3403_v1 = vsel %vm564_vm5, %v3325_v31, %v3327_v50 }
 0x555   : > { %3645 = vmatpush1.bf16.msra.mxu1 %v3404_v41  ;;  %3532 = vmatprep.mubr.bf16.mxu1 %v4306_v7 }
 0x556   : > { %3586 = vmatpush2.bf16.msra.mxu0 %v3390_v51  ;;  %3646 = vmatprep.subr.bf16.mxu1 %v3403_v1 }
 0x557   : > { %v3323_v25 = vpop.permute.xlu0 %3322  ;;  %3587 = vmatprep.subr.bf16.mxu0 %v3389_v26  ;;  %v3269_v47 = vpop.permute.xlu1 %3268 }
 0x558   : > { %v3402_v55 = vsel %vm564_vm5, %v3323_v25, %v3325_v31  ;;  %v3384_v40 = vsel %vm564_vm5, %v3269_v47, %v3271_v43 }
 0x559   : > { %3647 = vmatpush1.bf16.msra.mxu1 %v3402_v55 }
 0x55a   : > { %3588 = vmatpush2.bf16.msra.mxu0 %v3388_v8 }
 0x55b   : > { %v3273_v5 = vpop.permute.xlu0 %3272  ;;  %3589 = vmatprep.subr.bf16.mxu0 %v3387_v62  ;;  %v3321_v37 = vpop.permute.xlu1 %3320 }
 0x55c   : > { %3533 = vmatmul.mubr.bf16.gmra.mxu1 %v4308_v30  ;;  %v3385_v27 = vsel %vm564_vm5, %v3271_v43, %v3273_v5 }
 0x55d   : > { %3542 = vmatprep.mubr.bf16.mxu1 %v4309_v46 }
 0x55e   : > { %3590 = vmatpush2.bf16.msra.mxu0 %v3386_v54  ;;  %v4331_v54 = vld [vmem:[%s4699_s30] sm:$0xff] }
 0x55f   : > { %v3319_v24 = vpop.permute.xlu0 %3318  ;;  %3591 = vmatprep.subr.bf16.mxu0 %v3385_v27  ;;  %v3265_v56 = vpop.permute.xlu1 %3264 }
 0x560   : > { %v3401_v59 = vsel %vm564_vm5, %v3319_v24, %v3321_v37 }
 0x561   : > { %3648 = vmatprep.subr.bf16.mxu1 %v3401_v59 }
 0x562   : > { %3592 = vmatpush2.bf16.msra.mxu0 %v3384_v40 }
 0x563   : > { %v3317_v52 = vpop.permute.xlu0 %3316  ;;  %v3263_v36 = vpop.permute.xlu1 %3262 }
 0x564   : > { %v3400_v19 = vsel %vm564_vm5, %v3317_v52, %v3319_v24  ;;  %3543 = vmatmul.mubr.bf16.gmra.mxu1 %v4311_v61  ;;  %v3382_v0 = vsel %vm564_vm5, %v3263_v36, %v3265_v56  ;;  %v4332_v52 = vld [vmem:[%s4699_s30 + $0x8] sm:$0xff] }
 0x565   : > { %3649 = vmatpush1.bf16.msra.mxu1 %v3400_v19  ;;  %3552 = vmatprep.mubr.bf16.mxu1 %v4312_v28 }
 0x567   : > { %v3267_v49 = vpop.permute.xlu0 %3266  ;;  %v3315_v11 = vpop.permute.xlu1 %3314 }
 0x568   : > { %v3383_v22 = vsel %vm564_vm5, %v3265_v56, %v3267_v49 }
 0x569   : > { %3593 = vmatprep.subr.bf16.mxu0 %v3383_v22 }
 0x56a   : > { %3594 = vmatpush2.bf16.msra.mxu0 %v3382_v0 }
 0x56b   : > { %v3313_v45 = vpop.permute.xlu0 %3312 }
 0x56c   : > { %3553 = vmatmul.mubr.bf16.gmra.mxu1 %v4314_v39  ;;  %v3399_v16 = vsel %vm564_vm5, %v3313_v45, %v3315_v11 }
 0x56d   : > { %3596 = vmatmul.mubr.bf16.vlgmr.msra.gmra.mxu0 %v4315_v12  ;;  %3650 = vmatprep.subr.bf16.mxu1 %v3399_v16  ;;  %v4333_v12 = vld [vmem:[%s4699_s30 + $0x10] sm:$0xff] }
 0x56e   : > { %3668 = vmatprep.mubr.bf16.mxu1 %v7524_v20  ;;  %3605 = vmatprep.mubr.bf16.mxu0 %v4318_v42 }
 0x56f   : > { %v3311_v63 = vpop.permute.xlu0 %3310 }
 0x570   : > { %v3398_v14 = vsel %vm564_vm5, %v3311_v63, %v3313_v45 }
 0x571   : > { %3651 = vmatpush1.bf16.msra.mxu1 %v3398_v14 }
 0x574   : > { %4128 = vmatmul.mubr.msk.bf16.vlgmr.msra.gmra.mxu1 %vm1814_vm8, %v4320_v35  ;;  %v2981_v7 = vpop.permute.xlu1 %2980 }
 0x575   : > { %3606 = vmatmul.mubr.bf16.gmra.mxu0 %v4321_v33  ;;  %3678 = vmatprep.mubr.bf16.mxu1 %v7524_v20  ;;  %v4334_v33 = vld [vmem:[%s4699_s30 + $0x18] sm:$0xff] }
 0x576   : > { %3615 = vmatprep.mubr.bf16.mxu0 %v4322_v58 }
 0x578   : > { %v2991_v59 = vpop.permute.xlu1 %2990 }
 0x57c   : > { %4129 = vmatmul.mubr.msk.bf16.gmra.mxu1 %vm1814_vm8, %v4324_v13  ;;  %v2986_v25 = vpop.permute.xlu0 %2985 }
 0x57d   : > { %3616 = vmatmul.mubr.bf16.gmra.mxu0 %v4325_v44  ;;  %3688 = vmatprep.mubr.bf16.mxu1 %v7524_v20 }
 0x57e   : > { %3625 = vmatprep.mubr.bf16.mxu0 %v4326_v10 }
 0x580   : > { %v2996_v16 = vpop.permute.xlu0 %2995 }
 0x584   : > { %4130 = vmatmul.mubr.msk.bf16.gmra.mxu1 %vm1814_vm8, %v4328_v15 }
 0x585   : > { %3626 = vmatmul.mubr.bf16.gmra.mxu0 %v4329_v3  ;;  %3698 = vmatprep.mubr.bf16.mxu1 %v7524_v20 }
 0x58c   : > { %4131 = vmatmul.mubr.msk.bf16.gmra.mxu1 %vm1814_vm8, %v4330_v18  ;;  %v4335_v18 = vld [vmem:[%s4699_s30 + $0x20] sm:$0xff] }
 0x614   : > { %v3524_v21 = vpop.f32.mrf.mxu1 }
 0x615   : > { %v3525_v31 = vadd.f32 %v3524_v21, %v2981_v7 }
 0x616   : > { %v3526_v23 = vpop.f32.mrf.mxu1 }
 0x617   : > { %v3527_v1 = vadd.f32 %v3526_v23, %v2981_v7 }
 0x618   : > { %v3528_v6 = vpop.f32.mrf.mxu1 }
 0x619   : > { %v3529_v55 = vadd.f32 %v3528_v6, %v2986_v25 }
 0x61a   : > { %v3530_v2 = vpop.f32.mrf.mxu1 }
 0x61b   : > { %v3531_v5 = vadd.f32 %v3530_v2, %v2986_v25  ;;  %v3001_v2 = vpop.permute.xlu1 %3000 }
 0x61c   : > { %v3534_v38 = vpop.f32.mrf.mxu1 }
 0x61d   : > { %v3535_v40 = vadd.f32 %v3534_v38, %v2991_v59 }
 0x61e   : > { %v3536_v32 = vpop.f32.mrf.mxu1 }
 0x61f   : > { %v3537_v39 = vadd.f32 %v3536_v32, %v2991_v59 }
 0x620   : > { %v3538_v57 = vpop.f32.mrf.mxu1 }
 0x621   : > { %v3539_v14 = vadd.f32 %v3538_v57, %v2996_v16 }
 0x622   : > { %v3540_v34 = vpop.f32.mrf.mxu1 }
 0x623   : > { %v3541_v15 = vadd.f32 %v3540_v34, %v2996_v16 }
 0x624   : > { %v7342_v17 = vpop.f32.mrf.mxu1 }
 0x625   : > { %v3545_v32 = vadd.f32 %v7342_v17, %v3001_v2  ;;  %v3006_v17 = vpop.permute.xlu0 %3005 }
 0x626   : > { %v7344_v29 = vpop.f32.mrf.mxu1 }
 0x628   : > { %v7346_v4 = vpop.f32.mrf.mxu1 }
 0x62a   : > { %v7348_v50 = vpop.f32.mrf.mxu1 }
 0x62c   : > { %v7350_v20 = vpop.f32.mrf.mxu1 }
 0x62d   : > { %v3597_v53 = vpop.f32.mrf.mxu0 }
 0x62e   : > { %v7352_v9 = vpop.f32.mrf.mxu1  ;;  %v3598_v51 = vadd.f32 %v3597_v53, %v3525_v31  ;;  %v4336_v53 = vld [vmem:[%s4699_s30 + $0x28] sm:$0xff] }
 0x62f   : > { %v3599_v60 = vpop.f32.mrf.mxu0 }
 0x630   : > { %v7354_v48 = vpop.f32.mrf.mxu1  ;;  %v3600_v30 = vadd.f32 %v3599_v60, %v3527_v1 }
 0x631   : > { %v3601_v43 = vpop.f32.mrf.mxu0 }
 0x632   : > { %v7356_v41 = vpop.f32.mrf.mxu1  ;;  %v3602_v37 = vadd.f32 %v3601_v43, %v3529_v55  ;;  %v3547_v43 = vadd.f32 %v7344_v29, %v3001_v2  ;;  %v4345_v2 = vld [vmem:[%s4699_s30 + $0x70] sm:$0xff] }
 0x633   : > { %v3603_v26 = vpop.f32.mrf.mxu0 }
 0x634   : > { %v3670_v47 = vpop.f32.mrf.mxu1  ;;  %v3604_v28 = vadd.f32 %v3603_v26, %v3531_v5 }
 0x635   : > { %v3671_v8 = vadd.f32 %v3670_v47, %v3598_v51  ;;  %v3607_v46 = vpop.f32.mrf.mxu0  ;;  %v4337_v51 = vld [vmem:[%s4699_s30 + $0x30] sm:$0xff] }
 0x636   : > { %v3672_v62 = vpop.f32.mrf.mxu1  ;;  %v3608_v0 = vadd.f32 %v3607_v46, %v3535_v40  ;;  %v4338_v46 = vld [vmem:[%s4699_s30 + $0x38] sm:$0xff] }
 0x637   : > { %v3709_v27 = vadd.f32 %v4331_v54, %v3671_v8  ;;  %v3673_v24 = vadd.f32 %v3672_v62, %v3600_v30  ;;  %v3609_v56 = vpop.f32.mrf.mxu0  ;;  %v3549_v30 = vadd.f32 %v7346_v4, %v3006_v17  ;;  %v3551_v54 = vadd.f32 %v7348_v50, %v3006_v17  ;;  %v3011_v4 = vpop.permute.xlu1 %3010 }
 0x638   : > { %v3674_v61 = vpop.f32.mrf.mxu1  ;;  %v3610_v35 = vadd.f32 %v3609_v56, %v3537_v39  ;;  %v3557_v39 = vadd.f32 %v7352_v9, %v3011_v4 }
 0x639   : > { %3725 = vst [vmem:[%s7361_s7] sm:$0xff] %v3709_v27  ;;  %v3710_v19 = vadd.f32 %v4332_v52, %v3673_v24  ;;  %v3675_v36 = vadd.f32 %v3674_v61, %v3602_v37  ;;  %v3611_v49 = vpop.f32.mrf.mxu0  ;;  %v4339_v24 = vld [vmem:[%s4699_s30 + $0x40] sm:$0xff] }
 0x63a   : > { %v3676_v22 = vpop.f32.mrf.mxu1  ;;  %v3612_v3 = vadd.f32 %v3611_v49, %v3539_v14  ;;  %v4342_v14 = vld [vmem:[%s4699_s30 + $0x58] sm:$0xff] }
 0x63b   : > { %3726 = vst [vmem:[%s7361_s7 + $0x8] sm:$0xff] %v3710_v19  ;;  %v3711_v42 = vadd.f32 %v4333_v12, %v3675_v36  ;;  %v3677_v11 = vadd.f32 %v3676_v22, %v3604_v28  ;;  %v3613_v45 = vpop.f32.mrf.mxu0  ;;  %v3555_v28 = vadd.f32 %v7350_v20, %v3011_v4  ;;  %v4340_v19 = vld [vmem:[%s4699_s30 + $0x48] sm:$0xff]  ;;  %v4341_v12 = vld [vmem:[%s4699_s30 + $0x50] sm:$0xff] }
 0x63c   : > { %v3680_v63 = vpop.f32.mrf.mxu1  ;;  %v3614_v57 = vadd.f32 %v3613_v45, %v3541_v15  ;;  %v3016_v45 = vpop.permute.xlu0 %3015 }
 0x63d   : > { %3727 = vst [vmem:[%s7361_s7 + $0x10] sm:$0xff] %v3711_v42  ;;  %v3712_v58 = vadd.f32 %v4334_v33, %v3677_v11  ;;  %v3681_v13 = vadd.f32 %v3680_v63, %v3608_v0  ;;  %v3617_v44 = vpop.f32.mrf.mxu0  ;;  %v3559_v16 = vadd.f32 %v7354_v48, %v3016_v45 }
 0x63e   : > { %v3682_v10 = vpop.f32.mrf.mxu1  ;;  %v3618_v1 = vadd.f32 %v3617_v44, %v3545_v32 }
 0x63f   : > { %3728 = vst [vmem:[%s7361_s7 + $0x18] sm:$0xff] %v3712_v58  ;;  %v3713_v21 = vadd.f32 %v4335_v18, %v3681_v13  ;;  %v3683_v23 = vadd.f32 %v3682_v10, %v3610_v35  ;;  %v3619_v6 = vpop.f32.mrf.mxu0  ;;  %v3561_v13 = vadd.f32 %v7356_v41, %v3016_v45  ;;  %v4343_v10 = vld [vmem:[%s4699_s30 + $0x60] sm:$0xff] }
 0x640   : > { %v3684_v38 = vpop.f32.mrf.mxu1  ;;  %v3620_v8 = vadd.f32 %v3619_v6, %v3547_v43 }
 0x641   : > { %3729 = vst [vmem:[%s7361_s7 + $0x20] sm:$0xff] %v3713_v21  ;;  %v3714_v60 = vadd.f32 %v4336_v53, %v3683_v23  ;;  %v3685_v7 = vadd.f32 %v3684_v38, %v3612_v3  ;;  %v3621_v34 = vpop.f32.mrf.mxu0  ;;  %v4344_v21 = vld [vmem:[%s4699_s30 + $0x68] sm:$0xff] }
 0x642   : > { %v3686_v31 = vpop.f32.mrf.mxu1  ;;  %v3622_v27 = vadd.f32 %v3621_v34, %v3549_v30 }
 0x643   : > { %3730 = vst [vmem:[%s7361_s7 + $0x28] sm:$0xff] %v3714_v60  ;;  %v3715_v26 = vadd.f32 %v4337_v51, %v3685_v7  ;;  %v3687_v25 = vadd.f32 %v3686_v31, %v3614_v57  ;;  %v3623_v47 = vpop.f32.mrf.mxu0  ;;  %v4346_v57 = vld [vmem:[%s4699_s30 + $0x78] sm:$0xff] }
 0x644   : > { %v3690_v55 = vpop.f32.mrf.mxu1  ;;  %v3624_v52 = vadd.f32 %v3623_v47, %v3551_v54 }
 0x645   : > { %3731 = vst [vmem:[%s7361_s7 + $0x30] sm:$0xff] %v3715_v26  ;;  %v3716_v62 = vadd.f32 %v4338_v46, %v3687_v25  ;;  %v3691_v5 = vadd.f32 %v3690_v55, %v3618_v1  ;;  %v3627_v29 = vpop.f32.mrf.mxu0 }
 0x646   : > { %v3692_v37 = vpop.f32.mrf.mxu1  ;;  %v3628_v0 = vadd.f32 %v3627_v29, %v3555_v28 }
 0x647   : > { %3732 = vst [vmem:[%s7361_s7 + $0x38] sm:$0xff] %v3716_v62  ;;  %v3717_v56 = vadd.f32 %v4339_v24, %v3691_v5  ;;  %v3693_v59 = vadd.f32 %v3692_v37, %v3620_v8  ;;  %v3629_v61 = vpop.f32.mrf.mxu0 }
 0x648   : > { %v3694_v40 = vpop.f32.mrf.mxu1  ;;  %v3630_v63 = vadd.f32 %v3629_v61, %v3557_v39 }
 0x649   : > { %3733 = vst [vmem:[%s7361_s7 + $0x40] sm:$0xff] %v3717_v56  ;;  %v3718_v36 = vadd.f32 %v4340_v19, %v3693_v59  ;;  %v3695_v49 = vadd.f32 %v3694_v40, %v3622_v27  ;;  %v3631_v50 = vpop.f32.mrf.mxu0 }
 0x64a   : > { %v3696_v22 = vpop.f32.mrf.mxu1  ;;  %v3632_v44 = vadd.f32 %v3631_v50, %v3559_v16 }
 0x64b   : > { %3734 = vst [vmem:[%s7361_s7 + $0x48] sm:$0xff] %v3718_v36  ;;  %v3719_v42 = vadd.f32 %v4341_v12, %v3695_v49  ;;  %v3697_v11 = vadd.f32 %v3696_v22, %v3624_v52  ;;  %v3633_v9 = vpop.f32.mrf.mxu0 }
 0x64c   : > { %v3700_v20 = vpop.f32.mrf.mxu1  ;;  %v3634_v18 = vadd.f32 %v3633_v9, %v3561_v13 }
 0x64d   : > { %3735 = vst [vmem:[%s7361_s7 + $0x50] sm:$0xff] %v3719_v42  ;;  %v3720_v35 = vadd.f32 %v4342_v14, %v3697_v11  ;;  %v3701_v33 = vadd.f32 %v3700_v20, %v3628_v0 }
 0x64e   : > { %v3702_v58 = vpop.f32.mrf.mxu1 }
 0x64f   : > { %3736 = vst [vmem:[%s7361_s7 + $0x58] sm:$0xff] %v3720_v35  ;;  %v3721_v15 = vadd.f32 %v4343_v10, %v3701_v33  ;;  %v3703_v48 = vadd.f32 %v3702_v58, %v3630_v63 }
 0x650   : > { %v3704_v3 = vpop.f32.mrf.mxu1 }
 0x651   : > { %3737 = vst [vmem:[%s7361_s7 + $0x60] sm:$0xff] %v3721_v15  ;;  %v3722_v23 = vadd.f32 %v4344_v21, %v3703_v48  ;;  %v3705_v6 = vadd.f32 %v3704_v3, %v3632_v44 }
 0x652   : > { %v3706_v41 = vpop.f32.mrf.mxu1 }
 0x653   : > { %3738 = vst [vmem:[%s7361_s7 + $0x68] sm:$0xff] %v3722_v23  ;;  %v3723_v38 = vadd.f32 %v4345_v2, %v3705_v6  ;;  %v3707_v32 = vadd.f32 %v3706_v41, %v3634_v18 }
 0x655   : > { %3739 = vst [vmem:[%s7361_s7 + $0x70] sm:$0xff] %v3723_v38  ;;  %v3724_v53 = vadd.f32 %v4346_v57, %v3707_v32 }
 0x657   : > { %3740 = vst [vmem:[%s7361_s7 + $0x78] sm:$0xff] %v3724_v53 }
 0x658   : > { %4456 = shalt.err (!%p4453_p9)
}
 0x659   : > { %s4457_s30 = scalar_lea.hbm %s7404_s6, 2048  ;;  %s4461_s10 = scalar_lea.hbm %s7457_s5, 4096 }
 0x65a   : > { %p4458_p13 = scmp.ne.s32.totalorder %s7404_s6, %s4457_s30  ;;  %p4462_p4 = scmp.lt.s32.totalorder %s7404_s6, %s7457_s5 }
 0x65b   : > { %p4463_p8 = scmp.lt.s32.totalorder %s4461_s10, %s4457_s30 }
 0x65c   : > { %p4459_p5 = pnand %p4458_p13, %p7573_p10 }
 0x65d   : > { %p4464_p3 = por %p4463_p8, %p4462_p4 }
 0x65e   : > { %p4460_p0 = pneg %p4459_p5 }
 0x660   : > { %p4465_p11 = pnand %p4464_p3, %p4460_p0 }
 0x662   : > { %4468 = shalt.err (!%p4465_p11)
}
 0x663   : > { %s4534_s13 = smov 256   ;;  %s4535_s17 = smov 16  }
 0x664   : > { %4165 = dma.vmem_to_hbm [thread:$0]  (%p7573_p10), %s7406_s14, 2048, %s7404_s6, %s3742_s22, %s4534_s13, %s4534_s13, %s4535_s17  }
 0x665 PF: > { %s3770_s12 = sand.u32 1, %s4499_s18   ;;  %p7574_p1 = scmp.ne.s32.totalorder %s7489_s25, 0 }
 0x666   : > { %p7575_p2 = scmp.ge.s32.totalorder %s4511_s21, 2  ;;  %s3771_s9 = scalar_lea.sflag [#allocation5], %s3770_s12 }
 0x668   : > { %p4179_p6 = pnand %p7575_p2, %p7574_p1 }
 0x66a   : > { %p4180_p12 = pneg %p4179_p6 }
 0x66c   : > { %4494 = dma.done.wait (%p4180_p12), %s3771_s9, 2048  }
 0x66d   : > { %4496 = vsyncadd (%p4180_p12), %s3771_s9, 4294965248  ;;  %p19_p7 = scmp.ge.s32.totalorder %s4638_s15, 4   ;;  %s7576_s18 = smov %s4503_s19 }
 0x66e   : > { %s7577_s19 = smov %s4507_s20  ;;  %s7578_s20 = smov %s4654_s27 }
 0x66f   : > { %s7579_s21 = smov %s4638_s15  ;;  %21 = sbr.rel (!%p19_p7) target bundleno = 6 (0x6), region = 93 }
 0x674   :  { %3776 = vsyncpa [#allocation4], 1 }
 0x675   :  { %3778 = vsyncpa [#allocation4 + $0x1], 1 }
 0x676   :  { %3779 = vsyncpa [#allocation7], 1 }
 0x677   :  { %3780 = vsyncpa [#allocation5], 1 }
 0x678   :  { %3782 = vsyncpa [#allocation5 + $0x1], 1 }

</bundles_post_ra>
